<compile_context>
chip_gen: v5e
topology: v5e:2x2
jax: 0.10.0
libtpu: 0.0.40
codegen_flags: <defaults>
</compile_context>

<pallas_src>
import jax
import jax.numpy as jnp
from jax.experimental import pallas as pl
from jax.experimental.pallas import tpu as pltpu

N_LAYERS = 4
N_UNITS = 512
OUT_PAD = 128          # lane-dense padded width of the final (512, 1) projection
LEAKY_SLOPE = 0.01     # PyTorch nn.LeakyReLU default


def _round_up(a, m):
    return (a + m - 1) // m * m


def _mlp_kernel(x_ref, w0_ref, b0_ref, wh_ref, bh_ref, wl_ref, bl_ref, o_ref):
    # Linear(inp, 512) + LeakyReLU: bf16 operands, f32 accumulation on the MXU.
    h = jnp.dot(x_ref[...], w0_ref[...], preferred_element_type=jnp.float32)
    h = h + b0_ref[...]
    h = jnp.maximum(h, LEAKY_SLOPE * h)     # LeakyReLU as a single VPU max
    h = h.astype(jnp.bfloat16)

    # 4 x (Linear(512, 512) + tanh), statically unrolled; weights resident.
    for i in range(N_LAYERS):
        z = jnp.dot(h, wh_ref[i], preferred_element_type=jnp.float32) + bh_ref[i]
        h = jnp.tanh(z).astype(jnp.bfloat16)

    # Final Linear(512, 1) padded to 128 lanes (column 0 is the real output).
    out = jnp.dot(h, wl_ref[...], preferred_element_type=jnp.float32) + bl_ref[...]
    o_ref[...] = out.astype(o_ref.dtype)


def _pick_batch_tile(B, tb_cap):
    """Balanced batch tiling: >= 2 (even) grid steps when B allows, TB % 16 == 0."""
    n_tiles = max(pl.cdiv(B, tb_cap), 1)
    if B >= 32:
        n_tiles = max(n_tiles, 2)           # keep both v7x TensorCores busy
    if n_tiles > 1 and n_tiles % 2:
        n_tiles += 1                        # even step count -> balanced megacore halves
    tb = _round_up(pl.cdiv(B, n_tiles), 16)
    # Bump to a 256-row multiple only if the step count is unchanged and the
    # padded total grows by at most 12.5% (avoids the B=520 -> 2x-padding trap).
    tb256 = _round_up(tb, 256)
    if (pl.cdiv(B, tb256) == pl.cdiv(B, tb)
            and pl.cdiv(B, tb256) * tb256 <= (pl.cdiv(B, tb) * tb * 9) // 8):
        tb = tb256
    b_pad = pl.cdiv(B, tb) * tb
    return tb, b_pad


def _vmem_limit_bytes(tb, inp_pad):
    """Scoped-VMEM request sized to the real footprint, capped for v7x (64 MiB)."""
    w_bytes = (inp_pad * N_UNITS + N_LAYERS * N_UNITS * N_UNITS + N_UNITS * OUT_PAD) * 2
    b_bytes = (N_UNITS + N_LAYERS * N_UNITS + OUT_PAD) * 4
    io_bytes = tb * inp_pad * 2 + tb * OUT_PAD * 2
    # Pipeline double-buffers operands; add headroom for in-kernel f32 temps.
    need = 2 * (w_bytes + b_bytes + io_bytes) + 4 * tb * N_UNITS * 4
    return int(min(max(need, 32 << 20), 48 << 20))


def discriminator_forward(x, params, *, tb_cap=1024):
    """x: (B, *inp_shape) or (B, inp). Returns (B, 1) float32."""
    w0, b0, wh, bh, wl, bl = params
    B = x.shape[0]
    x2d = x.reshape(B, -1)
    inp = x2d.shape[1]

    # K padding: keep the first matmul lane-dense for arbitrary feature dims.
    inp_pad = _round_up(inp, 128)

    # bf16 casts (and zero pads) happen ONCE here, not per grid step.
    x_bf = x2d.astype(jnp.bfloat16)
    w0_bf = w0.astype(jnp.bfloat16)
    if inp_pad != inp:
        x_bf = jnp.pad(x_bf, ((0, 0), (0, inp_pad - inp)))
        w0_bf = jnp.pad(w0_bf, ((0, inp_pad - inp), (0, 0)))
    wh_bf = wh.astype(jnp.bfloat16)
    b0_f = b0.astype(jnp.float32).reshape(1, N_UNITS)
    bh_f = bh.astype(jnp.float32).reshape(N_LAYERS, 1, N_UNITS)

    # Lane-dense final projection: (512, 1) -> (512, 128), column 0 = wl.
    wl_pad = (jnp.zeros((N_UNITS, OUT_PAD), jnp.bfloat16)
              .at[:, :1].set(wl.astype(jnp.bfloat16)))
    bl_pad = (jnp.zeros((1, OUT_PAD), jnp.float32)
              .at[:, :1].set(bl.astype(jnp.float32).reshape(1, 1)))

    # Balanced batch tiling (>= 2 even grid steps when B allows -> megacore).
    TB, B_pad = _pick_batch_tile(B, tb_cap)
    if B_pad != B:
        x_bf = jnp.pad(x_bf, ((0, B_pad - B), (0, 0)))
    grid = (B_pad // TB,)

    cost = pl.CostEstimate(
        flops=2 * B_pad * (inp_pad * N_UNITS + N_LAYERS * N_UNITS * N_UNITS
                           + N_UNITS * OUT_PAD),
        transcendentals=N_LAYERS * B_pad * N_UNITS,
        bytes_accessed=(x_bf.size * 2 + w0_bf.size * 2 + wh_bf.size * 2
                        + wl_pad.size * 2 + b0_f.size * 4 + bh_f.size * 4
                        + bl_pad.size * 4 + B_pad * OUT_PAD * 2),
    )

    out = pl.pallas_call(
        _mlp_kernel,
        out_shape=jax.ShapeDtypeStruct((B_pad, OUT_PAD), jnp.bfloat16),
        grid=grid,
        in_specs=[
            pl.BlockSpec((TB, inp_pad), lambda i: (i, 0)),                    # x tile
            pl.BlockSpec((inp_pad, N_UNITS), lambda i: (0, 0)),               # w0 (resident)
            pl.BlockSpec((1, N_UNITS), lambda i: (0, 0)),                     # b0
            pl.BlockSpec((N_LAYERS, N_UNITS, N_UNITS), lambda i: (0, 0, 0)),  # wh (resident)
            pl.BlockSpec((N_LAYERS, 1, N_UNITS), lambda i: (0, 0, 0)),        # bh
            pl.BlockSpec((N_UNITS, OUT_PAD), lambda i: (0, 0)),               # wl padded
            pl.BlockSpec((1, OUT_PAD), lambda i: (0, 0)),                     # bl padded
        ],
        out_specs=pl.BlockSpec((TB, OUT_PAD), lambda i: (i, 0)),
        compiler_params=pltpu.CompilerParams(
            dimension_semantics=("parallel",),            # megacore sharding on v7x
            vmem_limit_bytes=_vmem_limit_bytes(TB, inp_pad),
        ),
        cost_estimate=cost,
    )(x_bf, w0_bf, b0_f, wh_bf, bh_f, wl_pad, bl_pad)

    return out[:B, :1].astype(jnp.float32)


def init_params(key, inp, n_layers=N_LAYERS, n_units=N_UNITS):
    """Deterministic init mimicking nn.Linear: U(-1/sqrt(fan_in), 1/sqrt(fan_in))."""
    ks = jax.random.split(key, 6)

    def uni(k, shape, fan_in):
        bound = 1.0 / jnp.sqrt(jnp.float32(fan_in))
        return jax.random.uniform(
            k, shape, dtype=jnp.float32, minval=-bound, maxval=bound
        )

    w0 = uni(ks[0], (inp, n_units), inp)               # (in, out) layout == W.T
    b0 = uni(ks[1], (1, n_units), inp)
    wh = uni(ks[2], (n_layers, n_units, n_units), n_units)
    bh = uni(ks[3], (n_layers, 1, n_units), n_units)
    wl = uni(ks[4], (n_units, 1), n_units)
    bl = uni(ks[5], (1, 1), n_units)
    return (w0, b0, wh, bh, wl, bl)


def reference_forward(x, params):
    """Pure-JAX f32 reference for correctness check."""
    w0, b0, wh, bh, wl, bl = params
    h = x.reshape(x.shape[0], -1) @ w0 + b0
    h = jnp.where(h >= 0.0, h, LEAKY_SLOPE * h)
    for i in range(N_LAYERS):
        h = jnp.tanh(h @ wh[i] + bh[i])
    return h @ wl + bl


if __name__ == "__main__":
    key = jax.random.PRNGKey(0)
    k_x1, k_p1, k_x2, k_p2 = jax.random.split(key, 4)

    # Case 1: tuple inp_shape (tag=1 flatten branch), (4,16,16) -> 1024 feats,
    # tiny batch -> single grid step path.
    B1, inp_shape1 = 2, (4, 16, 16)
    inp1 = 4 * 16 * 16
    x1 = jax.random.normal(k_x1, (B1,) + inp_shape1, dtype=jnp.float32)
    params1 = init_params(k_p1, inp1)
    out1 = jax.block_until_ready(discriminator_forward(x1, params1))
    ref1 = reference_forward(x1, params1)
    assert out1.shape == (B1, 1)
    # bf16 matmul operands + bf16 output store with f32 accumulation:
    # relaxed tolerance vs the pure-f32 reference.
    assert jnp.allclose(out1, ref1, atol=3e-2, rtol=3e-2), (out1, ref1)

    # Case 2: int inp_shape (tag=0 branch), non-128-multiple feature dim,
    # multi-step grid -> exercises K padding, batch tiling and megacore path.
    B2, inp2 = 96, 192
    x2 = jax.random.normal(k_x2, (B2, inp2), dtype=jnp.float32)
    params2 = init_params(k_p2, inp2)
    out2 = jax.block_until_ready(discriminator_forward(x2, params2))
    ref2 = reference_forward(x2, params2)
    assert out2.shape == (B2, 1)
    assert jnp.allclose(out2, ref2, atol=3e-2, rtol=3e-2), (out2, ref2)

    print("KERNEL_OK")
</pallas_src>

<mosaic_0001>
module attributes {stable_mosaic.version = 11 : i64} {
  func.func @_mlp_kernel(%arg0: i32, %arg1: memref<16x1024xbf16, #tpu.memory_space<vmem>>, %arg2: memref<1024x512xbf16, #tpu.memory_space<vmem>>, %arg3: memref<1x512xf32, #tpu.memory_space<vmem>>, %arg4: memref<4x512x512xbf16, #tpu.memory_space<vmem>>, %arg5: memref<4x1x512xf32, #tpu.memory_space<vmem>>, %arg6: memref<512x128xbf16, #tpu.memory_space<vmem>>, %arg7: memref<1x128xf32, #tpu.memory_space<vmem>>, %arg8: memref<16x128xbf16, #tpu.memory_space<vmem>>) attributes {dimension_semantics = [#tpu.dimension_semantics<parallel>], iteration_bounds = array<i64: 1>, scalar_prefetch = 0 : i64, scratch_operands = 0 : i64, tpu.core_type = #tpu.core_type<tc>, window_params = [{transform_indices = @transform_0, window_bounds = array<i64: 16, 1024>}, {pipeline_mode = #tpu.pipeline_mode<synchronous>, transform_indices = @transform_1, window_bounds = array<i64: 1024, 512>}, {pipeline_mode = #tpu.pipeline_mode<synchronous>, transform_indices = @transform_2, window_bounds = array<i64: 1, 512>}, {pipeline_mode = #tpu.pipeline_mode<synchronous>, transform_indices = @transform_3, window_bounds = array<i64: 4, 512, 512>}, {pipeline_mode = #tpu.pipeline_mode<synchronous>, transform_indices = @transform_4, window_bounds = array<i64: 4, 1, 512>}, {pipeline_mode = #tpu.pipeline_mode<synchronous>, transform_indices = @transform_5, window_bounds = array<i64: 512, 128>}, {pipeline_mode = #tpu.pipeline_mode<synchronous>, transform_indices = @transform_6, window_bounds = array<i64: 1, 128>}, {transform_indices = @transform_7, window_bounds = array<i64: 16, 128>}]} {
    %c0 = arith.constant 0 : index
    %c0_0 = arith.constant 0 : index
    %0 = vector.load %arg1[%c0, %c0_0] : memref<16x1024xbf16, #tpu.memory_space<vmem>>, vector<16x1024xbf16>
    %c0_1 = arith.constant 0 : index
    %c0_2 = arith.constant 0 : index
    %1 = vector.load %arg2[%c0_1, %c0_2] : memref<1024x512xbf16, #tpu.memory_space<vmem>>, vector<1024x512xbf16>
    %cst = arith.constant dense<0.000000e+00> : vector<16x512xf32>
    %2 = tpu.matmul %0, %1, %cst {dimension_numbers = #tpu.dot_dimension_numbers<[1], [0], [0], [1], [0, 0, 1, 1], [], []>} : vector<16x1024xbf16>, vector<1024x512xbf16>, vector<16x512xf32> -> vector<16x512xf32>
    %c0_3 = arith.constant 0 : index
    %c0_4 = arith.constant 0 : index
    %3 = vector.load %arg3[%c0_3, %c0_4] : memref<1x512xf32, #tpu.memory_space<vmem>>, vector<1x512xf32>
    %4 = vector.broadcast %3 : vector<1x512xf32> to vector<16x512xf32>
    %5 = arith.addf %2, %4 : vector<16x512xf32>
    %cst_5 = arith.constant 0.00999999977 : f32
    %6 = vector.broadcast %cst_5 : f32 to vector<16x512xf32>
    %7 = arith.mulf %6, %5 : vector<16x512xf32>
    %8 = arith.maximumf %5, %7 : vector<16x512xf32>
    %9 = arith.truncf %8 : vector<16x512xf32> to vector<16x512xbf16>
    %c0_6 = arith.constant 0 : index
    %c0_7 = arith.constant 0 : index
    %c0_8 = arith.constant 0 : index
    %10 = vector.load %arg4[%c0_6, %c0_7, %c0_8] : memref<4x512x512xbf16, #tpu.memory_space<vmem>>, vector<1x512x512xbf16>
    %11 = vector.shape_cast %10 : vector<1x512x512xbf16> to vector<512x512xbf16>
    %cst_9 = arith.constant dense<0.000000e+00> : vector<16x512xf32>
    %12 = tpu.matmul %9, %11, %cst_9 {dimension_numbers = #tpu.dot_dimension_numbers<[1], [0], [0], [1], [0, 0, 1, 1], [], []>} : vector<16x512xbf16>, vector<512x512xbf16>, vector<16x512xf32> -> vector<16x512xf32>
    %c0_10 = arith.constant 0 : index
    %c0_11 = arith.constant 0 : index
    %c0_12 = arith.constant 0 : index
    %13 = vector.load %arg5[%c0_10, %c0_11, %c0_12] : memref<4x1x512xf32, #tpu.memory_space<vmem>>, vector<1x1x512xf32>
    %14 = vector.shape_cast %13 : vector<1x1x512xf32> to vector<1x512xf32>
    %15 = vector.broadcast %14 : vector<1x512xf32> to vector<16x512xf32>
    %16 = arith.addf %12, %15 : vector<16x512xf32>
    %17 = math.tanh %16 : vector<16x512xf32>
    %18 = arith.truncf %17 : vector<16x512xf32> to vector<16x512xbf16>
    %c1 = arith.constant 1 : index
    %c0_13 = arith.constant 0 : index
    %c0_14 = arith.constant 0 : index
    %19 = vector.load %arg4[%c1, %c0_13, %c0_14] : memref<4x512x512xbf16, #tpu.memory_space<vmem>>, vector<1x512x512xbf16>
    %20 = vector.shape_cast %19 : vector<1x512x512xbf16> to vector<512x512xbf16>
    %cst_15 = arith.constant dense<0.000000e+00> : vector<16x512xf32>
    %21 = tpu.matmul %18, %20, %cst_15 {dimension_numbers = #tpu.dot_dimension_numbers<[1], [0], [0], [1], [0, 0, 1, 1], [], []>} : vector<16x512xbf16>, vector<512x512xbf16>, vector<16x512xf32> -> vector<16x512xf32>
    %c1_16 = arith.constant 1 : index
    %c0_17 = arith.constant 0 : index
    %c0_18 = arith.constant 0 : index
    %22 = vector.load %arg5[%c1_16, %c0_17, %c0_18] : memref<4x1x512xf32, #tpu.memory_space<vmem>>, vector<1x1x512xf32>
    %23 = vector.shape_cast %22 : vector<1x1x512xf32> to vector<1x512xf32>
    %24 = vector.broadcast %23 : vector<1x512xf32> to vector<16x512xf32>
    %25 = arith.addf %21, %24 : vector<16x512xf32>
    %26 = math.tanh %25 : vector<16x512xf32>
    %27 = arith.truncf %26 : vector<16x512xf32> to vector<16x512xbf16>
    %c2 = arith.constant 2 : index
    %c0_19 = arith.constant 0 : index
    %c0_20 = arith.constant 0 : index
    %28 = vector.load %arg4[%c2, %c0_19, %c0_20] : memref<4x512x512xbf16, #tpu.memory_space<vmem>>, vector<1x512x512xbf16>
    %29 = vector.shape_cast %28 : vector<1x512x512xbf16> to vector<512x512xbf16>
    %cst_21 = arith.constant dense<0.000000e+00> : vector<16x512xf32>
    %30 = tpu.matmul %27, %29, %cst_21 {dimension_numbers = #tpu.dot_dimension_numbers<[1], [0], [0], [1], [0, 0, 1, 1], [], []>} : vector<16x512xbf16>, vector<512x512xbf16>, vector<16x512xf32> -> vector<16x512xf32>
    %c2_22 = arith.constant 2 : index
    %c0_23 = arith.constant 0 : index
    %c0_24 = arith.constant 0 : index
    %31 = vector.load %arg5[%c2_22, %c0_23, %c0_24] : memref<4x1x512xf32, #tpu.memory_space<vmem>>, vector<1x1x512xf32>
    %32 = vector.shape_cast %31 : vector<1x1x512xf32> to vector<1x512xf32>
    %33 = vector.broadcast %32 : vector<1x512xf32> to vector<16x512xf32>
    %34 = arith.addf %30, %33 : vector<16x512xf32>
    %35 = math.tanh %34 : vector<16x512xf32>
    %36 = arith.truncf %35 : vector<16x512xf32> to vector<16x512xbf16>
    %c3 = arith.constant 3 : index
    %c0_25 = arith.constant 0 : index
    %c0_26 = arith.constant 0 : index
    %37 = vector.load %arg4[%c3, %c0_25, %c0_26] : memref<4x512x512xbf16, #tpu.memory_space<vmem>>, vector<1x512x512xbf16>
    %38 = vector.shape_cast %37 : vector<1x512x512xbf16> to vector<512x512xbf16>
    %cst_27 = arith.constant dense<0.000000e+00> : vector<16x512xf32>
    %39 = tpu.matmul %36, %38, %cst_27 {dimension_numbers = #tpu.dot_dimension_numbers<[1], [0], [0], [1], [0, 0, 1, 1], [], []>} : vector<16x512xbf16>, vector<512x512xbf16>, vector<16x512xf32> -> vector<16x512xf32>
    %c3_28 = arith.constant 3 : index
    %c0_29 = arith.constant 0 : index
    %c0_30 = arith.constant 0 : index
    %40 = vector.load %arg5[%c3_28, %c0_29, %c0_30] : memref<4x1x512xf32, #tpu.memory_space<vmem>>, vector<1x1x512xf32>
    %41 = vector.shape_cast %40 : vector<1x1x512xf32> to vector<1x512xf32>
    %42 = vector.broadcast %41 : vector<1x512xf32> to vector<16x512xf32>
    %43 = arith.addf %39, %42 : vector<16x512xf32>
    %44 = math.tanh %43 : vector<16x512xf32>
    %45 = arith.truncf %44 : vector<16x512xf32> to vector<16x512xbf16>
    %c0_31 = arith.constant 0 : index
    %c0_32 = arith.constant 0 : index
    %46 = vector.load %arg6[%c0_31, %c0_32] : memref<512x128xbf16, #tpu.memory_space<vmem>>, vector<512x128xbf16>
    %cst_33 = arith.constant dense<0.000000e+00> : vector<16x128xf32>
    %47 = tpu.matmul %45, %46, %cst_33 {dimension_numbers = #tpu.dot_dimension_numbers<[1], [0], [0], [1], [0, 0, 1, 1], [], []>} : vector<16x512xbf16>, vector<512x128xbf16>, vector<16x128xf32> -> vector<16x128xf32>
    %c0_34 = arith.constant 0 : index
    %c0_35 = arith.constant 0 : index
    %48 = vector.load %arg7[%c0_34, %c0_35] : memref<1x128xf32, #tpu.memory_space<vmem>>, vector<1x128xf32>
    %49 = vector.broadcast %48 : vector<1x128xf32> to vector<16x128xf32>
    %50 = arith.addf %47, %49 : vector<16x128xf32>
    %51 = arith.truncf %50 : vector<16x128xf32> to vector<16x128xbf16>
    %c0_36 = arith.constant 0 : index
    %c0_37 = arith.constant 0 : index
    %52 = vector.load %arg8[%c0_36, %c0_37] : memref<16x128xbf16, #tpu.memory_space<vmem>>, vector<16x128xbf16>
    tpu.vector_store %arg8[%c0_36, %c0_37], %51 {strides = array<i32>} : memref<16x128xbf16, #tpu.memory_space<vmem>>, vector<16x128xbf16>,
    return
  }
  func.func @transform_0(%arg0: i32) -> (i32, i32) {
    %c0_i32 = arith.constant 0 : i32
    %c0_i32_0 = arith.constant 0 : i32
    return %arg0, %c0_i32 : i32, i32
  }
  func.func @transform_1(%arg0: i32) -> (i32, i32) {
    %c0_i32 = arith.constant 0 : i32
    %c0_i32_0 = arith.constant 0 : i32
    %c0_i32_1 = arith.constant 0 : i32
    return %c0_i32, %c0_i32_0 : i32, i32
  }
  func.func @transform_2(%arg0: i32) -> (i32, i32) {
    %c0_i32 = arith.constant 0 : i32
    %c0_i32_0 = arith.constant 0 : i32
    %c0_i32_1 = arith.constant 0 : i32
    return %c0_i32, %c0_i32_0 : i32, i32
  }
  func.func @transform_3(%arg0: i32) -> (i32, i32, i32) {
    %c0_i32 = arith.constant 0 : i32
    %c0_i32_0 = arith.constant 0 : i32
    %c0_i32_1 = arith.constant 0 : i32
    %c0_i32_2 = arith.constant 0 : i32
    return %c0_i32, %c0_i32_0, %c0_i32_1 : i32, i32, i32
  }
  func.func @transform_4(%arg0: i32) -> (i32, i32, i32) {
    %c0_i32 = arith.constant 0 : i32
    %c0_i32_0 = arith.constant 0 : i32
    %c0_i32_1 = arith.constant 0 : i32
    %c0_i32_2 = arith.constant 0 : i32
    return %c0_i32, %c0_i32_0, %c0_i32_1 : i32, i32, i32
  }
  func.func @transform_5(%arg0: i32) -> (i32, i32) {
    %c0_i32 = arith.constant 0 : i32
    %c0_i32_0 = arith.constant 0 : i32
    %c0_i32_1 = arith.constant 0 : i32
    return %c0_i32, %c0_i32_0 : i32, i32
  }
  func.func @transform_6(%arg0: i32) -> (i32, i32) {
    %c0_i32 = arith.constant 0 : i32
    %c0_i32_0 = arith.constant 0 : i32
    %c0_i32_1 = arith.constant 0 : i32
    return %c0_i32, %c0_i32_0 : i32, i32
  }
  func.func @transform_7(%arg0: i32) -> (i32, i32) {
    %c0_i32 = arith.constant 0 : i32
    %c0_i32_0 = arith.constant 0 : i32
    return %arg0, %c0_i32 : i32, i32
  }
}

</mosaic_0001>

<bundles_post_ra>
// kernel: tpu_custom_call.1
= control target key start
LH: loop header
LB: loop body
LE: loop exit
PB: predicated region body
PF: predicated region fallthrough
CT: control target
= control target key end

     0   :  { %12 = vsyncpa [#allocation3], 0  ;;  %s11258_s0 = inlined_call_operand.hbm [shape: bf16[16,1024], index: 0, kind: input, shape index: {}]   ;;  %s11259_s1 = inlined_call_operand.hbm [shape: bf16[1024,512], index: 1, kind: input, shape index: {}]   ;;  %s11260_s2 = inlined_call_operand.hbm [shape: f32[1,512], index: 2, kind: input, shape index: {}]   ;;  %s11261_s3 = inlined_call_operand.hbm [shape: bf16[4,512,512], index: 3, kind: input, shape index: {}]   ;;  %s11262_s4 = inlined_call_operand.hbm [shape: f32[4,1,512], index: 4, kind: input, shape index: {}]   ;;  %s11263_s5 = inlined_call_operand.hbm [shape: bf16[512,128], index: 5, kind: input, shape index: {}]   ;;  %s11264_s6 = inlined_call_operand.hbm [shape: f32[1,128], index: 6, kind: input, shape index: {}]   ;;  %s11265_s7 = inlined_call_operand.hbm [shape: bf16[16,128], index: 7, kind: output, shape index: {}]  }
   0x1   :  { %13 = vsyncpa [#allocation6], 0 }
   0x2   :  { %14 = vsyncpa [#allocation9], 0 }
   0x3   :  { %15 = vsyncpa [#allocation12], 0  ;;  %s34_s26 = sshll.u32 %s11259_s1, 4  ;;  %s35_s26 = int_to_ptr.hbm [resolvable:$true] %s34_s26 }
   0x4   :  { %16 = vsyncpa [#allocation4], 0  ;;  %s10925_s27 = smov [#allocation5]   ;;  %s58_s8 = sshll.u32 %s11261_s3, 4  ;;  %s59_s8 = int_to_ptr.hbm [resolvable:$true] %s58_s8 }
   0x5   :  { %s36_s28 = sshll.u32 %s10925_s27, 4  ;;  %s10926_s9 = smov 256   ;;  %s37_s28 = int_to_ptr.vmem [resolvable:$true] %s36_s28 }
   0x6   :  { %s10927_s10 = smov 16   ;;  %s10928_s11 = smov [#allocation8]  }
   0x7   :  { %42 = dma.hbm_to_vmem [thread:$0]  %s35_s26, 32768, %s37_s28, [#allocation6], %s10926_s9, %s10926_s9, %s10927_s10  }
   0x8   :  { %s60_s12 = sshll.u32 %s10928_s11, 4  ;;  %s84_s1 = sshll.u32 %s11263_s5, 4  ;;  %s61_s12 = int_to_ptr.vmem [resolvable:$true] %s60_s12  ;;  %s85_s1 = int_to_ptr.hbm [resolvable:$true] %s84_s1 }
   0x9   :  { %66 = dma.hbm_to_vmem [thread:$0]  %s59_s8, 65536, %s61_s12, [#allocation9], %s10926_s9, %s10926_s9, %s10927_s10  }
   0xa   :  { %s10929_s15 = smov [#allocation11]   ;;  %s21_s3 = sshll.u32 %s11258_s0, 4  ;;  %s22_s3 = int_to_ptr.hbm [resolvable:$true] %s21_s3 }
   0xb   :  { %s86_s16 = sshll.u32 %s10929_s15, 4  ;;  %s10930_s19 = smov 64   ;;  %s87_s16 = int_to_ptr.vmem [resolvable:$true] %s86_s16 }
   0xc   :  { %s10931_s20 = smov 4   ;;  %s10932_s21 = smov [#allocation2]  }
   0xd   :  { %92 = dma.hbm_to_vmem [thread:$0]  %s85_s1, 4096, %s87_s16, [#allocation12], %s10930_s19, %s10930_s19, %s10931_s20  }
   0xe   :  { %s23_s22 = sshll.u32 %s10932_s21, 4  ;;  %s10933_s23 = smov 512   ;;  %s24_s22 = int_to_ptr.vmem [resolvable:$true] %s23_s22 }
   0xf   :  { %s10934_s5 = smov 32   ;;  %s48_s26 = sshll.u32 %s11260_s2, 4  ;;  %s49_s26 = int_to_ptr.hbm [resolvable:$true] %s48_s26 }
  0x10   :  { %29 = dma.hbm_to_vmem [thread:$0]  %s22_s3, 1024, %s24_s22, [#allocation3], %s10933_s23, %s10933_s23, %s10934_s5  }
  0x11   :  { %s10935_s27 = smov [#allocation7]   ;;  %s71_s30 = sshll.u32 %s11262_s4, 4  ;;  %s72_s30 = int_to_ptr.hbm [resolvable:$true] %s71_s30 }
  0x12   :  { %s50_s0 = sshll.u32 %s10935_s27, 4  ;;  %s10936_s8 = smov [#allocation10]   ;;  %s51_s0 = int_to_ptr.vmem [resolvable:$true] %s50_s0 }
  0x13   :  { %53 = dma.hbm_to_vmem [thread:$0]  %s49_s26, 64, %s51_s0, [#allocation6]  }
  0x14   :  { %s73_s9 = sshll.u32 %s10936_s8, 4  ;;  %s98_s12 = sshll.u32 %s11264_s6, 4  ;;  %s74_s9 = int_to_ptr.vmem [resolvable:$true] %s73_s9  ;;  %s99_s12 = int_to_ptr.hbm [resolvable:$true] %s98_s12 }
  0x15   :  { %79 = dma.hbm_to_vmem [thread:$0]  %s72_s30, 256, %s74_s9, [#allocation9], %s10930_s19, %s10930_s19, %s10931_s20  }
  0x16   :  { %s10937_s2 = smov [#allocation13]  }
  0x17   :  { %s100_s13 = sshll.u32 %s10937_s2, 4  ;;  %s101_s13 = int_to_ptr.vmem [resolvable:$true] %s100_s13 }
  0x18   :  { %103 = dma.hbm_to_vmem [thread:$0]  %s99_s12, 16, %s101_s13, [#allocation12]  }
  0x19   :  { %10915 = dma.done.wait [#allocation3], 1024  }
  0x1a   :  { %10916 = vsyncadd [#allocation3], 4294966272 }
  0x1b   :  { %10917 = dma.done.wait [#allocation6], 32832  }
  0x1c   :  { %10918 = vsyncadd [#allocation6], 4294934464 }
  0x1d   :  { %10919 = dma.done.wait [#allocation9], 65792  }
  0x1e   :  { %10920 = vsyncadd [#allocation9], 4294901504 }
  0x1f   :  { %10921 = dma.done.wait [#allocation12], 4112  }
  0x20   :  { %10922 = vsyncadd [#allocation12], 4294963184  ;;  %v6744_v0 = vld [vmem:[#allocation5 + $0xe0] sm:$0xf]  ;;  %v9868_v1 = vld [vmem:[#allocation5 + $0xec] sm:$0xf0] }
  0x21   :  { %v6872_v2 = vld [vmem:[#allocation5 + $0x1e0] sm:$0xf]  ;;  %v6745_v3 = vor.u32 %v9868_v1, %v6744_v0  ;;  %v9900_v4 = vld [vmem:[#allocation5 + $0x1ec] sm:$0xf0]  ;;  %s10938_s4 = smov [#allocation14]   ;;  %s6582_s15 = sshll.u32 %s11265_s7, 4  ;;  %s6583_s15 = int_to_ptr.hbm [resolvable:$true] %s6582_s15 }
  0x22   :  { %v7000_v5 = vld [vmem:[#allocation5 + $0x2e0] sm:$0xf]  ;;  %v9932_v6 = vld [vmem:[#allocation5 + $0x2ec] sm:$0xf0]  ;;  %v6873_v7 = vor.u32 %v9900_v4, %v6872_v2  ;;  %s6580_s6 = sshll.u32 %s10938_s4, 4  ;;  %s6581_s6 = int_to_ptr.vmem [resolvable:$true] %s6580_s6 }
  0x23   :  { %v7001_v8 = vor.u32 %v9932_v6, %v7000_v5  ;;  %v7128_v9 = vld [vmem:[#allocation5 + $0x3e0] sm:$0xf]  ;;  %v9964_v10 = vld [vmem:[#allocation5 + $0x3ec] sm:$0xf0]  ;;  %1726 = vmatpush.bf16.msra.mxu0 %v6745_v3 }
  0x24   :  { %v6728_v11 = vld [vmem:[#allocation5 + $0xc0] sm:$0xf]  ;;  %v7129_v12 = vor.u32 %v9964_v10, %v7128_v9  ;;  %v9864_v13 = vld [vmem:[#allocation5 + $0xcc] sm:$0xf0]  ;;  %1740 = vmatpush.bf16.msra.mxu1 %v6873_v7 }
  0x25   :  { %v6856_v14 = vld [vmem:[#allocation5 + $0x1c0] sm:$0xf]  ;;  %v9896_v15 = vld [vmem:[#allocation5 + $0x1cc] sm:$0xf0]  ;;  %1754 = vmatpush.bf16.msra.mxu2 %v7001_v8  ;;  %v6729_v16 = vor.u32 %v9864_v13, %v6728_v11 }
  0x26   :  { %v6857_v17 = vor.u32 %v9896_v15, %v6856_v14  ;;  %v6984_v18 = vld [vmem:[#allocation5 + $0x2c0] sm:$0xf]  ;;  %v9928_v19 = vld [vmem:[#allocation5 + $0x2cc] sm:$0xf0]  ;;  %1768 = vmatpush.bf16.msra.mxu3 %v7129_v12 }
  0x27   :  { %v7112_v20 = vld [vmem:[#allocation5 + $0x3c0] sm:$0xf]  ;;  %v6985_v21 = vor.u32 %v9928_v19, %v6984_v18  ;;  %v9960_v22 = vld [vmem:[#allocation5 + $0x3cc] sm:$0xf0]  ;;  %1727 = vmatpush.bf16.msra.mxu0 %v6729_v16 }
  0x28   :  { %v6712_v23 = vld [vmem:[#allocation5 + $0xa0] sm:$0xf]  ;;  %v9860_v24 = vld [vmem:[#allocation5 + $0xac] sm:$0xf0]  ;;  %v7113_v25 = vor.u32 %v9960_v22, %v7112_v20  ;;  %1741 = vmatpush.bf16.msra.mxu1 %v6857_v17 }
  0x29   :  { %v6840_v26 = vld [vmem:[#allocation5 + $0x1a0] sm:$0xf]  ;;  %v9892_v27 = vld [vmem:[#allocation5 + $0x1ac] sm:$0xf0]  ;;  %v6713_v29 = vor.u32 %v9860_v24, %v6712_v23  ;;  %1755 = vmatpush.bf16.msra.mxu2 %v6985_v21 }
  0x2a   :  { %v6968_v28 = vld [vmem:[#allocation5 + $0x2a0] sm:$0xf]  ;;  %v9924_v30 = vld [vmem:[#allocation5 + $0x2ac] sm:$0xf0]  ;;  %v6841_v33 = vor.u32 %v9892_v27, %v6840_v26  ;;  %1769 = vmatpush.bf16.msra.mxu3 %v7113_v25 }
  0x2b   :  { %v7096_v31 = vld [vmem:[#allocation5 + $0x3a0] sm:$0xf]  ;;  %v9956_v32 = vld [vmem:[#allocation5 + $0x3ac] sm:$0xf0]  ;;  %v6969_v34 = vor.u32 %v9924_v30, %v6968_v28  ;;  %1728 = vmatpush.bf16.msra.mxu0 %v6713_v29 }
  0x2c   :  { %v6696_v35 = vld [vmem:[#allocation5 + $0x80] sm:$0xf]  ;;  %v9856_v36 = vld [vmem:[#allocation5 + $0x8c] sm:$0xf0]  ;;  %v7097_v38 = vor.u32 %v9956_v32, %v7096_v31  ;;  %1742 = vmatpush.bf16.msra.mxu1 %v6841_v33 }
  0x2d   :  { %v6824_v37 = vld [vmem:[#allocation5 + $0x180] sm:$0xf]  ;;  %v9888_v39 = vld [vmem:[#allocation5 + $0x18c] sm:$0xf0]  ;;  %v6697_v44 = vor.u32 %v9856_v36, %v6696_v35  ;;  %1756 = vmatpush.bf16.msra.mxu2 %v6969_v34 }
  0x2e   :  { %v6952_v40 = vld [vmem:[#allocation5 + $0x280] sm:$0xf]  ;;  %v9920_v41 = vld [vmem:[#allocation5 + $0x28c] sm:$0xf0]  ;;  %v6825_v45 = vor.u32 %v9888_v39, %v6824_v37  ;;  %1770 = vmatpush.bf16.msra.mxu3 %v7097_v38 }
  0x2f   :  { %v7080_v42 = vld [vmem:[#allocation5 + $0x380] sm:$0xf]  ;;  %v9952_v43 = vld [vmem:[#allocation5 + $0x38c] sm:$0xf0]  ;;  %v6953_v46 = vor.u32 %v9920_v41, %v6952_v40  ;;  %1729 = vmatpush.bf16.msra.mxu0 %v6697_v44 }
  0x30   :  { %v6680_v47 = vld [vmem:[#allocation5 + $0x60] sm:$0xf]  ;;  %v9852_v48 = vld [vmem:[#allocation5 + $0x6c] sm:$0xf0]  ;;  %v7081_v50 = vor.u32 %v9952_v43, %v7080_v42  ;;  %1743 = vmatpush.bf16.msra.mxu1 %v6825_v45 }
  0x31   :  { %v6808_v49 = vld [vmem:[#allocation5 + $0x160] sm:$0xf]  ;;  %v9884_v51 = vld [vmem:[#allocation5 + $0x16c] sm:$0xf0]  ;;  %v6681_v56 = vor.u32 %v9852_v48, %v6680_v47  ;;  %1757 = vmatpush.bf16.msra.mxu2 %v6953_v46 }
  0x32   :  { %v6936_v52 = vld [vmem:[#allocation5 + $0x260] sm:$0xf]  ;;  %v9916_v53 = vld [vmem:[#allocation5 + $0x26c] sm:$0xf0]  ;;  %v6809_v57 = vor.u32 %v9884_v51, %v6808_v49  ;;  %1771 = vmatpush.bf16.msra.mxu3 %v7081_v50 }
  0x33   :  { %v7064_v54 = vld [vmem:[#allocation5 + $0x360] sm:$0xf]  ;;  %v9948_v55 = vld [vmem:[#allocation5 + $0x36c] sm:$0xf0]  ;;  %v6937_v58 = vor.u32 %v9916_v53, %v6936_v52  ;;  %1730 = vmatpush.bf16.msra.mxu0 %v6681_v56 }
  0x34   :  { %v6664_v59 = vld [vmem:[#allocation5 + $0x40] sm:$0xf]  ;;  %v9848_v60 = vld [vmem:[#allocation5 + $0x4c] sm:$0xf0]  ;;  %v7065_v62 = vor.u32 %v9948_v55, %v7064_v54  ;;  %1744 = vmatpush.bf16.msra.mxu1 %v6809_v57  ;;  %v6608_v54 = vld [vmem:[#allocation2 + $0x8] sm:$0xf] }
  0x35   :  { %v6792_v61 = vld [vmem:[#allocation5 + $0x140] sm:$0xf]  ;;  %v9880_v63 = vld [vmem:[#allocation5 + $0x14c] sm:$0xf0]  ;;  %v6665_v4 = vor.u32 %v9848_v60, %v6664_v59  ;;  %1758 = vmatpush.bf16.msra.mxu2 %v6937_v58  ;;  %v9835_v59 = vld [vmem:[#allocation2 + $0x24] sm:$0xf0] }
  0x36   :  { %v6920_v0 = vld [vmem:[#allocation5 + $0x240] sm:$0xf]  ;;  %v9912_v1 = vld [vmem:[#allocation5 + $0x24c] sm:$0xf0]  ;;  %v6793_v5 = vor.u32 %v9880_v63, %v6792_v61  ;;  %1772 = vmatpush.bf16.msra.mxu3 %v7065_v62 }
  0x37   :  { %v7048_v2 = vld [vmem:[#allocation5 + $0x340] sm:$0xf]  ;;  %v9944_v3 = vld [vmem:[#allocation5 + $0x34c] sm:$0xf0]  ;;  %v6921_v6 = vor.u32 %v9912_v1, %v6920_v0  ;;  %1731 = vmatpush.bf16.msra.mxu0 %v6665_v4  ;;  %v11008_v1 = vor.u32 %v9835_v59, %v6608_v54 }
  0x38   :  { %v6648_v7 = vld [vmem:[#allocation5 + $0x20] sm:$0xf]  ;;  %v9844_v8 = vld [vmem:[#allocation5 + $0x2c] sm:$0xf0]  ;;  %v7049_v10 = vor.u32 %v9944_v3, %v7048_v2  ;;  %1745 = vmatpush.bf16.msra.mxu1 %v6793_v5 }
  0x39   :  { %v6776_v9 = vld [vmem:[#allocation5 + $0x120] sm:$0xf]  ;;  %v9876_v11 = vld [vmem:[#allocation5 + $0x12c] sm:$0xf0]  ;;  %v6649_v16 = vor.u32 %v9844_v8, %v6648_v7  ;;  %1759 = vmatpush.bf16.msra.mxu2 %v6921_v6  ;;  %v9830_v6 = vld [vmem:[#allocation2 + $0x4] sm:$0xf] }
  0x3a   :  { %v6904_v12 = vld [vmem:[#allocation5 + $0x220] sm:$0xf]  ;;  %v9908_v13 = vld [vmem:[#allocation5 + $0x22c] sm:$0xf0]  ;;  %v6777_v19 = vor.u32 %v9876_v11, %v6776_v9  ;;  %1773 = vmatpush.bf16.msra.mxu3 %v7049_v10  ;;  %v6602_v7 = vld [vmem:[#allocation2 + $0x20] sm:$0xf0] }
  0x3b   :  { %v7032_v14 = vld [vmem:[#allocation5 + $0x320] sm:$0xf]  ;;  %v9940_v15 = vld [vmem:[#allocation5 + $0x32c] sm:$0xf0]  ;;  %v6905_v20 = vor.u32 %v9908_v13, %v6904_v12  ;;  %1732 = vmatpush.bf16.msra.mxu0 %v6649_v16  ;;  %v9831_v8 = vld [vmem:[#allocation2 + $0xc] sm:$0xf]  ;;  %v11012_v10 = vor.u32 %v9830_v6, %v6602_v7 }
  0x3c   :  { %v6632_v17 = vld [vmem:[#allocation5] sm:$0xf]  ;;  %v9840_v18 = vld [vmem:[#allocation5 + $0xc] sm:$0xf0]  ;;  %v7033_v24 = vor.u32 %v9940_v15, %v7032_v14  ;;  %1746 = vmatpush.bf16.msra.mxu1 %v6777_v19  ;;  %v6610_v11 = vld [vmem:[#allocation2 + $0x28] sm:$0xf0] }
  0x3d   :  { %v6760_v21 = vld [vmem:[#allocation5 + $0x100] sm:$0xf]  ;;  %v9872_v22 = vld [vmem:[#allocation5 + $0x10c] sm:$0xf0]  ;;  %v6633_v31 = vor.u32 %v9840_v18, %v6632_v17  ;;  %1760 = vmatpush.bf16.msra.mxu2 %v6905_v20  ;;  %v11014_v17 = vor.u32 %v9831_v8, %v6610_v11 }
  0x3e   :  { %v6888_v23 = vld [vmem:[#allocation5 + $0x200] sm:$0xf]  ;;  %v9904_v25 = vld [vmem:[#allocation5 + $0x20c] sm:$0xf0]  ;;  %v6761_v35 = vor.u32 %v9872_v22, %v6760_v21  ;;  %1774 = vmatpush.bf16.msra.mxu3 %v7033_v24 }
  0x3f   :  { %v7016_v26 = vld [vmem:[#allocation5 + $0x300] sm:$0xf]  ;;  %v9936_v27 = vld [vmem:[#allocation5 + $0x30c] sm:$0xf0]  ;;  %v6889_v36 = vor.u32 %v9904_v25, %v6888_v23  ;;  %1733 = vmatpush.bf16.msra.mxu0 %v6633_v31 }
  0x40   :  { %v7256_v28 = vld [vmem:[#allocation5 + $0x4e0] sm:$0xf]  ;;  %v9996_v29 = vld [vmem:[#allocation5 + $0x4ec] sm:$0xf0]  ;;  %v7017_v39 = vor.u32 %v9936_v27, %v7016_v26  ;;  %1747 = vmatpush.bf16.msra.mxu1 %v6761_v35 }
  0x41   :  { %v7384_v30 = vld [vmem:[#allocation5 + $0x5e0] sm:$0xf]  ;;  %v10028_v32 = vld [vmem:[#allocation5 + $0x5ec] sm:$0xf0]  ;;  %v7257_v40 = vor.u32 %v9996_v29, %v7256_v28  ;;  %1761 = vmatpush.bf16.msra.mxu2 %v6889_v36 }
  0x42   :  { %v7512_v33 = vld [vmem:[#allocation5 + $0x6e0] sm:$0xf]  ;;  %v10060_v34 = vld [vmem:[#allocation5 + $0x6ec] sm:$0xf0]  ;;  %v7385_v43 = vor.u32 %v10028_v32, %v7384_v30  ;;  %1775 = vmatpush.bf16.msra.mxu3 %v7017_v39 }
  0x43   :  { %v7640_v37 = vld [vmem:[#allocation5 + $0x7e0] sm:$0xf]  ;;  %v10092_v38 = vld [vmem:[#allocation5 + $0x7ec] sm:$0xf0]  ;;  %v7513_v44 = vor.u32 %v10060_v34, %v7512_v33  ;;  %1782 = vmatpush.bf16.msrb.mxu0 %v7257_v40  ;;  %1748 = vmatmul.bf16.vlgmr.msra.gmra.mxu1 %v11012_v10 }
  0x44   :  { %v7240_v41 = vld [vmem:[#allocation5 + $0x4c0] sm:$0xf]  ;;  %v9992_v42 = vld [vmem:[#allocation5 + $0x4cc] sm:$0xf0]  ;;  %v7641_v48 = vor.u32 %v10092_v38, %v7640_v37  ;;  %1796 = vmatpush.bf16.msrb.mxu1 %v7385_v43  ;;  %1762 = vmatmul.bf16.vlgmr.msra.gmra.mxu2 %v11008_v1 }
  0x45   :  { %v7368_v45 = vld [vmem:[#allocation5 + $0x5c0] sm:$0xf]  ;;  %v10024_v46 = vld [vmem:[#allocation5 + $0x5cc] sm:$0xf0]  ;;  %v7241_v55 = vor.u32 %v9992_v42, %v7240_v41  ;;  %1810 = vmatpush.bf16.msrb.mxu2 %v7513_v44  ;;  %1776 = vmatmul.bf16.vlgmr.msra.gmra.mxu3 %v11014_v17 }
  0x46   :  { %v7496_v47 = vld [vmem:[#allocation5 + $0x6c0] sm:$0xf]  ;;  %v10056_v49 = vld [vmem:[#allocation5 + $0x6cc] sm:$0xf0]  ;;  %v7369_v60 = vor.u32 %v10024_v46, %v7368_v45  ;;  %1824 = vmatpush.bf16.msrb.mxu3 %v7641_v48 }
  0x47   :  { %v7624_v50 = vld [vmem:[#allocation5 + $0x7c0] sm:$0xf]  ;;  %v10088_v51 = vld [vmem:[#allocation5 + $0x7cc] sm:$0xf0]  ;;  %v7497_v61 = vor.u32 %v10056_v49, %v7496_v47  ;;  %1783 = vmatpush.bf16.msrb.mxu0 %v7241_v55 }
  0x48   :  { %v6600_v52 = vld [vmem:[#allocation2] sm:$0xf]  ;;  %v9988_v57 = vld [vmem:[#allocation5 + $0x4ac] sm:$0xf0]  ;;  %v7625_v2 = vor.u32 %v10088_v51, %v7624_v50  ;;  %1797 = vmatpush.bf16.msrb.mxu1 %v7369_v60 }
  0x49   :  { %v9834_v53 = vld [vmem:[#allocation2 + $0x1c] sm:$0xf0]  ;;  %v10020_v63 = vld [vmem:[#allocation5 + $0x5ac] sm:$0xf0]  ;;  %1811 = vmatpush.bf16.msrb.mxu2 %v7497_v61 }
  0x4a   :  { %v7224_v56 = vld [vmem:[#allocation5 + $0x4a0] sm:$0xf]  ;;  %v11006_v58 = vor.u32 %v9834_v53, %v6600_v52  ;;  %v10052_v3 = vld [vmem:[#allocation5 + $0x6ac] sm:$0xf0]  ;;  %1825 = vmatpush.bf16.msrb.mxu3 %v7625_v2 }
  0x4b   :  { %v7352_v62 = vld [vmem:[#allocation5 + $0x5a0] sm:$0xf]  ;;  %v10084_v5 = vld [vmem:[#allocation5 + $0x7ac] sm:$0xf0]  ;;  %v7225_v9 = vor.u32 %v9988_v57, %v7224_v56 }
  0x4c   :  { %v7480_v0 = vld [vmem:[#allocation5 + $0x6a0] sm:$0xf]  ;;  %1734 = vmatmul.bf16.vlgmr.msra.gmra.mxu0 %v11006_v58  ;;  %v7353_v12 = vor.u32 %v10020_v63, %v7352_v62  ;;  %v9984_v15 = vld [vmem:[#allocation5 + $0x48c] sm:$0xf0] }
  0x4d   :  { %v7608_v4 = vld [vmem:[#allocation5 + $0x7a0] sm:$0xf]  ;;  %v7481_v13 = vor.u32 %v10052_v3, %v7480_v0  ;;  %v10016_v19 = vld [vmem:[#allocation5 + $0x58c] sm:$0xf0]  ;;  %1784 = vmatpush.bf16.msrb.mxu0 %v7225_v9  ;;  %v9866_v9 = vld [vmem:[#allocation5 + $0xe4] sm:$0xf] }
  0x4e   :  { %v7208_v14 = vld [vmem:[#allocation5 + $0x480] sm:$0xf]  ;;  %v7609_v18 = vor.u32 %v10084_v5, %v7608_v4  ;;  %v10048_v21 = vld [vmem:[#allocation5 + $0x68c] sm:$0xf0]  ;;  %1798 = vmatpush.bf16.msrb.mxu1 %v7353_v12  ;;  %v6746_v12 = vld [vmem:[#allocation5 + $0xf0] sm:$0xf0] }
  0x4f   :  { %v7336_v16 = vld [vmem:[#allocation5 + $0x580] sm:$0xf]  ;;  %v10080_v23 = vld [vmem:[#allocation5 + $0x78c] sm:$0xf0]  ;;  %v7209_v24 = vor.u32 %v9984_v15, %v7208_v14  ;;  %1812 = vmatpush.bf16.msrb.mxu2 %v7481_v13  ;;  %v9898_v13 = vld [vmem:[#allocation5 + $0x1e4] sm:$0xf] }
  0x50   :  { %v7464_v20 = vld [vmem:[#allocation5 + $0x680] sm:$0xf]  ;;  %v7337_v25 = vor.u32 %v10016_v19, %v7336_v16  ;;  %v9980_v28 = vld [vmem:[#allocation5 + $0x46c] sm:$0xf0]  ;;  %1826 = vmatpush.bf16.msrb.mxu3 %v7609_v18  ;;  %v6874_v14 = vld [vmem:[#allocation5 + $0x1f0] sm:$0xf0] }
  0x51   :  { %v7592_v22 = vld [vmem:[#allocation5 + $0x780] sm:$0xf]  ;;  %v7465_v26 = vor.u32 %v10048_v21, %v7464_v20  ;;  %v10012_v31 = vld [vmem:[#allocation5 + $0x56c] sm:$0xf0]  ;;  %1785 = vmatpush.bf16.msrb.mxu0 %v7209_v24  ;;  %v9930_v15 = vld [vmem:[#allocation5 + $0x2e4] sm:$0xf] }
  0x52   :  { %v7192_v27 = vld [vmem:[#allocation5 + $0x460] sm:$0xf]  ;;  %v7593_v30 = vor.u32 %v10080_v23, %v7592_v22  ;;  %v10044_v33 = vld [vmem:[#allocation5 + $0x66c] sm:$0xf0]  ;;  %1799 = vmatpush.bf16.msrb.mxu1 %v7337_v25  ;;  %v7002_v16 = vld [vmem:[#allocation5 + $0x2f0] sm:$0xf0] }
  0x53   :  { %v7320_v29 = vld [vmem:[#allocation5 + $0x560] sm:$0xf]  ;;  %v10076_v35 = vld [vmem:[#allocation5 + $0x76c] sm:$0xf0]  ;;  %v7193_v36 = vor.u32 %v9980_v28, %v7192_v27  ;;  %1813 = vmatpush.bf16.msrb.mxu2 %v7465_v26  ;;  %v9962_v18 = vld [vmem:[#allocation5 + $0x3e4] sm:$0xf] }
  0x54   :  { %v7448_v32 = vld [vmem:[#allocation5 + $0x660] sm:$0xf]  ;;  %v7321_v37 = vor.u32 %v10012_v31, %v7320_v29  ;;  %v9976_v40 = vld [vmem:[#allocation5 + $0x44c] sm:$0xf0]  ;;  %1827 = vmatpush.bf16.msrb.mxu3 %v7593_v30  ;;  %v7130_v20 = vld [vmem:[#allocation5 + $0x3f0] sm:$0xf0]  ;;  %v6749_v29 = vor.u32 %v9866_v9, %v6746_v12 }
  0x55   :  { %v7576_v34 = vld [vmem:[#allocation5 + $0x760] sm:$0xf]  ;;  %v7449_v38 = vor.u32 %v10044_v33, %v7448_v32  ;;  %v10008_v43 = vld [vmem:[#allocation5 + $0x54c] sm:$0xf0]  ;;  %1786 = vmatpush.bf16.msrb.mxu0 %v7193_v36  ;;  %v6624_v25 = vld [vmem:[#allocation2 + $0x18] sm:$0xf]  ;;  %v6877_v33 = vor.u32 %v9898_v13, %v6874_v14 }
  0x56   :  { %v7176_v39 = vld [vmem:[#allocation5 + $0x440] sm:$0xf]  ;;  %v7577_v42 = vor.u32 %v10076_v35, %v7576_v34  ;;  %v10040_v45 = vld [vmem:[#allocation5 + $0x64c] sm:$0xf0]  ;;  %1800 = vmatpush.bf16.msrb.mxu1 %v7321_v37  ;;  %v9837_v26 = vld [vmem:[#allocation2 + $0x34] sm:$0xf0]  ;;  %v7005_v34 = vor.u32 %v9930_v15, %v7002_v16 }
  0x57   :  { %v7304_v41 = vld [vmem:[#allocation5 + $0x540] sm:$0xf]  ;;  %v10072_v47 = vld [vmem:[#allocation5 + $0x74c] sm:$0xf0]  ;;  %v7177_v48 = vor.u32 %v9976_v40, %v7176_v39  ;;  %1814 = vmatpush.bf16.msrb.mxu2 %v7449_v38  ;;  %v9832_v27 = vld [vmem:[#allocation2 + $0x14] sm:$0xf]  ;;  %v7133_v38 = vor.u32 %v9962_v18, %v7130_v20 }
  0x58   :  { %v7432_v44 = vld [vmem:[#allocation5 + $0x640] sm:$0xf]  ;;  %v7305_v50 = vor.u32 %v10008_v43, %v7304_v41  ;;  %v9972_v52 = vld [vmem:[#allocation5 + $0x42c] sm:$0xf0]  ;;  %1828 = vmatpush.bf16.msrb.mxu3 %v7577_v42  ;;  %v6618_v30 = vld [vmem:[#allocation2 + $0x30] sm:$0xf0]  ;;  %v11020_v43 = vor.u32 %v9837_v26, %v6624_v25 }
  0x59   :  { %v7560_v46 = vld [vmem:[#allocation5 + $0x740] sm:$0xf]  ;;  %v7433_v51 = vor.u32 %v10040_v45, %v7432_v44  ;;  %v10004_v54 = vld [vmem:[#allocation5 + $0x52c] sm:$0xf0]  ;;  %1787 = vmatpush.bf16.msrb.mxu0 %v7177_v48  ;;  %v9833_v31 = vld [vmem:[#allocation2 + $0x1c] sm:$0xf]  ;;  %v11022_v44 = vor.u32 %v9832_v27, %v6618_v30 }
  0x5a   :  { %v7160_v49 = vld [vmem:[#allocation5 + $0x420] sm:$0xf]  ;;  %v7561_v55 = vor.u32 %v10072_v47, %v7560_v46  ;;  %v10036_v57 = vld [vmem:[#allocation5 + $0x62c] sm:$0xf0]  ;;  %1801 = vmatpush.bf16.msrb.mxu1 %v7305_v50  ;;  %v6626_v32 = vld [vmem:[#allocation2 + $0x38] sm:$0xf0] }
  0x5b   :  { %v7288_v53 = vld [vmem:[#allocation5 + $0x520] sm:$0xf]  ;;  %v10068_v60 = vld [vmem:[#allocation5 + $0x72c] sm:$0xf0]  ;;  %v7161_v63 = vor.u32 %v9972_v52, %v7160_v49  ;;  %1815 = vmatpush.bf16.msrb.mxu2 %v7433_v51  ;;  %v9862_v35 = vld [vmem:[#allocation5 + $0xc4] sm:$0xf]  ;;  %v11024_v47 = vor.u32 %v9833_v31, %v6626_v32 }
  0x5c   :  { %v7416_v56 = vld [vmem:[#allocation5 + $0x620] sm:$0xf]  ;;  %v9968_v62 = vld [vmem:[#allocation5 + $0x40c] sm:$0xf0]  ;;  %v7289_v5 = vor.u32 %v10004_v54, %v7288_v53  ;;  %1829 = vmatpush.bf16.msrb.mxu3 %v7561_v55  ;;  %v6730_v36 = vld [vmem:[#allocation5 + $0xd0] sm:$0xf0] }
  0x5d   :  { %v7544_v59 = vld [vmem:[#allocation5 + $0x720] sm:$0xf]  ;;  %v10000_v2 = vld [vmem:[#allocation5 + $0x50c] sm:$0xf0]  ;;  %v7417_v6 = vor.u32 %v10036_v57, %v7416_v56  ;;  %1788 = vmatpush.bf16.msrb.mxu0 %v7161_v63  ;;  %v9894_v37 = vld [vmem:[#allocation5 + $0x1c4] sm:$0xf]  ;;  %v6733_v48 = vor.u32 %v9862_v35, %v6730_v36 }
  0x5e   :  { %v7144_v61 = vld [vmem:[#allocation5 + $0x400] sm:$0xf]  ;;  %v10032_v4 = vld [vmem:[#allocation5 + $0x60c] sm:$0xf0]  ;;  %v7545_v11 = vor.u32 %v10068_v60, %v7544_v59  ;;  %1802 = vmatpush.bf16.msrb.mxu1 %v7289_v5  ;;  %v6858_v40 = vld [vmem:[#allocation5 + $0x1d0] sm:$0xf0] }
  0x5f   :  { %v7272_v0 = vld [vmem:[#allocation5 + $0x500] sm:$0xf]  ;;  %v10064_v8 = vld [vmem:[#allocation5 + $0x70c] sm:$0xf0]  ;;  %v7145_v19 = vor.u32 %v9968_v62, %v7144_v61  ;;  %1816 = vmatpush.bf16.msrb.mxu2 %v7417_v6  ;;  %v9926_v41 = vld [vmem:[#allocation5 + $0x2c4] sm:$0xf]  ;;  %v6861_v49 = vor.u32 %v9894_v37, %v6858_v40 }
  0x60   :  { %v7400_v3 = vld [vmem:[#allocation5 + $0x600] sm:$0xf]  ;;  %v6616_v21 = vld [vmem:[#allocation2 + $0x10] sm:$0xf]  ;;  %v7273_v23 = vor.u32 %v10000_v2, %v7272_v0  ;;  %1830 = vmatpush.bf16.msrb.mxu3 %v7545_v11  ;;  %v6986_v42 = vld [vmem:[#allocation5 + $0x2d0] sm:$0xf0] }
  0x61   :  { %v7528_v7 = vld [vmem:[#allocation5 + $0x700] sm:$0xf]  ;;  %v9836_v22 = vld [vmem:[#allocation2 + $0x2c] sm:$0xf0]  ;;  %v7401_v24 = vor.u32 %v10032_v4, %v7400_v3  ;;  %1789 = vmatpush.bf16.msrb.mxu0 %v7145_v19  ;;  %v9958_v45 = vld [vmem:[#allocation5 + $0x3c4] sm:$0xf]  ;;  %v6989_v50 = vor.u32 %v9926_v41, %v6986_v42 }
  0x62   :  { %v7529_v28 = vor.u32 %v10064_v8, %v7528_v7  ;;  %v11018_v39 = vor.u32 %v9836_v22, %v6616_v21  ;;  %1803 = vmatpush.bf16.msrb.mxu1 %v7273_v23  ;;  %v7114_v46 = vld [vmem:[#allocation5 + $0x3d0] sm:$0xf0]  ;;  %v9858_v51 = vld [vmem:[#allocation5 + $0xa4] sm:$0xf] }
  0x63   :  { %1817 = vmatpush.bf16.msrb.mxu2 %v7401_v24  ;;  %v6714_v52 = vld [vmem:[#allocation5 + $0xb0] sm:$0xf0]  ;;  %v9890_v53 = vld [vmem:[#allocation5 + $0x1a4] sm:$0xf]  ;;  %v7117_v54 = vor.u32 %v9958_v45, %v7114_v46 }
  0x64   :  { %1831 = vmatpush.bf16.msrb.mxu3 %v7529_v28  ;;  %1790 = vmatmul.bf16.vlgmr.msrb.gmra.mxu0 %v11018_v39  ;;  %v6842_v55 = vld [vmem:[#allocation5 + $0x1b0] sm:$0xf0]  ;;  %v9922_v56 = vld [vmem:[#allocation5 + $0x2a4] sm:$0xf]  ;;  %v6717_v61 = vor.u32 %v9858_v51, %v6714_v52 }
  0x65   :  { %1838 = vmatpush.bf16.msra.mxu0 %v6749_v29  ;;  %v6970_v57 = vld [vmem:[#allocation5 + $0x2b0] sm:$0xf0]  ;;  %1804 = vmatmul.bf16.vlgmr.msrb.gmra.mxu1 %v11022_v44  ;;  %v9954_v59 = vld [vmem:[#allocation5 + $0x3a4] sm:$0xf]  ;;  %v6845_v62 = vor.u32 %v9890_v53, %v6842_v55 }
  0x66   :  { %1852 = vmatpush.bf16.msra.mxu1 %v6877_v33  ;;  %1818 = vmatmul.bf16.vlgmr.msrb.gmra.mxu2 %v11020_v43  ;;  %v7098_v60 = vld [vmem:[#allocation5 + $0x3b0] sm:$0xf0]  ;;  %v6973_v63 = vor.u32 %v9922_v56, %v6970_v57  ;;  %v9854_v0 = vld [vmem:[#allocation5 + $0x84] sm:$0xf] }
  0x67   :  { %1866 = vmatpush.bf16.msra.mxu2 %v7005_v34  ;;  %1832 = vmatmul.bf16.vlgmr.msrb.gmra.mxu3 %v11024_v47  ;;  %v6698_v2 = vld [vmem:[#allocation5 + $0x90] sm:$0xf0]  ;;  %v9886_v3 = vld [vmem:[#allocation5 + $0x184] sm:$0xf]  ;;  %v7101_v4 = vor.u32 %v9954_v59, %v7098_v60 }
  0x68   :  { %1880 = vmatpush.bf16.msra.mxu3 %v7133_v38  ;;  %v6826_v5 = vld [vmem:[#allocation5 + $0x190] sm:$0xf0]  ;;  %v9918_v6 = vld [vmem:[#allocation5 + $0x284] sm:$0xf]  ;;  %v6701_v11 = vor.u32 %v9854_v0, %v6698_v2 }
  0x69   :  { %1839 = vmatpush.bf16.msra.mxu0 %v6733_v48  ;;  %v6954_v7 = vld [vmem:[#allocation5 + $0x290] sm:$0xf0]  ;;  %v9950_v8 = vld [vmem:[#allocation5 + $0x384] sm:$0xf]  ;;  %v6829_v12 = vor.u32 %v9886_v3, %v6826_v5 }
  0x6a   :  { %1853 = vmatpush.bf16.msra.mxu1 %v6861_v49  ;;  %v7082_v9 = vld [vmem:[#allocation5 + $0x390] sm:$0xf0]  ;;  %v6957_v13 = vor.u32 %v9918_v6, %v6954_v7  ;;  %v9850_v14 = vld [vmem:[#allocation5 + $0x64] sm:$0xf] }
  0x6b   :  { %1867 = vmatpush.bf16.msra.mxu2 %v6989_v50  ;;  %v6682_v15 = vld [vmem:[#allocation5 + $0x70] sm:$0xf0]  ;;  %v9882_v16 = vld [vmem:[#allocation5 + $0x164] sm:$0xf]  ;;  %v7085_v18 = vor.u32 %v9950_v8, %v7082_v9 }
  0x6c   :  { %1881 = vmatpush.bf16.msra.mxu3 %v7117_v54  ;;  %v6810_v19 = vld [vmem:[#allocation5 + $0x170] sm:$0xf0]  ;;  %v9914_v20 = vld [vmem:[#allocation5 + $0x264] sm:$0xf]  ;;  %v6685_v24 = vor.u32 %v9850_v14, %v6682_v15 }
  0x6d   :  { %1840 = vmatpush.bf16.msra.mxu0 %v6717_v61  ;;  %v6938_v21 = vld [vmem:[#allocation5 + $0x270] sm:$0xf0]  ;;  %v9946_v22 = vld [vmem:[#allocation5 + $0x364] sm:$0xf]  ;;  %v6813_v25 = vor.u32 %v9882_v16, %v6810_v19 }
  0x6e   :  { %1854 = vmatpush.bf16.msra.mxu1 %v6845_v62  ;;  %v7066_v23 = vld [vmem:[#allocation5 + $0x370] sm:$0xf0]  ;;  %v6941_v26 = vor.u32 %v9914_v20, %v6938_v21  ;;  %v9846_v27 = vld [vmem:[#allocation5 + $0x44] sm:$0xf] }
  0x6f   :  { %1868 = vmatpush.bf16.msra.mxu2 %v6973_v63  ;;  %v6666_v28 = vld [vmem:[#allocation5 + $0x50] sm:$0xf0]  ;;  %v9878_v29 = vld [vmem:[#allocation5 + $0x144] sm:$0xf]  ;;  %v7069_v30 = vor.u32 %v9946_v22, %v7066_v23 }
  0x70   :  { %1882 = vmatpush.bf16.msra.mxu3 %v7101_v4  ;;  %v6794_v31 = vld [vmem:[#allocation5 + $0x150] sm:$0xf0]  ;;  %v9910_v32 = vld [vmem:[#allocation5 + $0x244] sm:$0xf]  ;;  %v6669_v36 = vor.u32 %v9846_v27, %v6666_v28 }
  0x71   :  { %1841 = vmatpush.bf16.msra.mxu0 %v6701_v11  ;;  %v6922_v33 = vld [vmem:[#allocation5 + $0x250] sm:$0xf0]  ;;  %v9942_v34 = vld [vmem:[#allocation5 + $0x344] sm:$0xf]  ;;  %v6797_v37 = vor.u32 %v9878_v29, %v6794_v31 }
  0x72   :  { %1855 = vmatpush.bf16.msra.mxu1 %v6829_v12  ;;  %v7050_v35 = vld [vmem:[#allocation5 + $0x350] sm:$0xf0]  ;;  %v6925_v38 = vor.u32 %v9910_v32, %v6922_v33  ;;  %v9842_v40 = vld [vmem:[#allocation5 + $0x24] sm:$0xf] }
  0x73   :  { %1869 = vmatpush.bf16.msra.mxu2 %v6957_v13  ;;  %v6650_v41 = vld [vmem:[#allocation5 + $0x30] sm:$0xf0]  ;;  %v9874_v42 = vld [vmem:[#allocation5 + $0x124] sm:$0xf]  ;;  %v7053_v45 = vor.u32 %v9942_v34, %v7050_v35 }
  0x74   :  { %1883 = vmatpush.bf16.msra.mxu3 %v7085_v18  ;;  %v6778_v46 = vld [vmem:[#allocation5 + $0x130] sm:$0xf0]  ;;  %v9906_v48 = vld [vmem:[#allocation5 + $0x224] sm:$0xf]  ;;  %v6653_v52 = vor.u32 %v9842_v40, %v6650_v41 }
  0x75   :  { %1842 = vmatpush.bf16.msra.mxu0 %v6685_v24  ;;  %v6906_v49 = vld [vmem:[#allocation5 + $0x230] sm:$0xf0]  ;;  %v9938_v50 = vld [vmem:[#allocation5 + $0x324] sm:$0xf]  ;;  %v6781_v55 = vor.u32 %v9874_v42, %v6778_v46 }
  0x76   :  { %1856 = vmatpush.bf16.msra.mxu1 %v6813_v25  ;;  %v7034_v51 = vld [vmem:[#allocation5 + $0x330] sm:$0xf0]  ;;  %v9838_v53 = vld [vmem:[#allocation5 + $0x4] sm:$0xf]  ;;  %v6909_v56 = vor.u32 %v9906_v48, %v6906_v49 }
  0x77   :  { %1870 = vmatpush.bf16.msra.mxu2 %v6941_v26  ;;  %v6634_v54 = vld [vmem:[#allocation5 + $0x10] sm:$0xf0]  ;;  %v9870_v57 = vld [vmem:[#allocation5 + $0x104] sm:$0xf]  ;;  %v7037_v61 = vor.u32 %v9938_v50, %v7034_v51 }
  0x78   :  { %1884 = vmatpush.bf16.msra.mxu3 %v7069_v30  ;;  %v6762_v59 = vld [vmem:[#allocation5 + $0x110] sm:$0xf0]  ;;  %v9902_v60 = vld [vmem:[#allocation5 + $0x204] sm:$0xf]  ;;  %v6637_v5 = vor.u32 %v9838_v53, %v6634_v54 }
  0x79   :  { %1843 = vmatpush.bf16.msra.mxu0 %v6669_v36  ;;  %v6890_v62 = vld [vmem:[#allocation5 + $0x210] sm:$0xf0]  ;;  %v9934_v63 = vld [vmem:[#allocation5 + $0x304] sm:$0xf]  ;;  %v6765_v9 = vor.u32 %v9870_v57, %v6762_v59 }
  0x7a   :  { %1857 = vmatpush.bf16.msra.mxu1 %v6797_v37  ;;  %v7018_v0 = vld [vmem:[#allocation5 + $0x310] sm:$0xf0]  ;;  %v9994_v2 = vld [vmem:[#allocation5 + $0x4e4] sm:$0xf]  ;;  %v6893_v11 = vor.u32 %v9902_v60, %v6890_v62 }
  0x7b   :  { %1871 = vmatpush.bf16.msra.mxu2 %v6925_v38  ;;  %v7258_v3 = vld [vmem:[#allocation5 + $0x4f0] sm:$0xf0]  ;;  %v10026_v4 = vld [vmem:[#allocation5 + $0x5e4] sm:$0xf]  ;;  %v7021_v14 = vor.u32 %v9934_v63, %v7018_v0 }
  0x7c   :  { %1885 = vmatpush.bf16.msra.mxu3 %v7053_v45  ;;  %v7386_v6 = vld [vmem:[#allocation5 + $0x5f0] sm:$0xf0]  ;;  %v10058_v7 = vld [vmem:[#allocation5 + $0x6e4] sm:$0xf]  ;;  %v7261_v15 = vor.u32 %v9994_v2, %v7258_v3 }
  0x7d   :  { %1844 = vmatpush.bf16.msra.mxu0 %v6653_v52  ;;  %v7514_v8 = vld [vmem:[#allocation5 + $0x6f0] sm:$0xf0]  ;;  %v10090_v12 = vld [vmem:[#allocation5 + $0x7e4] sm:$0xf]  ;;  %v7389_v16 = vor.u32 %v10026_v4, %v7386_v6 }
  0x7e   :  { %1858 = vmatpush.bf16.msra.mxu1 %v6781_v55  ;;  %v7642_v13 = vld [vmem:[#allocation5 + $0x7f0] sm:$0xf0]  ;;  %v7517_v18 = vor.u32 %v10058_v7, %v7514_v8  ;;  %v9990_v19 = vld [vmem:[#allocation5 + $0x4c4] sm:$0xf] }
  0x7f   :  { %1872 = vmatpush.bf16.msra.mxu2 %v6909_v56  ;;  %v7242_v20 = vld [vmem:[#allocation5 + $0x4d0] sm:$0xf0]  ;;  %v10022_v21 = vld [vmem:[#allocation5 + $0x5c4] sm:$0xf]  ;;  %v7645_v22 = vor.u32 %v10090_v12, %v7642_v13 }
  0x80   :  { %1886 = vmatpush.bf16.msra.mxu3 %v7037_v61  ;;  %v7370_v23 = vld [vmem:[#allocation5 + $0x5d0] sm:$0xf0]  ;;  %v10054_v24 = vld [vmem:[#allocation5 + $0x6c4] sm:$0xf]  ;;  %v7245_v28 = vor.u32 %v9990_v19, %v7242_v20 }
  0x81   :  { %1845 = vmatpush.bf16.msra.mxu0 %v6637_v5  ;;  %v7498_v25 = vld [vmem:[#allocation5 + $0x6d0] sm:$0xf0]  ;;  %v10086_v26 = vld [vmem:[#allocation5 + $0x7c4] sm:$0xf]  ;;  %v7373_v29 = vor.u32 %v10022_v21, %v7370_v23 }
  0x82   :  { %1859 = vmatpush.bf16.msra.mxu1 %v6765_v9  ;;  %v7626_v27 = vld [vmem:[#allocation5 + $0x7d0] sm:$0xf0]  ;;  %v7501_v30 = vor.u32 %v10054_v24, %v7498_v25  ;;  %v9986_v31 = vld [vmem:[#allocation5 + $0x4a4] sm:$0xf] }
  0x83   :  { %1873 = vmatpush.bf16.msra.mxu2 %v6893_v11  ;;  %v7226_v32 = vld [vmem:[#allocation5 + $0x4b0] sm:$0xf0]  ;;  %v10018_v33 = vld [vmem:[#allocation5 + $0x5a4] sm:$0xf]  ;;  %v7629_v34 = vor.u32 %v10086_v26, %v7626_v27 }
  0x84   :  { %1887 = vmatpush.bf16.msra.mxu3 %v7021_v14  ;;  %v7354_v35 = vld [vmem:[#allocation5 + $0x5b0] sm:$0xf0]  ;;  %v10050_v36 = vld [vmem:[#allocation5 + $0x6a4] sm:$0xf]  ;;  %1846 = vmatmul.bf16.vlgmr.msra.gmra.mxu0 %v11006_v58  ;;  %v7229_v41 = vor.u32 %v9986_v31, %v7226_v32 }
  0x85   :  { %1894 = vmatpush.bf16.msrb.mxu0 %v7261_v15  ;;  %v7482_v37 = vld [vmem:[#allocation5 + $0x6b0] sm:$0xf0]  ;;  %v10082_v38 = vld [vmem:[#allocation5 + $0x7a4] sm:$0xf]  ;;  %1860 = vmatmul.bf16.vlgmr.msra.gmra.mxu1 %v11012_v10  ;;  %v7357_v42 = vor.u32 %v10018_v33, %v7354_v35 }
  0x86   :  { %1908 = vmatpush.bf16.msrb.mxu1 %v7389_v16  ;;  %v7610_v40 = vld [vmem:[#allocation5 + $0x7b0] sm:$0xf0]  ;;  %1874 = vmatmul.bf16.vlgmr.msra.gmra.mxu2 %v11008_v1  ;;  %v7485_v45 = vor.u32 %v10050_v36, %v7482_v37  ;;  %v9982_v46 = vld [vmem:[#allocation5 + $0x484] sm:$0xf] }
  0x87   :  { %1922 = vmatpush.bf16.msrb.mxu2 %v7517_v18  ;;  %1888 = vmatmul.bf16.vlgmr.msra.gmra.mxu3 %v11014_v17  ;;  %v7210_v48 = vld [vmem:[#allocation5 + $0x490] sm:$0xf0]  ;;  %v10014_v49 = vld [vmem:[#allocation5 + $0x584] sm:$0xf]  ;;  %v7613_v50 = vor.u32 %v10082_v38, %v7610_v40 }
  0x88   :  { %1936 = vmatpush.bf16.msrb.mxu3 %v7645_v22  ;;  %v7338_v51 = vld [vmem:[#allocation5 + $0x590] sm:$0xf0]  ;;  %v10046_v52 = vld [vmem:[#allocation5 + $0x684] sm:$0xf]  ;;  %v7213_v56 = vor.u32 %v9982_v46, %v7210_v48  ;;  %v6752_v48 = vld [vmem:[#allocation5 + $0xe8] sm:$0xf] }
  0x89   :  { %1895 = vmatpush.bf16.msrb.mxu0 %v7245_v28  ;;  %v7466_v53 = vld [vmem:[#allocation5 + $0x690] sm:$0xf0]  ;;  %v10078_v54 = vld [vmem:[#allocation5 + $0x784] sm:$0xf]  ;;  %v7341_v57 = vor.u32 %v10014_v49, %v7338_v51  ;;  %v9869_v49 = vld [vmem:[#allocation5 + $0xf4] sm:$0xf0] }
  0x8a   :  { %1909 = vmatpush.bf16.msrb.mxu1 %v7373_v29  ;;  %v7594_v55 = vld [vmem:[#allocation5 + $0x790] sm:$0xf0]  ;;  %v7469_v59 = vor.u32 %v10046_v52, %v7466_v53  ;;  %v9978_v60 = vld [vmem:[#allocation5 + $0x464] sm:$0xf]  ;;  %v9901_v52 = vld [vmem:[#allocation5 + $0x1f4] sm:$0xf0] }
  0x8b   :  { %1923 = vmatpush.bf16.msrb.mxu2 %v7501_v30  ;;  %v7194_v61 = vld [vmem:[#allocation5 + $0x470] sm:$0xf0]  ;;  %v10010_v62 = vld [vmem:[#allocation5 + $0x564] sm:$0xf]  ;;  %v7597_v63 = vor.u32 %v10078_v54, %v7594_v55  ;;  %v7008_v53 = vld [vmem:[#allocation5 + $0x2e8] sm:$0xf] }
  0x8c   :  { %1937 = vmatpush.bf16.msrb.mxu3 %v7629_v34  ;;  %v7322_v0 = vld [vmem:[#allocation5 + $0x570] sm:$0xf0]  ;;  %v10042_v2 = vld [vmem:[#allocation5 + $0x664] sm:$0xf]  ;;  %v7197_v6 = vor.u32 %v9978_v60, %v7194_v61  ;;  %v9933_v54 = vld [vmem:[#allocation5 + $0x2f4] sm:$0xf0]  ;;  %v6753_v61 = vor.u32 %v9869_v49, %v6752_v48 }
  0x8d   :  { %1896 = vmatpush.bf16.msrb.mxu0 %v7229_v41  ;;  %v7450_v3 = vld [vmem:[#allocation5 + $0x670] sm:$0xf0]  ;;  %v10074_v4 = vld [vmem:[#allocation5 + $0x764] sm:$0xf]  ;;  %v7325_v7 = vor.u32 %v10010_v62, %v7322_v0  ;;  %v6736_v0 = vld [vmem:[#allocation5 + $0xc8] sm:$0xf] }
  0x8e   :  { %1910 = vmatpush.bf16.msrb.mxu1 %v7357_v42  ;;  %v7578_v5 = vld [vmem:[#allocation5 + $0x770] sm:$0xf0]  ;;  %v7453_v8 = vor.u32 %v10042_v2, %v7450_v3  ;;  %v9974_v9 = vld [vmem:[#allocation5 + $0x444] sm:$0xf]  ;;  %v9865_v2 = vld [vmem:[#allocation5 + $0xd4] sm:$0xf0] }
  0x8f   :  { %1924 = vmatpush.bf16.msrb.mxu2 %v7485_v45  ;;  %v7178_v11 = vld [vmem:[#allocation5 + $0x450] sm:$0xf0]  ;;  %v10006_v12 = vld [vmem:[#allocation5 + $0x544] sm:$0xf]  ;;  %v7581_v13 = vor.u32 %v10074_v4, %v7578_v5  ;;  %v6864_v3 = vld [vmem:[#allocation5 + $0x1c8] sm:$0xf] }
  0x90   :  { %1938 = vmatpush.bf16.msrb.mxu3 %v7613_v50  ;;  %v7306_v14 = vld [vmem:[#allocation5 + $0x550] sm:$0xf0]  ;;  %v10038_v15 = vld [vmem:[#allocation5 + $0x644] sm:$0xf]  ;;  %v7181_v20 = vor.u32 %v9974_v9, %v7178_v11  ;;  %v6880_v50 = vld [vmem:[#allocation5 + $0x1e8] sm:$0xf]  ;;  %v6737_v11 = vor.u32 %v9865_v2, %v6736_v0 }
  0x91   :  { %1897 = vmatpush.bf16.msrb.mxu0 %v7213_v56  ;;  %v7434_v16 = vld [vmem:[#allocation5 + $0x650] sm:$0xf0]  ;;  %v10070_v18 = vld [vmem:[#allocation5 + $0x744] sm:$0xf]  ;;  %v7309_v21 = vor.u32 %v10006_v12, %v7306_v14  ;;  %v6881_v62 = vor.u32 %v9901_v52, %v6880_v50  ;;  %v9897_v5 = vld [vmem:[#allocation5 + $0x1d4] sm:$0xf0] }
  0x92   :  { %1911 = vmatpush.bf16.msrb.mxu1 %v7341_v57  ;;  %v7562_v19 = vld [vmem:[#allocation5 + $0x750] sm:$0xf0]  ;;  %v7437_v22 = vor.u32 %v10038_v15, %v7434_v16  ;;  %v9970_v23 = vld [vmem:[#allocation5 + $0x424] sm:$0xf]  ;;  %v7136_v57 = vld [vmem:[#allocation5 + $0x3e8] sm:$0xf]  ;;  %v6865_v12 = vor.u32 %v9897_v5, %v6864_v3 }
  0x93   :  { %1925 = vmatpush.bf16.msrb.mxu2 %v7469_v59  ;;  %v7162_v24 = vld [vmem:[#allocation5 + $0x430] sm:$0xf0]  ;;  %v10002_v25 = vld [vmem:[#allocation5 + $0x524] sm:$0xf]  ;;  %v7565_v26 = vor.u32 %v10070_v18, %v7562_v19  ;;  %v9965_v59 = vld [vmem:[#allocation5 + $0x3f4] sm:$0xf0] }
  0x94   :  { %1939 = vmatpush.bf16.msrb.mxu3 %v7597_v63  ;;  %v7290_v27 = vld [vmem:[#allocation5 + $0x530] sm:$0xf0]  ;;  %v10034_v28 = vld [vmem:[#allocation5 + $0x624] sm:$0xf]  ;;  %v7165_v32 = vor.u32 %v9970_v23, %v7162_v24  ;;  %v7009_v63 = vor.u32 %v9933_v54, %v7008_v53  ;;  %v7137_v4 = vor.u32 %v9965_v59, %v7136_v57  ;;  %v9961_v9 = vld [vmem:[#allocation5 + $0x3d4] sm:$0xf0] }
  0x95   :  { %1898 = vmatpush.bf16.msrb.mxu0 %v7197_v6  ;;  %v7418_v29 = vld [vmem:[#allocation5 + $0x630] sm:$0xf0]  ;;  %v10066_v30 = vld [vmem:[#allocation5 + $0x724] sm:$0xf]  ;;  %v7293_v35 = vor.u32 %v10002_v25, %v7290_v27  ;;  %v6992_v6 = vld [vmem:[#allocation5 + $0x2c8] sm:$0xf] }
  0x96   :  { %1912 = vmatpush.bf16.msrb.mxu1 %v7325_v7  ;;  %v7546_v31 = vld [vmem:[#allocation5 + $0x730] sm:$0xf0]  ;;  %v9966_v33 = vld [vmem:[#allocation5 + $0x404] sm:$0xf]  ;;  %v7421_v36 = vor.u32 %v10034_v28, %v7418_v29  ;;  %v9929_v7 = vld [vmem:[#allocation5 + $0x2d4] sm:$0xf0] }
  0x97   :  { %1926 = vmatpush.bf16.msrb.mxu2 %v7453_v8  ;;  %v7146_v34 = vld [vmem:[#allocation5 + $0x410] sm:$0xf0]  ;;  %v9998_v37 = vld [vmem:[#allocation5 + $0x504] sm:$0xf]  ;;  %v7549_v41 = vor.u32 %v10066_v30, %v7546_v31  ;;  %v7120_v8 = vld [vmem:[#allocation5 + $0x3c8] sm:$0xf] }
  0x98   :  { %1940 = vmatpush.bf16.msrb.mxu3 %v7581_v13  ;;  %v7274_v38 = vld [vmem:[#allocation5 + $0x510] sm:$0xf0]  ;;  %v10030_v40 = vld [vmem:[#allocation5 + $0x604] sm:$0xf]  ;;  %v7149_v51 = vor.u32 %v9966_v33, %v7146_v34  ;;  %v6993_v13 = vor.u32 %v9929_v7, %v6992_v6  ;;  %v6720_v14 = vld [vmem:[#allocation5 + $0xa8] sm:$0xf]  ;;  %v7121_v18 = vor.u32 %v9961_v9, %v7120_v8 }
  0x99   :  { %1899 = vmatpush.bf16.msrb.mxu0 %v7181_v20  ;;  %v7402_v42 = vld [vmem:[#allocation5 + $0x610] sm:$0xf0]  ;;  %v10062_v45 = vld [vmem:[#allocation5 + $0x704] sm:$0xf]  ;;  %v7277_v55 = vor.u32 %v9998_v37, %v7274_v38  ;;  %v9861_v15 = vld [vmem:[#allocation5 + $0xb4] sm:$0xf0] }
  0x9a   :  { %1913 = vmatpush.bf16.msrb.mxu1 %v7309_v21  ;;  %v7530_v46 = vld [vmem:[#allocation5 + $0x710] sm:$0xf0]  ;;  %v7405_v56 = vor.u32 %v10030_v40, %v7402_v42  ;;  %v6848_v16 = vld [vmem:[#allocation5 + $0x1a8] sm:$0xf]  ;;  %v9893_v19 = vld [vmem:[#allocation5 + $0x1b4] sm:$0xf0]  ;;  %v6721_v24 = vor.u32 %v9861_v15, %v6720_v14 }
  0x9b   :  { %1927 = vmatpush.bf16.msrb.mxu2 %v7437_v22  ;;  %v7533_v60 = vor.u32 %v10062_v45, %v7530_v46  ;;  %v6976_v20 = vld [vmem:[#allocation5 + $0x2a8] sm:$0xf]  ;;  %v9925_v21 = vld [vmem:[#allocation5 + $0x2b4] sm:$0xf0]  ;;  %v6849_v25 = vor.u32 %v9893_v19, %v6848_v16 }
  0x9c   :  { %1941 = vmatpush.bf16.msrb.mxu3 %v7565_v26  ;;  %v7104_v22 = vld [vmem:[#allocation5 + $0x3a8] sm:$0xf]  ;;  %v9957_v23 = vld [vmem:[#allocation5 + $0x3b4] sm:$0xf0]  ;;  %v6977_v26 = vor.u32 %v9925_v21, %v6976_v20 }
  0x9d   :  { %1900 = vmatpush.bf16.msrb.mxu0 %v7165_v32  ;;  %v6704_v27 = vld [vmem:[#allocation5 + $0x88] sm:$0xf]  ;;  %v9857_v28 = vld [vmem:[#allocation5 + $0x94] sm:$0xf0]  ;;  %v7105_v30 = vor.u32 %v9957_v23, %v7104_v22 }
  0x9e   :  { %1914 = vmatpush.bf16.msrb.mxu1 %v7293_v35  ;;  %v6832_v29 = vld [vmem:[#allocation5 + $0x188] sm:$0xf]  ;;  %v9889_v31 = vld [vmem:[#allocation5 + $0x194] sm:$0xf0] }
  0x9f   :  { %1928 = vmatpush.bf16.msrb.mxu2 %v7421_v36  ;;  %v6960_v32 = vld [vmem:[#allocation5 + $0x288] sm:$0xf]  ;;  %v9921_v33 = vld [vmem:[#allocation5 + $0x294] sm:$0xf0]  ;;  %v6705_v36 = vor.u32 %v9857_v28, %v6704_v27  ;;  %v6833_v37 = vor.u32 %v9889_v31, %v6832_v29 }
  0xa0   :  { %1942 = vmatpush.bf16.msrb.mxu3 %v7549_v41  ;;  %v7088_v34 = vld [vmem:[#allocation5 + $0x388] sm:$0xf]  ;;  %v9953_v35 = vld [vmem:[#allocation5 + $0x394] sm:$0xf0]  ;;  %v6961_v38 = vor.u32 %v9921_v33, %v6960_v32 }
  0xa1   :  { %1901 = vmatpush.bf16.msrb.mxu0 %v7149_v51  ;;  %v6688_v40 = vld [vmem:[#allocation5 + $0x68] sm:$0xf]  ;;  %v9853_v41 = vld [vmem:[#allocation5 + $0x74] sm:$0xf0]  ;;  %v7089_v45 = vor.u32 %v9953_v35, %v7088_v34 }
  0xa2   :  { %1915 = vmatpush.bf16.msrb.mxu1 %v7277_v55  ;;  %v6816_v42 = vld [vmem:[#allocation5 + $0x168] sm:$0xf]  ;;  %v9885_v46 = vld [vmem:[#allocation5 + $0x174] sm:$0xf0]  ;;  %v6689_v52 = vor.u32 %v9853_v41, %v6688_v40 }
  0xa3   :  { %1929 = vmatpush.bf16.msrb.mxu2 %v7405_v56  ;;  %v6944_v48 = vld [vmem:[#allocation5 + $0x268] sm:$0xf]  ;;  %v9917_v49 = vld [vmem:[#allocation5 + $0x274] sm:$0xf0]  ;;  %v6817_v53 = vor.u32 %v9885_v46, %v6816_v42 }
  0xa4   :  { %1943 = vmatpush.bf16.msrb.mxu3 %v7533_v60  ;;  %1902 = vmatmul.bf16.vlgmr.msrb.gmra.mxu0 %v11018_v39  ;;  %v7072_v50 = vld [vmem:[#allocation5 + $0x368] sm:$0xf]  ;;  %v9949_v51 = vld [vmem:[#allocation5 + $0x374] sm:$0xf0]  ;;  %v6945_v54 = vor.u32 %v9917_v49, %v6944_v48 }
  0xa5   :  { %1950 = vmatpush.bf16.msra.mxu0 %v6753_v61  ;;  %1916 = vmatmul.bf16.vlgmr.msrb.gmra.mxu1 %v11022_v44  ;;  %v6672_v55 = vld [vmem:[#allocation5 + $0x48] sm:$0xf]  ;;  %v9849_v56 = vld [vmem:[#allocation5 + $0x54] sm:$0xf0]  ;;  %v7073_v59 = vor.u32 %v9949_v51, %v7072_v50 }
  0xa6   :  { %1964 = vmatpush.bf16.msra.mxu1 %v6881_v62  ;;  %1930 = vmatmul.bf16.vlgmr.msrb.gmra.mxu2 %v11020_v43  ;;  %v6800_v57 = vld [vmem:[#allocation5 + $0x148] sm:$0xf]  ;;  %v9881_v60 = vld [vmem:[#allocation5 + $0x154] sm:$0xf0]  ;;  %v6673_v2 = vor.u32 %v9849_v56, %v6672_v55 }
  0xa7   :  { %1978 = vmatpush.bf16.msra.mxu2 %v7009_v63  ;;  %1944 = vmatmul.bf16.vlgmr.msrb.gmra.mxu3 %v11024_v47  ;;  %v6928_v61 = vld [vmem:[#allocation5 + $0x248] sm:$0xf]  ;;  %v9913_v62 = vld [vmem:[#allocation5 + $0x254] sm:$0xf0]  ;;  %v6801_v3 = vor.u32 %v9881_v60, %v6800_v57 }
  0xa8   :  { %1992 = vmatpush.bf16.msra.mxu3 %v7137_v4  ;;  %v7056_v63 = vld [vmem:[#allocation5 + $0x348] sm:$0xf]  ;;  %v9945_v0 = vld [vmem:[#allocation5 + $0x354] sm:$0xf0]  ;;  %v6929_v4 = vor.u32 %v9913_v62, %v6928_v61 }
  0xa9   :  { %1951 = vmatpush.bf16.msra.mxu0 %v6737_v11  ;;  %v6656_v5 = vld [vmem:[#allocation5 + $0x28] sm:$0xf]  ;;  %v9845_v6 = vld [vmem:[#allocation5 + $0x34] sm:$0xf0]  ;;  %v7057_v8 = vor.u32 %v9945_v0, %v7056_v63 }
  0xaa   :  { %1965 = vmatpush.bf16.msra.mxu1 %v6865_v12  ;;  %v6784_v7 = vld [vmem:[#allocation5 + $0x128] sm:$0xf]  ;;  %v9877_v9 = vld [vmem:[#allocation5 + $0x134] sm:$0xf0]  ;;  %v6657_v15 = vor.u32 %v9845_v6, %v6656_v5 }
  0xab   :  { %1979 = vmatpush.bf16.msra.mxu2 %v6993_v13  ;;  %v6912_v11 = vld [vmem:[#allocation5 + $0x228] sm:$0xf]  ;;  %v9909_v12 = vld [vmem:[#allocation5 + $0x234] sm:$0xf0]  ;;  %v6785_v19 = vor.u32 %v9877_v9, %v6784_v7 }
  0xac   :  { %1993 = vmatpush.bf16.msra.mxu3 %v7121_v18  ;;  %v7040_v13 = vld [vmem:[#allocation5 + $0x328] sm:$0xf]  ;;  %v9941_v14 = vld [vmem:[#allocation5 + $0x334] sm:$0xf0]  ;;  %v6913_v20 = vor.u32 %v9909_v12, %v6912_v11 }
  0xad   :  { %1952 = vmatpush.bf16.msra.mxu0 %v6721_v24  ;;  %v6640_v16 = vld [vmem:[#allocation5 + $0x8] sm:$0xf]  ;;  %v9841_v18 = vld [vmem:[#allocation5 + $0x14] sm:$0xf0]  ;;  %v7041_v24 = vor.u32 %v9941_v14, %v7040_v13 }
  0xae   :  { %1966 = vmatpush.bf16.msra.mxu1 %v6849_v25  ;;  %v6768_v21 = vld [vmem:[#allocation5 + $0x108] sm:$0xf]  ;;  %v9873_v22 = vld [vmem:[#allocation5 + $0x114] sm:$0xf0]  ;;  %v6641_v31 = vor.u32 %v9841_v18, %v6640_v16 }
  0xaf   :  { %1980 = vmatpush.bf16.msra.mxu2 %v6977_v26  ;;  %v6896_v23 = vld [vmem:[#allocation5 + $0x208] sm:$0xf]  ;;  %v9905_v25 = vld [vmem:[#allocation5 + $0x214] sm:$0xf0]  ;;  %v6769_v35 = vor.u32 %v9873_v22, %v6768_v21 }
  0xb0   :  { %1994 = vmatpush.bf16.msra.mxu3 %v7105_v30  ;;  %v7024_v26 = vld [vmem:[#allocation5 + $0x308] sm:$0xf]  ;;  %v9937_v27 = vld [vmem:[#allocation5 + $0x314] sm:$0xf0] }
  0xb1   :  { %1953 = vmatpush.bf16.msra.mxu0 %v6705_v36  ;;  %v7264_v28 = vld [vmem:[#allocation5 + $0x4e8] sm:$0xf]  ;;  %v9997_v29 = vld [vmem:[#allocation5 + $0x4f4] sm:$0xf0]  ;;  %v6897_v36 = vor.u32 %v9905_v25, %v6896_v23  ;;  %v7025_v40 = vor.u32 %v9937_v27, %v7024_v26 }
  0xb2   :  { %1967 = vmatpush.bf16.msra.mxu1 %v6833_v37  ;;  %v7392_v30 = vld [vmem:[#allocation5 + $0x5e8] sm:$0xf]  ;;  %v10029_v32 = vld [vmem:[#allocation5 + $0x5f4] sm:$0xf0]  ;;  %v7265_v41 = vor.u32 %v9997_v29, %v7264_v28 }
  0xb3   :  { %1981 = vmatpush.bf16.msra.mxu2 %v6961_v38  ;;  %v7520_v33 = vld [vmem:[#allocation5 + $0x6e8] sm:$0xf]  ;;  %v10061_v34 = vld [vmem:[#allocation5 + $0x6f4] sm:$0xf0]  ;;  %v7393_v42 = vor.u32 %v10029_v32, %v7392_v30 }
  0xb4   :  { %1995 = vmatpush.bf16.msra.mxu3 %v7089_v45  ;;  %v7648_v37 = vld [vmem:[#allocation5 + $0x7e8] sm:$0xf]  ;;  %v10093_v38 = vld [vmem:[#allocation5 + $0x7f4] sm:$0xf0]  ;;  %v7521_v45 = vor.u32 %v10061_v34, %v7520_v33 }
  0xb5   :  { %1954 = vmatpush.bf16.msra.mxu0 %v6689_v52  ;;  %v7248_v46 = vld [vmem:[#allocation5 + $0x4c8] sm:$0xf]  ;;  %v9993_v48 = vld [vmem:[#allocation5 + $0x4d4] sm:$0xf0]  ;;  %v7649_v50 = vor.u32 %v10093_v38, %v7648_v37 }
  0xb6   :  { %1968 = vmatpush.bf16.msra.mxu1 %v6817_v53  ;;  %v7376_v49 = vld [vmem:[#allocation5 + $0x5c8] sm:$0xf]  ;;  %v10025_v51 = vld [vmem:[#allocation5 + $0x5d4] sm:$0xf0]  ;;  %v7249_v56 = vor.u32 %v9993_v48, %v7248_v46 }
  0xb7   :  { %1982 = vmatpush.bf16.msra.mxu2 %v6945_v54  ;;  %v7504_v52 = vld [vmem:[#allocation5 + $0x6c8] sm:$0xf]  ;;  %v10057_v53 = vld [vmem:[#allocation5 + $0x6d4] sm:$0xf0]  ;;  %v7377_v57 = vor.u32 %v10025_v51, %v7376_v49 }
  0xb8   :  { %1996 = vmatpush.bf16.msra.mxu3 %v7073_v59  ;;  %v7632_v54 = vld [vmem:[#allocation5 + $0x7c8] sm:$0xf]  ;;  %v10089_v55 = vld [vmem:[#allocation5 + $0x7d4] sm:$0xf0]  ;;  %v7505_v59 = vor.u32 %v10057_v53, %v7504_v52 }
  0xb9   :  { %1955 = vmatpush.bf16.msra.mxu0 %v6673_v2  ;;  %v7232_v60 = vld [vmem:[#allocation5 + $0x4a8] sm:$0xf]  ;;  %v9989_v61 = vld [vmem:[#allocation5 + $0x4b4] sm:$0xf0]  ;;  %v7633_v63 = vor.u32 %v10089_v55, %v7632_v54 }
  0xba   :  { %1969 = vmatpush.bf16.msra.mxu1 %v6801_v3  ;;  %v7360_v62 = vld [vmem:[#allocation5 + $0x5a8] sm:$0xf]  ;;  %v10021_v0 = vld [vmem:[#allocation5 + $0x5b4] sm:$0xf0]  ;;  %v7233_v6 = vor.u32 %v9989_v61, %v7232_v60 }
  0xbb   :  { %1983 = vmatpush.bf16.msra.mxu2 %v6929_v4  ;;  %v7488_v2 = vld [vmem:[#allocation5 + $0x6a8] sm:$0xf]  ;;  %v10053_v3 = vld [vmem:[#allocation5 + $0x6b4] sm:$0xf0]  ;;  %v7361_v7 = vor.u32 %v10021_v0, %v7360_v62 }
  0xbc   :  { %1997 = vmatpush.bf16.msra.mxu3 %v7057_v8  ;;  %v7616_v4 = vld [vmem:[#allocation5 + $0x7a8] sm:$0xf]  ;;  %v10085_v5 = vld [vmem:[#allocation5 + $0x7b4] sm:$0xf0]  ;;  %v7489_v8 = vor.u32 %v10053_v3, %v7488_v2 }
  0xbd   :  { %1956 = vmatpush.bf16.msra.mxu0 %v6657_v15  ;;  %v7216_v9 = vld [vmem:[#allocation5 + $0x488] sm:$0xf]  ;;  %v9985_v11 = vld [vmem:[#allocation5 + $0x494] sm:$0xf0]  ;;  %v7617_v13 = vor.u32 %v10085_v5, %v7616_v4 }
  0xbe   :  { %1970 = vmatpush.bf16.msra.mxu1 %v6785_v19  ;;  %v7344_v12 = vld [vmem:[#allocation5 + $0x588] sm:$0xf]  ;;  %v10017_v14 = vld [vmem:[#allocation5 + $0x594] sm:$0xf0] }
  0xbf   :  { %1984 = vmatpush.bf16.msra.mxu2 %v6913_v20  ;;  %v7472_v15 = vld [vmem:[#allocation5 + $0x688] sm:$0xf]  ;;  %v10049_v16 = vld [vmem:[#allocation5 + $0x694] sm:$0xf0]  ;;  %v7217_v20 = vor.u32 %v9985_v11, %v7216_v9  ;;  %v7345_v21 = vor.u32 %v10017_v14, %v7344_v12  ;;  %v9867_v11 = vld [vmem:[#allocation5 + $0xec] sm:$0xf] }
  0xc0   :  { %1998 = vmatpush.bf16.msra.mxu3 %v7041_v24  ;;  %v7600_v18 = vld [vmem:[#allocation5 + $0x788] sm:$0xf]  ;;  %v10081_v19 = vld [vmem:[#allocation5 + $0x794] sm:$0xf0]  ;;  %v7473_v22 = vor.u32 %v10049_v16, %v7472_v15  ;;  %v6754_v12 = vld [vmem:[#allocation5 + $0xf8] sm:$0xf0] }
  0xc1   :  { %1957 = vmatpush.bf16.msra.mxu0 %v6641_v31  ;;  %v7200_v23 = vld [vmem:[#allocation5 + $0x468] sm:$0xf]  ;;  %v9981_v24 = vld [vmem:[#allocation5 + $0x474] sm:$0xf0]  ;;  %v7601_v26 = vor.u32 %v10081_v19, %v7600_v18  ;;  %v6882_v15 = vld [vmem:[#allocation5 + $0x1f8] sm:$0xf0] }
  0xc2   :  { %1971 = vmatpush.bf16.msra.mxu1 %v6769_v35  ;;  %v7328_v25 = vld [vmem:[#allocation5 + $0x568] sm:$0xf]  ;;  %v10013_v27 = vld [vmem:[#allocation5 + $0x574] sm:$0xf0]  ;;  %v7201_v32 = vor.u32 %v9981_v24, %v7200_v23  ;;  %v9931_v16 = vld [vmem:[#allocation5 + $0x2ec] sm:$0xf]  ;;  %v6757_v24 = vor.u32 %v9867_v11, %v6754_v12 }
  0xc3   :  { %1985 = vmatpush.bf16.msra.mxu2 %v6897_v36  ;;  %v7456_v28 = vld [vmem:[#allocation5 + $0x668] sm:$0xf]  ;;  %v10045_v29 = vld [vmem:[#allocation5 + $0x674] sm:$0xf0]  ;;  %v7329_v33 = vor.u32 %v10013_v27, %v7328_v25  ;;  %v7010_v18 = vld [vmem:[#allocation5 + $0x2f8] sm:$0xf0] }
  0xc4   :  { %1999 = vmatpush.bf16.msra.mxu3 %v7025_v40  ;;  %1958 = vmatmul.bf16.vlgmr.msra.gmra.mxu0 %v11006_v58  ;;  %v7584_v30 = vld [vmem:[#allocation5 + $0x768] sm:$0xf]  ;;  %v10077_v31 = vld [vmem:[#allocation5 + $0x774] sm:$0xf0]  ;;  %v7457_v34 = vor.u32 %v10045_v29, %v7456_v28  ;;  %v9863_v27 = vld [vmem:[#allocation5 + $0xcc] sm:$0xf] }
  0xc5   :  { %2006 = vmatpush.bf16.msrb.mxu0 %v7265_v41  ;;  %1972 = vmatmul.bf16.vlgmr.msra.gmra.mxu1 %v11012_v10  ;;  %v7184_v35 = vld [vmem:[#allocation5 + $0x448] sm:$0xf]  ;;  %v9977_v36 = vld [vmem:[#allocation5 + $0x454] sm:$0xf0]  ;;  %v7585_v38 = vor.u32 %v10077_v31, %v7584_v30  ;;  %v6738_v28 = vld [vmem:[#allocation5 + $0xd8] sm:$0xf0] }
  0xc6   :  { %2020 = vmatpush.bf16.msrb.mxu1 %v7393_v42  ;;  %1986 = vmatmul.bf16.vlgmr.msra.gmra.mxu2 %v11008_v1  ;;  %v7312_v37 = vld [vmem:[#allocation5 + $0x548] sm:$0xf]  ;;  %v10009_v40 = vld [vmem:[#allocation5 + $0x554] sm:$0xf0]  ;;  %v7185_v48 = vor.u32 %v9977_v36, %v7184_v35  ;;  %v9895_v29 = vld [vmem:[#allocation5 + $0x1cc] sm:$0xf]  ;;  %v6741_v36 = vor.u32 %v9863_v27, %v6738_v28 }
  0xc7   :  { %2034 = vmatpush.bf16.msrb.mxu2 %v7521_v45  ;;  %2000 = vmatmul.bf16.vlgmr.msra.gmra.mxu3 %v11014_v17  ;;  %v7440_v41 = vld [vmem:[#allocation5 + $0x648] sm:$0xf]  ;;  %v10041_v42 = vld [vmem:[#allocation5 + $0x654] sm:$0xf0]  ;;  %v7313_v49 = vor.u32 %v10009_v40, %v7312_v37  ;;  %v6866_v31 = vld [vmem:[#allocation5 + $0x1d8] sm:$0xf0] }
  0xc8   :  { %2048 = vmatpush.bf16.msrb.mxu3 %v7649_v50  ;;  %v7568_v45 = vld [vmem:[#allocation5 + $0x748] sm:$0xf]  ;;  %v10073_v46 = vld [vmem:[#allocation5 + $0x754] sm:$0xf0]  ;;  %v7441_v50 = vor.u32 %v10041_v42, %v7440_v41  ;;  %v7122_v35 = vld [vmem:[#allocation5 + $0x3d8] sm:$0xf0]  ;;  %v6869_v37 = vor.u32 %v9895_v29, %v6866_v31 }
  0xc9   :  { %2007 = vmatpush.bf16.msrb.mxu0 %v7249_v56  ;;  %v7168_v51 = vld [vmem:[#allocation5 + $0x428] sm:$0xf]  ;;  %v9973_v52 = vld [vmem:[#allocation5 + $0x434] sm:$0xf0]  ;;  %v7569_v54 = vor.u32 %v10073_v46, %v7568_v45  ;;  %v9859_v40 = vld [vmem:[#allocation5 + $0xac] sm:$0xf] }
  0xca   :  { %2021 = vmatpush.bf16.msrb.mxu1 %v7377_v57  ;;  %v7296_v53 = vld [vmem:[#allocation5 + $0x528] sm:$0xf]  ;;  %v10005_v55 = vld [vmem:[#allocation5 + $0x534] sm:$0xf0]  ;;  %v7169_v61 = vor.u32 %v9973_v52, %v7168_v51  ;;  %v6722_v41 = vld [vmem:[#allocation5 + $0xb8] sm:$0xf0] }
  0xcb   :  { %2035 = vmatpush.bf16.msrb.mxu2 %v7505_v59  ;;  %v7424_v56 = vld [vmem:[#allocation5 + $0x628] sm:$0xf]  ;;  %v10037_v57 = vld [vmem:[#allocation5 + $0x634] sm:$0xf0]  ;;  %v7297_v0 = vor.u32 %v10005_v55, %v7296_v53  ;;  %v9891_v42 = vld [vmem:[#allocation5 + $0x1ac] sm:$0xf]  ;;  %v6725_v52 = vor.u32 %v9859_v40, %v6722_v41 }
  0xcc   :  { %2049 = vmatpush.bf16.msrb.mxu3 %v7633_v63  ;;  %v7552_v59 = vld [vmem:[#allocation5 + $0x728] sm:$0xf]  ;;  %v10069_v60 = vld [vmem:[#allocation5 + $0x734] sm:$0xf0]  ;;  %v7425_v2 = vor.u32 %v10037_v57, %v7424_v56  ;;  %v6850_v46 = vld [vmem:[#allocation5 + $0x1b8] sm:$0xf0] }
  0xcd   :  { %2008 = vmatpush.bf16.msrb.mxu0 %v7233_v6  ;;  %v7152_v62 = vld [vmem:[#allocation5 + $0x408] sm:$0xf]  ;;  %v9969_v63 = vld [vmem:[#allocation5 + $0x414] sm:$0xf0]  ;;  %v7553_v6 = vor.u32 %v10069_v60, %v7552_v59  ;;  %v7106_v51 = vld [vmem:[#allocation5 + $0x3b8] sm:$0xf0]  ;;  %v6853_v53 = vor.u32 %v9891_v42, %v6850_v46 }
  0xce   :  { %2022 = vmatpush.bf16.msrb.mxu1 %v7361_v7  ;;  %v7280_v3 = vld [vmem:[#allocation5 + $0x508] sm:$0xf]  ;;  %v10001_v4 = vld [vmem:[#allocation5 + $0x514] sm:$0xf0]  ;;  %v7153_v14 = vor.u32 %v9969_v63, %v7152_v62  ;;  %v9855_v55 = vld [vmem:[#allocation5 + $0x8c] sm:$0xf] }
  0xcf   :  { %2036 = vmatpush.bf16.msrb.mxu2 %v7489_v8  ;;  %v7408_v5 = vld [vmem:[#allocation5 + $0x608] sm:$0xf]  ;;  %v10033_v7 = vld [vmem:[#allocation5 + $0x614] sm:$0xf0]  ;;  %v7281_v19 = vor.u32 %v10001_v4, %v7280_v3  ;;  %v6706_v56 = vld [vmem:[#allocation5 + $0x98] sm:$0xf0]  ;;  %v11046_v3 = vpop.f32.mrf.mxu0 }
  0xd0   :  { %2050 = vmatpush.bf16.msrb.mxu3 %v7617_v13  ;;  %v7536_v8 = vld [vmem:[#allocation5 + $0x708] sm:$0xf]  ;;  %v10065_v9 = vld [vmem:[#allocation5 + $0x714] sm:$0xf0]  ;;  %v9899_v13 = vld [vmem:[#allocation5 + $0x1ec] sm:$0xf] }
  0xd1   :  { %2009 = vmatpush.bf16.msrb.mxu0 %v7217_v20  ;;  %v7409_v20 = vor.u32 %v10033_v7, %v7408_v5  ;;  %v7537_v23 = vor.u32 %v10065_v9, %v7536_v8  ;;  %v6885_v25 = vor.u32 %v9899_v13, %v6882_v15  ;;  %v9887_v57 = vld [vmem:[#allocation5 + $0x18c] sm:$0xf]  ;;  %v6834_v60 = vld [vmem:[#allocation5 + $0x198] sm:$0xf0]  ;;  %v11048_v9 = vpop.f32.mrf.mxu1 }
  0xd2   :  { %2023 = vmatpush.bf16.msrb.mxu1 %v7345_v21  ;;  %v9963_v21 = vld [vmem:[#allocation5 + $0x3ec] sm:$0xf]  ;;  %v6962_v62 = vld [vmem:[#allocation5 + $0x298] sm:$0xf0]  ;;  %v6837_v4 = vor.u32 %v9887_v57, %v6834_v60 }
  0xd3   :  { %2037 = vmatpush.bf16.msrb.mxu2 %v7473_v22  ;;  %v7138_v22 = vld [vmem:[#allocation5 + $0x3f8] sm:$0xf0]  ;;  %v9951_v63 = vld [vmem:[#allocation5 + $0x38c] sm:$0xf] }
  0xd4   :  { %2051 = vmatpush.bf16.msrb.mxu3 %v7601_v26  ;;  %v7013_v26 = vor.u32 %v9931_v16, %v7010_v18  ;;  %v7141_v30 = vor.u32 %v9963_v21, %v7138_v22  ;;  %v6690_v7 = vld [vmem:[#allocation5 + $0x78] sm:$0xf0]  ;;  %v9883_v8 = vld [vmem:[#allocation5 + $0x16c] sm:$0xf] }
  0xd5   :  { %2010 = vmatpush.bf16.msrb.mxu0 %v7201_v32  ;;  %v9927_v32 = vld [vmem:[#allocation5 + $0x2cc] sm:$0xf]  ;;  %v6818_v12 = vld [vmem:[#allocation5 + $0x178] sm:$0xf0] }
  0xd6   :  { %2024 = vmatpush.bf16.msrb.mxu1 %v7329_v33  ;;  %v6994_v33 = vld [vmem:[#allocation5 + $0x2d8] sm:$0xf0]  ;;  %v9915_v13 = vld [vmem:[#allocation5 + $0x26c] sm:$0xf] }
  0xd7   :  { %2038 = vmatpush.bf16.msrb.mxu2 %v7457_v34  ;;  %v9959_v34 = vld [vmem:[#allocation5 + $0x3cc] sm:$0xf]  ;;  %v7074_v16 = vld [vmem:[#allocation5 + $0x378] sm:$0xf0] }
  0xd8   :  { %2052 = vmatpush.bf16.msrb.mxu3 %v7585_v38  ;;  %v6997_v38 = vor.u32 %v9927_v32, %v6994_v33  ;;  %v7125_v45 = vor.u32 %v9959_v34, %v7122_v35  ;;  %v9947_v15 = vld [vmem:[#allocation5 + $0x36c] sm:$0xf]  ;;  %v6674_v22 = vld [vmem:[#allocation5 + $0x58] sm:$0xf0]  ;;  %v11052_v32 = vpop.f32.mrf.mxu3 }
  0xd9   :  { %2011 = vmatpush.bf16.msrb.mxu0 %v7185_v48  ;;  %v9923_v48 = vld [vmem:[#allocation5 + $0x2ac] sm:$0xf]  ;;  %v6930_v27 = vld [vmem:[#allocation5 + $0x258] sm:$0xf0] }
  0xda   :  { %2025 = vmatpush.bf16.msrb.mxu1 %v7313_v49  ;;  %v6978_v49 = vld [vmem:[#allocation5 + $0x2b8] sm:$0xf0]  ;;  %v9847_v21 = vld [vmem:[#allocation5 + $0x4c] sm:$0xf] }
  0xdb   :  { %2039 = vmatpush.bf16.msrb.mxu2 %v7441_v50  ;;  %v9955_v50 = vld [vmem:[#allocation5 + $0x3ac] sm:$0xf]  ;;  %v7058_v29 = vld [vmem:[#allocation5 + $0x358] sm:$0xf0]  ;;  %v6677_v31 = vor.u32 %v9847_v21, %v6674_v22 }
  0xdc   :  { %2053 = vmatpush.bf16.msrb.mxu3 %v7569_v54  ;;  %v6981_v54 = vor.u32 %v9923_v48, %v6978_v49  ;;  %v7109_v59 = vor.u32 %v9955_v50, %v7106_v51  ;;  %v9943_v28 = vld [vmem:[#allocation5 + $0x34c] sm:$0xf]  ;;  %v6786_v40 = vld [vmem:[#allocation5 + $0x138] sm:$0xf0]  ;;  %v11056_v49 = vpop.f32.mrf.mxu1 }
  0xdd   :  { %2012 = vmatpush.bf16.msrb.mxu0 %v7169_v61  ;;  %v9919_v61 = vld [vmem:[#allocation5 + $0x28c] sm:$0xf]  ;;  %v6914_v42 = vld [vmem:[#allocation5 + $0x238] sm:$0xf0] }
  0xde   :  { %2026 = vmatpush.bf16.msrb.mxu1 %v7297_v0  ;;  %v7090_v0 = vld [vmem:[#allocation5 + $0x398] sm:$0xf0]  ;;  %v6965_v5 = vor.u32 %v9919_v61, %v6962_v62  ;;  %v9843_v35 = vld [vmem:[#allocation5 + $0x2c] sm:$0xf] }
  0xdf   :  { %2040 = vmatpush.bf16.msrb.mxu2 %v7425_v2  ;;  %v6709_v2 = vor.u32 %v9855_v55, %v6706_v56  ;;  %v7093_v11 = vor.u32 %v9951_v63, %v7090_v0  ;;  %v9907_v41 = vld [vmem:[#allocation5 + $0x22c] sm:$0xf]  ;;  %v7042_v48 = vld [vmem:[#allocation5 + $0x338] sm:$0xf0] }
  0xe0   :  { %2054 = vmatpush.bf16.msrb.mxu3 %v7553_v6  ;;  %v9851_v6 = vld [vmem:[#allocation5 + $0x6c] sm:$0xf]  ;;  %v6770_v56 = vld [vmem:[#allocation5 + $0x118] sm:$0xf0] }
  0xe1   :  { %2013 = vmatpush.bf16.msrb.mxu0 %v7153_v14  ;;  %v6946_v14 = vld [vmem:[#allocation5 + $0x278] sm:$0xf0]  ;;  %v6693_v18 = vor.u32 %v9851_v6, %v6690_v7  ;;  %v9939_v46 = vld [vmem:[#allocation5 + $0x32c] sm:$0xf] }
  0xe2   :  { %2027 = vmatpush.bf16.msrb.mxu1 %v7281_v19  ;;  %v6821_v19 = vor.u32 %v9883_v8, %v6818_v12  ;;  %v9839_v51 = vld [vmem:[#allocation5 + $0xc] sm:$0xf]  ;;  %v6898_v60 = vld [vmem:[#allocation5 + $0x218] sm:$0xf0] }
  0xe3   :  { %2041 = vmatpush.bf16.msrb.mxu2 %v7409_v20  ;;  %v6949_v20 = vor.u32 %v9915_v13, %v6946_v14  ;;  %v9871_v55 = vld [vmem:[#allocation5 + $0x10c] sm:$0xf]  ;;  %v7026_v62 = vld [vmem:[#allocation5 + $0x318] sm:$0xf0] }
  0xe4   :  { %2055 = vmatpush.bf16.msrb.mxu3 %v7537_v23  ;;  %2014 = vmatmul.bf16.vlgmr.msrb.gmra.mxu0 %v11018_v39  ;;  %v9879_v23 = vld [vmem:[#allocation5 + $0x14c] sm:$0xf]  ;;  %v7266_v0 = vld [vmem:[#allocation5 + $0x4f8] sm:$0xf0]  ;;  %v6773_v8 = vor.u32 %v9871_v55, %v6770_v56 }
  0xe5   :  { %2062 = vmatpush.bf16.msra.mxu0 %v6757_v24  ;;  %2028 = vmatmul.bf16.vlgmr.msrb.gmra.mxu1 %v11022_v44  ;;  %v7077_v24 = vor.u32 %v9947_v15, %v7074_v16  ;;  %v9903_v57 = vld [vmem:[#allocation5 + $0x20c] sm:$0xf]  ;;  %v7522_v7 = vld [vmem:[#allocation5 + $0x6f8] sm:$0xf0] }
  0xe6   :  { %2076 = vmatpush.bf16.msra.mxu1 %v6885_v25  ;;  %2042 = vmatmul.bf16.vlgmr.msrb.gmra.mxu2 %v11020_v43  ;;  %v6802_v25 = vld [vmem:[#allocation5 + $0x158] sm:$0xf0]  ;;  %v9935_v61 = vld [vmem:[#allocation5 + $0x30c] sm:$0xf] }
  0xe7   :  { %2090 = vmatpush.bf16.msra.mxu2 %v7013_v26  ;;  %2056 = vmatmul.bf16.vlgmr.msrb.gmra.mxu3 %v11024_v47  ;;  %v9911_v26 = vld [vmem:[#allocation5 + $0x24c] sm:$0xf]  ;;  %v6805_v33 = vor.u32 %v9879_v23, %v6802_v25  ;;  %v7650_v13 = vld [vmem:[#allocation5 + $0x7f8] sm:$0xf0]  ;;  %v7029_v15 = vor.u32 %v9935_v61, %v7026_v62 }
  0xe8   :  { %2104 = vmatpush.bf16.msra.mxu3 %v7141_v30  ;;  %v11050_v30 = vpop.f32.mrf.mxu2  ;;  %v6933_v34 = vor.u32 %v9911_v26, %v6930_v27  ;;  %v9995_v63 = vld [vmem:[#allocation5 + $0x4ec] sm:$0xf]  ;;  %v7250_v22 = vld [vmem:[#allocation5 + $0x4d8] sm:$0xf0] }
  0xe9   :  { %2063 = vmatpush.bf16.msra.mxu0 %v6741_v36  ;;  %v6658_v36 = vld [vmem:[#allocation5 + $0x38] sm:$0xf0]  ;;  %v10059_v6 = vld [vmem:[#allocation5 + $0x6ec] sm:$0xf]  ;;  %v7269_v16 = vor.u32 %v9995_v63, %v7266_v0  ;;  %v11074_v0 = vld [vmem:[#allocation7] sm:$0xf] }
  0xea   :  { %2077 = vmatpush.bf16.msra.mxu1 %v6869_v37  ;;  %v9875_v37 = vld [vmem:[#allocation5 + $0x12c] sm:$0xf]  ;;  %v6661_v50 = vor.u32 %v9843_v35, %v6658_v36  ;;  %v7378_v25 = vld [vmem:[#allocation5 + $0x5d8] sm:$0xf0] }
  0xeb   :  { %2091 = vmatpush.bf16.msra.mxu2 %v6997_v38  ;;  %v7061_v38 = vor.u32 %v9943_v28, %v7058_v29  ;;  %v10091_v12 = vld [vmem:[#allocation5 + $0x7ec] sm:$0xf]  ;;  %v7506_v27 = vld [vmem:[#allocation5 + $0x6d8] sm:$0xf0] }
  0xec   :  { %2105 = vmatpush.bf16.msra.mxu3 %v7125_v45  ;;  %v11054_v45 = vpop.f32.mrf.mxu0  ;;  %v9991_v21 = vld [vmem:[#allocation5 + $0x4cc] sm:$0xf]  ;;  %v7218_v56 = vld [vmem:[#allocation5 + $0x498] sm:$0xf0] }
  0xed   :  { %2064 = vmatpush.bf16.msra.mxu0 %v6725_v52  ;;  %v6642_v52 = vld [vmem:[#allocation5 + $0x18] sm:$0xf0]  ;;  %v10023_v23 = vld [vmem:[#allocation5 + $0x5cc] sm:$0xf] }
  0xee   :  { %2078 = vmatpush.bf16.msra.mxu1 %v6853_v53  ;;  %v6789_v53 = vor.u32 %v9875_v37, %v6786_v40  ;;  %v10055_v26 = vld [vmem:[#allocation5 + $0x6cc] sm:$0xf]  ;;  %v7381_v35 = vor.u32 %v10023_v23, %v7378_v25  ;;  %v7602_v63 = vld [vmem:[#allocation5 + $0x798] sm:$0xf0] }
  0xef   :  { %2092 = vmatpush.bf16.msra.mxu2 %v6981_v54  ;;  %v6917_v54 = vor.u32 %v9907_v41, %v6914_v42  ;;  %v10087_v29 = vld [vmem:[#allocation5 + $0x7cc] sm:$0xf]  ;;  %v7509_v36 = vor.u32 %v10055_v26, %v7506_v27  ;;  %v7362_v42 = vld [vmem:[#allocation5 + $0x5b8] sm:$0xf0] }
  0xf0   :  { %2106 = vmatpush.bf16.msra.mxu3 %v7109_v59  ;;  %v7045_v59 = vor.u32 %v9939_v46, %v7042_v48  ;;  %v11058_v14 = vpop.f32.mrf.mxu2  ;;  %v9987_v37 = vld [vmem:[#allocation5 + $0x4ac] sm:$0xf]  ;;  %v7490_v48 = vld [vmem:[#allocation5 + $0x6b8] sm:$0xf0] }
  0xf1   :  { %2065 = vmatpush.bf16.msra.mxu0 %v6709_v2  ;;  %v10027_v2 = vld [vmem:[#allocation5 + $0x5ec] sm:$0xf]  ;;  %v7186_v26 = vld [vmem:[#allocation5 + $0x458] sm:$0xf0] }
  0xf2   :  { %2079 = vmatpush.bf16.msra.mxu1 %v6837_v4  ;;  %v6645_v4 = vor.u32 %v9839_v51, %v6642_v52  ;;  %v10019_v40 = vld [vmem:[#allocation5 + $0x5ac] sm:$0xf]  ;;  %v7618_v51 = vld [vmem:[#allocation5 + $0x7b8] sm:$0xf0] }
  0xf3   :  { %2093 = vmatpush.bf16.msra.mxu2 %v6965_v5  ;;  %v7394_v5 = vld [vmem:[#allocation5 + $0x5f8] sm:$0xf0]  ;;  %v10051_v46 = vld [vmem:[#allocation5 + $0x6ac] sm:$0xf] }
  0xf4   :  { %2107 = vmatpush.bf16.msra.mxu3 %v7093_v11  ;;  %v6901_v11 = vor.u32 %v9903_v57, %v6898_v60  ;;  %v11062_v28 = vpop.f32.mrf.mxu0  ;;  %v9983_v55 = vld [vmem:[#allocation5 + $0x48c] sm:$0xf]  ;;  %v7346_v60 = vld [vmem:[#allocation5 + $0x598] sm:$0xf0] }
  0xf5   :  { %2066 = vmatpush.bf16.msra.mxu0 %v6693_v18  ;;  %v11060_v18 = vpop.f32.mrf.mxu3  ;;  %v10047_v61 = vld [vmem:[#allocation5 + $0x68c] sm:$0xf] }
  0xf6   :  { %2080 = vmatpush.bf16.msra.mxu1 %v6821_v19  ;;  %v7397_v19 = vor.u32 %v10027_v2, %v7394_v5  ;;  %v9975_v25 = vld [vmem:[#allocation5 + $0x44c] sm:$0xf] }
  0xf7   :  { %2094 = vmatpush.bf16.msra.mxu2 %v6949_v20  ;;  %v7525_v20 = vor.u32 %v10059_v6, %v7522_v7  ;;  %v9979_v6 = vld [vmem:[#allocation5 + $0x46c] sm:$0xf]  ;;  %v7202_v7 = vld [vmem:[#allocation5 + $0x478] sm:$0xf0] }
  0xf8   :  { %2108 = vmatpush.bf16.msra.mxu3 %v7077_v24  ;;  %v7653_v24 = vor.u32 %v10091_v12, %v7650_v13  ;;  %v11070_v57 = vpop.f32.mrf.mxu2  ;;  %v7330_v13 = vld [vmem:[#allocation5 + $0x578] sm:$0xf0]  ;;  %v10007_v27 = vld [vmem:[#allocation5 + $0x54c] sm:$0xf] }
  0xf9   :  { %2067 = vmatpush.bf16.msra.mxu0 %v6677_v31  ;;  %v7634_v31 = vld [vmem:[#allocation5 + $0x7d8] sm:$0xf0] }
  0xfa   :  { %2081 = vmatpush.bf16.msra.mxu1 %v6805_v33  ;;  %v11064_v33 = vpop.f32.mrf.mxu1  ;;  %v7637_v41 = vor.u32 %v10087_v29, %v7634_v31  ;;  %v7314_v31 = vld [vmem:[#allocation5 + $0x558] sm:$0xf0] }
  0xfb   :  { %2095 = vmatpush.bf16.msra.mxu2 %v6933_v34  ;;  %v7253_v34 = vor.u32 %v9991_v21, %v7250_v22  ;;  %v398_v21 = vperm.slane %v11074_v0, 0  ;;  %v7205_v22 = vor.u32 %v9979_v6, %v7202_v7  ;;  %v7154_v6 = vld [vmem:[#allocation5 + $0x418] sm:$0xf0]  ;;  %v9999_v7 = vld [vmem:[#allocation5 + $0x50c] sm:$0xf] }
  0xfc   :  { %2109 = vmatpush.bf16.msra.mxu3 %v7061_v38  ;;  %v7234_v38 = vld [vmem:[#allocation5 + $0x4b8] sm:$0xf0]  ;;  %v11076_v2 = vpop.f32.mrf.mxu0 }
  0xfd   :  { %2068 = vmatpush.bf16.msra.mxu0 %v6661_v50  ;;  %v10083_v50 = vld [vmem:[#allocation5 + $0x7ac] sm:$0xf]  ;;  %v7237_v52 = vor.u32 %v9987_v37, %v7234_v38  ;;  %v11072_v62 = vpop.f32.mrf.mxu3  ;;  %v7570_v37 = vld [vmem:[#allocation5 + $0x758] sm:$0xf0] }
  0xfe   :  { %2082 = vmatpush.bf16.msra.mxu1 %v6789_v53  ;;  %v7365_v53 = vor.u32 %v10019_v40, %v7362_v42  ;;  %v7189_v40 = vor.u32 %v9975_v25, %v7186_v26 }
  0xff   :  { %2096 = vmatpush.bf16.msra.mxu2 %v6917_v54  ;;  %v7493_v54 = vor.u32 %v10051_v46, %v7490_v48  ;;  %v7317_v46 = vor.u32 %v10007_v27, %v7314_v31 }
 0x100   :  { %2110 = vmatpush.bf16.msra.mxu3 %v7045_v59  ;;  %v7621_v59 = vor.u32 %v10083_v50, %v7618_v51  ;;  %v11081_v38 = vpop.f32.mrf.mxu2  ;;  %v9971_v51 = vld [vmem:[#allocation5 + $0x42c] sm:$0xf] }
 0x101   :  { %2069 = vmatpush.bf16.msra.mxu0 %v6645_v4 }
 0x102   :  { %2083 = vmatpush.bf16.msra.mxu1 %v6773_v8  ;;  %v10011_v8 = vld [vmem:[#allocation5 + $0x56c] sm:$0xf] }
 0x103   :  { %2097 = vmatpush.bf16.msra.mxu2 %v6901_v11  ;;  %v11078_v11 = vpop.f32.mrf.mxu1  ;;  %v7333_v23 = vor.u32 %v10011_v8, %v7330_v13  ;;  %v7282_v8 = vld [vmem:[#allocation5 + $0x518] sm:$0xf0]  ;;  %v10031_v13 = vld [vmem:[#allocation5 + $0x60c] sm:$0xf] }
 0x104   :  { %2111 = vmatpush.bf16.msra.mxu3 %v7029_v15  ;;  %2070 = vmatmul.bf16.vlgmr.msra.gmra.mxu0 %v11006_v58  ;;  %v7474_v58 = vld [vmem:[#allocation5 + $0x698] sm:$0xf0]  ;;  %v10043_v15 = vld [vmem:[#allocation5 + $0x66c] sm:$0xf]  ;;  %v1847_v50 = vpop.f32.mrf.mxu0  ;;  %v7285_v27 = vor.u32 %v9999_v7, %v7282_v8  ;;  %v10144_v7 = vld [vmem:[#allocation8 + $0x18c] sm:$0xf0] }
 0x105   :  { %2118 = vmatpush.bf16.msrb.mxu0 %v7269_v16  ;;  %2084 = vmatmul.bf16.vlgmr.msra.gmra.mxu1 %v11012_v10  ;;  %v7221_v10 = vor.u32 %v9983_v55, %v7218_v56  ;;  %v7477_v5 = vor.u32 %v10047_v61, %v7474_v58  ;;  %v7458_v16 = vld [vmem:[#allocation5 + $0x678] sm:$0xf0]  ;;  %v11084_v42 = vpop.f32.mrf.mxu3  ;;  %v10035_v56 = vld [vmem:[#allocation5 + $0x62c] sm:$0xf]  ;;  %v1738_v58 = vadd.f32 %v11054_v45, %v398_v21  ;;  %v7768_v45 = vld [vmem:[#allocation8 + $0xe0] sm:$0xf] }
 0x106   :  { %2132 = vmatpush.bf16.msrb.mxu1 %v7397_v19  ;;  %2098 = vmatmul.bf16.vlgmr.msra.gmra.mxu2 %v11008_v1  ;;  %v10015_v1 = vld [vmem:[#allocation5 + $0x58c] sm:$0xf]  ;;  %v7298_v55 = vld [vmem:[#allocation5 + $0x538] sm:$0xf0]  ;;  %v8008_v8 = vld [vmem:[#allocation8 + $0x2c0] sm:$0xf] }
 0x107   :  { %2146 = vmatpush.bf16.msrb.mxu2 %v7525_v20  ;;  %2112 = vmatmul.bf16.vlgmr.msra.gmra.mxu3 %v11014_v17  ;;  %v10079_v17 = vld [vmem:[#allocation5 + $0x78c] sm:$0xf]  ;;  %v7349_v4 = vor.u32 %v10015_v1, %v7346_v60  ;;  %v7586_v20 = vld [vmem:[#allocation5 + $0x778] sm:$0xf0]  ;;  %v399_v60 = vperm.slane %v11074_v0, 1 }
 0x108   :  { %2160 = vmatpush.bf16.msrb.mxu3 %v7653_v24  ;;  %v7605_v12 = vor.u32 %v10079_v17, %v7602_v63  ;;  %v10075_v19 = vld [vmem:[#allocation5 + $0x76c] sm:$0xf]  ;;  %v7461_v24 = vor.u32 %v10043_v15, %v7458_v16  ;;  %v7426_v1 = vld [vmem:[#allocation5 + $0x638] sm:$0xf0] }
 0x109   :  { %2119 = vmatpush.bf16.msrb.mxu0 %v7253_v34  ;;  %v7589_v29 = vor.u32 %v10075_v19, %v7586_v20  ;;  %v10039_v34 = vld [vmem:[#allocation5 + $0x64c] sm:$0xf]  ;;  %v7410_v15 = vld [vmem:[#allocation5 + $0x618] sm:$0xf0]  ;;  %v1848_v19 = vadd.f32 %v1847_v50, %v399_v60  ;;  %v1875_v25 = vpop.f32.mrf.mxu2  ;;  %v10152_v50 = vld [vmem:[#allocation8 + $0x1cc] sm:$0xf0] }
 0x10a   :  { %2133 = vmatpush.bf16.msrb.mxu1 %v7381_v35  ;;  %v7442_v35 = vld [vmem:[#allocation5 + $0x658] sm:$0xf0]  ;;  %v10067_v61 = vld [vmem:[#allocation5 + $0x72c] sm:$0xf] }
 0x10b   :  { %2147 = vmatpush.bf16.msrb.mxu2 %v7509_v36  ;;  %v10071_v36 = vld [vmem:[#allocation5 + $0x74c] sm:$0xf]  ;;  %v7445_v48 = vor.u32 %v10039_v34, %v7442_v35  ;;  %v7538_v20 = vld [vmem:[#allocation5 + $0x718] sm:$0xf0] }
 0x10c   :  { %2161 = vmatpush.bf16.msrb.mxu3 %v7637_v41  ;;  %v1736_v41 = vadd.f32 %v11046_v3, %v398_v21  ;;  %v7554_v3 = vld [vmem:[#allocation5 + $0x738] sm:$0xf0]  ;;  %v9967_v63 = vld [vmem:[#allocation5 + $0x40c] sm:$0xf]  ;;  %v10124_v21 = vld [vmem:[#allocation8 + $0xec] sm:$0xf0] }
 0x10d   :  { %2120 = vmatpush.bf16.msrb.mxu0 %v7237_v52  ;;  %v7170_v52 = vld [vmem:[#allocation5 + $0x438] sm:$0xf0]  ;;  %v10063_v16 = vld [vmem:[#allocation5 + $0x70c] sm:$0xf]  ;;  %v1889_v31 = vpop.f32.mrf.mxu3  ;;  %v7769_v35 = vor.u32 %v10124_v21, %v7768_v45  ;;  %v7704_v21 = vld [vmem:[#allocation8 + $0x60] sm:$0xf] }
 0x10e   :  { %2134 = vmatpush.bf16.msrb.mxu1 %v7365_v53  ;;  %v10003_v53 = vld [vmem:[#allocation5 + $0x52c] sm:$0xf]  ;;  %v7173_v17 = vor.u32 %v9971_v51, %v7170_v52  ;;  %v7541_v34 = vor.u32 %v10063_v16, %v7538_v20 }
 0x10f   :  { %2148 = vmatpush.bf16.msrb.mxu2 %v7493_v54  ;;  %v7573_v54 = vor.u32 %v10071_v36, %v7570_v37 }
 0x110   :  { %2162 = vmatpush.bf16.msrb.mxu3 %v7621_v59  ;;  %v1861_v59 = vpop.f32.mrf.mxu1 }
 0x111   :  { %2121 = vmatpush.bf16.msrb.mxu0 %v7221_v10  ;;  %v1750_v10 = vadd.f32 %v11048_v9, %v1736_v41  ;;  %v7157_v9 = vor.u32 %v9967_v63, %v7154_v6  ;;  %v1862_v36 = vadd.f32 %v1861_v59, %v1848_v19  ;;  %v7752_v41 = vld [vmem:[#allocation8 + $0xc0] sm:$0xf] }
 0x112   :  { %2135 = vmatpush.bf16.msrb.mxu1 %v7349_v4  ;;  %v7301_v4 = vor.u32 %v10003_v53, %v7298_v55  ;;  %v7848_v6 = vld [vmem:[#allocation8 + $0x180] sm:$0xf] }
 0x113   :  { %2149 = vmatpush.bf16.msrb.mxu2 %v7477_v5  ;;  %v7429_v5 = vor.u32 %v10035_v56, %v7426_v1  ;;  %v1764_v26 = vadd.f32 %v11050_v30, %v1750_v10  ;;  %v1876_v53 = vadd.f32 %v1875_v25, %v1862_v36  ;;  %v7736_v56 = vld [vmem:[#allocation8 + $0xa0] sm:$0xf]  ;;  %v10116_v1 = vld [vmem:[#allocation8 + $0xac] sm:$0xf0]  ;;  %v7849_v45 = vor.u32 %v10144_v7, %v7848_v6  ;;  %v7770_v6 = vld [vmem:[#allocation8 + $0xf0] sm:$0xf0] }
 0x114   :  { %2163 = vmatpush.bf16.msrb.mxu3 %v7605_v12  ;;  %v7557_v12 = vor.u32 %v10067_v61, %v7554_v3  ;;  %v8024_v61 = vld [vmem:[#allocation8 + $0x2e0] sm:$0xf]  ;;  %v10188_v3 = vld [vmem:[#allocation8 + $0x2ec] sm:$0xf0] }
 0x115   :  { %2122 = vmatpush.bf16.msrb.mxu0 %v7205_v22  ;;  %v1752_v22 = vadd.f32 %v11056_v49, %v1738_v58  ;;  %v10120_v49 = vld [vmem:[#allocation8 + $0xcc] sm:$0xf0]  ;;  %v1778_v30 = vadd.f32 %v11052_v32, %v1764_v26  ;;  %v1890_v63 = vadd.f32 %v1889_v31, %v1876_v53  ;;  %v7688_v36 = vld [vmem:[#allocation8 + $0x40] sm:$0xf] }
 0x116   :  { %2136 = vmatpush.bf16.msrb.mxu1 %v7333_v23  ;;  %v7896_v23 = vld [vmem:[#allocation8 + $0x1e0] sm:$0xf]  ;;  %v7753_v52 = vor.u32 %v10120_v49, %v7752_v41  ;;  %v10148_v32 = vld [vmem:[#allocation8 + $0x1ac] sm:$0xf0] }
 0x117   :  { %2150 = vmatpush.bf16.msrb.mxu2 %v7461_v24  ;;  %v10156_v24 = vld [vmem:[#allocation8 + $0x1ec] sm:$0xf0]  ;;  %v1792_v58 = vadd.f32 %v11062_v28, %v1778_v30  ;;  %v7976_v49 = vld [vmem:[#allocation8 + $0x280] sm:$0xf] }
 0x118   :  { %2164 = vmatpush.bf16.msrb.mxu3 %v7589_v29  ;;  %v7413_v29 = vor.u32 %v10031_v13, %v7410_v15  ;;  %v7897_v37 = vor.u32 %v10156_v24, %v7896_v23  ;;  %v1863_v51 = vpop.f32.mrf.mxu1  ;;  %v10184_v28 = vld [vmem:[#allocation8 + $0x2cc] sm:$0xf0]  ;;  %v7992_v24 = vld [vmem:[#allocation8 + $0x2a0] sm:$0xf] }
 0x119   :  { %2123 = vmatpush.bf16.msrb.mxu0 %v7189_v40  ;;  %v1849_v40 = vpop.f32.mrf.mxu0  ;;  %v8009_v13 = vor.u32 %v10184_v28, %v8008_v8  ;;  %v10140_v23 = vld [vmem:[#allocation8 + $0x16c] sm:$0xf0] }
 0x11a   :  { %2137 = vmatpush.bf16.msrb.mxu1 %v7317_v46  ;;  %v1766_v46 = vadd.f32 %v11058_v14, %v1752_v22  ;;  %v7864_v14 = vld [vmem:[#allocation8 + $0x1a0] sm:$0xf]  ;;  %v10108_v22 = vld [vmem:[#allocation8 + $0x6c] sm:$0xf0] }
 0x11b   :  { %2151 = vmatpush.bf16.msrb.mxu2 %v7445_v48  ;;  %v7880_v48 = vld [vmem:[#allocation8 + $0x1c0] sm:$0xf]  ;;  %v10180_v25 = vld [vmem:[#allocation8 + $0x2ac] sm:$0xf0] }
 0x11c   :  { %2165 = vmatpush.bf16.msrb.mxu3 %v7573_v54  ;;  %v1850_v54 = vadd.f32 %v1849_v40, %v399_v60  ;;  %v7881_v55 = vor.u32 %v10152_v50, %v7880_v48  ;;  %v1780_v59 = vadd.f32 %v11060_v18, %v1766_v46  ;;  %v1877_v60 = vpop.f32.mrf.mxu2  ;;  %v1891_v18 = vpop.f32.mrf.mxu3  ;;  %v7993_v26 = vor.u32 %v10180_v25, %v7992_v24  ;;  %v7816_v40 = vld [vmem:[#allocation8 + $0x140] sm:$0xf]  ;;  %v10176_v46 = vld [vmem:[#allocation8 + $0x28c] sm:$0xf0] }
 0x11d   :  { %2124 = vmatpush.bf16.msrb.mxu0 %v7173_v17  ;;  %v8025_v17 = vor.u32 %v10188_v3, %v8024_v61  ;;  %v10168_v7 = vld [vmem:[#allocation8 + $0x24c] sm:$0xf0]  ;;  %v7928_v24 = vld [vmem:[#allocation8 + $0x220] sm:$0xf] }
 0x11e   :  { %2138 = vmatpush.bf16.msrb.mxu1 %v7301_v4  ;;  %v1864_v10 = vadd.f32 %v1863_v51, %v1850_v54  ;;  %v7865_v4 = vor.u32 %v10148_v32, %v7864_v14  ;;  %v7960_v32 = vld [vmem:[#allocation8 + $0x260] sm:$0xf]  ;;  %v10164_v25 = vld [vmem:[#allocation8 + $0x22c] sm:$0xf0] }
 0x11f   :  { %2152 = vmatpush.bf16.msrb.mxu2 %v7429_v5  ;;  %v7720_v5 = vld [vmem:[#allocation8 + $0x80] sm:$0xf] }
 0x120   :  { %2166 = vmatpush.bf16.msrb.mxu3 %v7557_v12  ;;  %v1878_v19 = vadd.f32 %v1877_v60, %v1864_v10 }
 0x121   :  { %2125 = vmatpush.bf16.msrb.mxu0 %v7157_v9  ;;  %v1903_v12 = vpop.f32.mrf.mxu0  ;;  %v7832_v9 = vld [vmem:[#allocation8 + $0x160] sm:$0xf] }
 0x122   :  { %2139 = vmatpush.bf16.msrb.mxu1 %v7285_v27  ;;  %v1917_v16 = vpop.f32.mrf.mxu1  ;;  %v1904_v20 = vadd.f32 %v1903_v12, %v1890_v63  ;;  %v1892_v31 = vadd.f32 %v1891_v18, %v1878_v19  ;;  %v10128_v18 = vld [vmem:[#allocation8 + $0x10c] sm:$0xf0]  ;;  %v7898_v12 = vld [vmem:[#allocation8 + $0x1f0] sm:$0xf0] }
 0x123   :  { %2153 = vmatpush.bf16.msrb.mxu2 %v7413_v29  ;;  %v7705_v29 = vor.u32 %v10108_v22, %v7704_v21  ;;  %v10118_v22 = vld [vmem:[#allocation8 + $0xc4] sm:$0xf] }
 0x124   :  { %2167 = vmatpush.bf16.msrb.mxu3 %v7541_v34  ;;  %2126 = vmatmul.bf16.vlgmr.msrb.gmra.mxu0 %v11018_v39  ;;  %v7737_v39 = vor.u32 %v10116_v1, %v7736_v56  ;;  %v1918_v34 = vadd.f32 %v1917_v16, %v1904_v20  ;;  %v10100_v56 = vld [vmem:[#allocation8 + $0x2c] sm:$0xf0]  ;;  %v7800_v1 = vld [vmem:[#allocation8 + $0x120] sm:$0xf] }
 0x125   :  { %2972 = vmatpush.bf16.msra.mxu0 %v7769_v35  ;;  %2140 = vmatmul.bf16.vlgmr.msrb.gmra.mxu1 %v11022_v44  ;;  %v10112_v44 = vld [vmem:[#allocation8 + $0x8c] sm:$0xf0]  ;;  %v7833_v35 = vor.u32 %v10140_v23, %v7832_v9  ;;  %v7754_v23 = vld [vmem:[#allocation8 + $0xd0] sm:$0xf0] }
 0x126   :  { %2986 = vmatpush.bf16.msra.mxu1 %v7897_v37  ;;  %2154 = vmatmul.bf16.vlgmr.msrb.gmra.mxu2 %v11020_v43  ;;  %v1794_v43 = vadd.f32 %v11076_v2, %v1780_v59  ;;  %v7721_v15 = vor.u32 %v10112_v44, %v7720_v5  ;;  %v10104_v37 = vld [vmem:[#allocation8 + $0x4c] sm:$0xf0]  ;;  %v10122_v5 = vld [vmem:[#allocation8 + $0xe4] sm:$0xf] }
 0x127   :  { %2168 = vmatmul.bf16.vlgmr.msrb.gmra.mxu3 %v11024_v47  ;;  %3000 = vmatpush.bf16.msra.mxu2 %v8025_v17  ;;  %v1806_v47 = vadd.f32 %v11064_v33, %v1792_v58  ;;  %v7689_v30 = vor.u32 %v10104_v37, %v7688_v36  ;;  %v10132_v59 = vld [vmem:[#allocation8 + $0x12c] sm:$0xf0]  ;;  %v7656_v17 = vld [vmem:[#allocation8] sm:$0xf]  ;;  %v7773_v21 = vor.u32 %v10122_v5, %v7770_v6  ;;  %v10114_v37 = vld [vmem:[#allocation8 + $0xa4] sm:$0xf] }
 0x128   :  { %v1808_v2 = vadd.f32 %v11078_v11, %v1794_v43  ;;  %v10136_v11 = vld [vmem:[#allocation8 + $0x14c] sm:$0xf0]  ;;  %v7801_v10 = vor.u32 %v10132_v59, %v7800_v1  ;;  %v7944_v43 = vld [vmem:[#allocation8 + $0x240] sm:$0xf]  ;;  %v7757_v36 = vor.u32 %v10118_v22, %v7754_v23  ;;  %v7850_v1 = vld [vmem:[#allocation8 + $0x190] sm:$0xf0] }
 0x129   :  { %2973 = vmatpush.bf16.msra.mxu0 %v7753_v52  ;;  %v1820_v33 = vadd.f32 %v11070_v57, %v1806_v47  ;;  %v1931_v41 = vpop.f32.mrf.mxu2  ;;  %v1905_v57 = vpop.f32.mrf.mxu0  ;;  %v7817_v54 = vor.u32 %v10136_v11, %v7816_v40  ;;  %v10154_v47 = vld [vmem:[#allocation8 + $0x1e4] sm:$0xf]  ;;  %v7738_v40 = vld [vmem:[#allocation8 + $0xb0] sm:$0xf0] }
 0x12a   :  { %2987 = vmatpush.bf16.msra.mxu1 %v7881_v55  ;;  %v1822_v27 = vadd.f32 %v11081_v38, %v1808_v2  ;;  %v1945_v50 = vpop.f32.mrf.mxu3  ;;  %v7977_v38 = vor.u32 %v10176_v46, %v7976_v49  ;;  %v1932_v52 = vadd.f32 %v1931_v41, %v1918_v34  ;;  %v1906_v53 = vadd.f32 %v1905_v57, %v1892_v31  ;;  %v7672_v55 = vld [vmem:[#allocation8 + $0x20] sm:$0xf]  ;;  %v1919_v14 = vpop.f32.mrf.mxu1  ;;  %v10146_v11 = vld [vmem:[#allocation8 + $0x1a4] sm:$0xf]  ;;  %v10160_v46 = vld [vmem:[#allocation8 + $0x20c] sm:$0xf0] }
 0x12b   :  { %3001 = vmatpush.bf16.msra.mxu2 %v8009_v13  ;;  %v11105_v48 = vadd.f32 %v11072_v62, %v1820_v33  ;;  %v10172_v62 = vld [vmem:[#allocation8 + $0x26c] sm:$0xf0]  ;;  %v7945_v13 = vor.u32 %v10168_v7, %v7944_v43  ;;  %v7901_v2 = vor.u32 %v10154_v47, %v7898_v12  ;;  %v7912_v49 = vld [vmem:[#allocation8 + $0x200] sm:$0xf]  ;;  %v7866_v57 = vld [vmem:[#allocation8 + $0x1b0] sm:$0xf0] }
 0x12c   :  { %v1836_v51 = vadd.f32 %v11084_v42, %v1822_v27  ;;  %v7961_v3 = vor.u32 %v10172_v62, %v7960_v32  ;;  %v7673_v42 = vor.u32 %v10100_v56, %v7672_v55  ;;  %v1946_v60 = vadd.f32 %v1945_v50, %v1932_v52  ;;  %v7882_v27 = vld [vmem:[#allocation8 + $0x1d0] sm:$0xf0]  ;;  %v10142_v56 = vld [vmem:[#allocation8 + $0x184] sm:$0xf] }
 0x12d   :  { %2974 = vmatpush.bf16.msra.mxu0 %v7737_v39  ;;  %v2174_v61 = vmul.f32 0.01, %v11105_v48  ;;  %v10096_v39 = vld [vmem:[#allocation8 + $0xc] sm:$0xf0]  ;;  %v1920_v63 = vadd.f32 %v1919_v14, %v1906_v53  ;;  %v7913_v50 = vor.u32 %v10160_v46, %v7912_v49  ;;  %v7741_v52 = vor.u32 %v10114_v37, %v7738_v40  ;;  %v7722_v55 = vld [vmem:[#allocation8 + $0x90] sm:$0xf0] }
 0x12e   :  { %2988 = vmatpush.bf16.msra.mxu1 %v7865_v4  ;;  %v2178_v58 = vmul.f32 0.01, %v1836_v51  ;;  %v7784_v4 = vld [vmem:[#allocation8 + $0x100] sm:$0xf]  ;;  %v7657_v16 = vor.u32 %v10096_v39, %v7656_v17  ;;  %v2175_v19 = vmul.f32 0.01, %v1946_v60  ;;  %v7869_v53 = vor.u32 %v10146_v11, %v7866_v57 }
 0x12f   :  { %3002 = vmatpush.bf16.msra.mxu2 %v7993_v26  ;;  %v2182_v9 = vmax.f32 %v11105_v48, %v2174_v61  ;;  %v10150_v26 = vld [vmem:[#allocation8 + $0x1c4] sm:$0xf]  ;;  %v8010_v59 = vld [vmem:[#allocation8 + $0x2d0] sm:$0xf0]  ;;  %v7853_v61 = vor.u32 %v10142_v56, %v7850_v1  ;;  %v10157_v37 = vld [vmem:[#allocation8 + $0x1f4] sm:$0xf0] }
 0x130   :  { %v2183_v34 = vmax.f32 %v1946_v60, %v2175_v19  ;;  %v7885_v41 = vor.u32 %v10150_v26, %v7882_v27  ;;  %v10182_v14 = vld [vmem:[#allocation8 + $0x2c4] sm:$0xf]  ;;  %v7834_v17 = vld [vmem:[#allocation8 + $0x170] sm:$0xf0]  ;;  %v7776_v27 = vld [vmem:[#allocation8 + $0xe8] sm:$0xf] }
 0x131   :  { %2975 = vmatpush.bf16.msra.mxu0 %v7721_v15  ;;  %v1933_v44 = vpop.f32.mrf.mxu2  ;;  %v2186_v15 = vmax.f32 %v1836_v51, %v2178_v58  ;;  %v8026_v51 = vld [vmem:[#allocation8 + $0x2f0] sm:$0xf0]  ;;  %v8013_v32 = vor.u32 %v10182_v14, %v8010_v59  ;;  %v10178_v39 = vld [vmem:[#allocation8 + $0x2a4] sm:$0xf]  ;;  %v7760_v57 = vld [vmem:[#allocation8 + $0xc8] sm:$0xf] }
 0x132   :  { %2989 = vmatpush.bf16.msra.mxu1 %v7849_v45  ;;  %v1934_v8 = vadd.f32 %v1933_v44, %v1920_v63  ;;  %v1947_v28 = vpop.f32.mrf.mxu3  ;;  %v7785_v45 = vor.u32 %v10128_v18, %v7784_v4  ;;  %v7706_v58 = vld [vmem:[#allocation8 + $0x70] sm:$0xf0]  ;;  %v10102_v18 = vld [vmem:[#allocation8 + $0x44] sm:$0xf] }
 0x133   :  { %3003 = vmatpush.bf16.msra.mxu2 %v7977_v38  ;;  %v11110_v31 = vpack.c.bf16 %v2186_v15, %v2182_v9  ;;  %v10186_v38 = vld [vmem:[#allocation8 + $0x2e4] sm:$0xf]  ;;  %v7994_v60 = vld [vmem:[#allocation8 + $0x2b0] sm:$0xf0]  ;;  %v400_v9 = vperm.slane %v11074_v0, 2 }
 0x134   :  { %v1948_v20 = vadd.f32 %v1947_v28, %v1934_v8  ;;  %v7997_v63 = vor.u32 %v10178_v39, %v7994_v60  ;;  %v7690_v5 = vld [vmem:[#allocation8 + $0x50] sm:$0xf0]  ;;  %v10134_v44 = vld [vmem:[#allocation8 + $0x144] sm:$0xf]  ;;  %v8152_v60 = vld [vmem:[#allocation8 + $0x3e0] sm:$0xf] }
 0x135   :  { %2976 = vmatpush.bf16.msra.mxu0 %v7705_v29  ;;  %v7929_v29 = vor.u32 %v10164_v25, %v7928_v24  ;;  %v7818_v6 = vld [vmem:[#allocation8 + $0x150] sm:$0xf0]  ;;  %v10174_v43 = vld [vmem:[#allocation8 + $0x284] sm:$0xf]  ;;  %v7693_v28 = vor.u32 %v10102_v18, %v7690_v5 }
 0x136   :  { %2990 = vmatpush.bf16.msra.mxu1 %v7833_v35  ;;  %v2179_v33 = vmul.f32 0.01, %v1948_v20  ;;  %v7978_v7 = vld [vmem:[#allocation8 + $0x290] sm:$0xf0]  ;;  %v7821_v47 = vor.u32 %v10134_v44, %v7818_v6  ;;  %v10098_v12 = vld [vmem:[#allocation8 + $0x24] sm:$0xf] }
 0x137   :  { %3004 = vmatpush.bf16.msra.mxu2 %v7961_v3  ;;  %v10106_v3 = vld [vmem:[#allocation8 + $0x64] sm:$0xf]  ;;  %v7981_v8 = vor.u32 %v10174_v43, %v7978_v7  ;;  %v7802_v19 = vld [vmem:[#allocation8 + $0x130] sm:$0xf0]  ;;  %v7728_v6 = vld [vmem:[#allocation8 + $0x88] sm:$0xf] }
 0x138   :  { %v2187_v35 = vmax.f32 %v1948_v20, %v2179_v33  ;;  %v10130_v15 = vld [vmem:[#allocation8 + $0x124] sm:$0xf]  ;;  %v7658_v24 = vld [vmem:[#allocation8 + $0x10] sm:$0xf0]  ;;  %v10113_v43 = vld [vmem:[#allocation8 + $0x94] sm:$0xf0] }
 0x139   :  { %2977 = vmatpush.bf16.msra.mxu0 %v7689_v30  ;;  %v8029_v30 = vor.u32 %v10186_v38, %v8026_v51  ;;  %v10170_v20 = vld [vmem:[#allocation8 + $0x264] sm:$0xf]  ;;  %v7805_v25 = vor.u32 %v10130_v15, %v7802_v19  ;;  %v7786_v26 = vld [vmem:[#allocation8 + $0x110] sm:$0xf0]  ;;  %v10121_v51 = vld [vmem:[#allocation8 + $0xd4] sm:$0xf0] }
 0x13a   :  { %2991 = vmatpush.bf16.msra.mxu1 %v7817_v54  ;;  %v11112_v48 = vpack.c.bf16 %v2187_v35, %v2183_v34  ;;  %v10110_v54 = vld [vmem:[#allocation8 + $0x84] sm:$0xf]  ;;  %v7946_v35 = vld [vmem:[#allocation8 + $0x250] sm:$0xf0]  ;;  %v7761_v14 = vor.u32 %v10121_v51, %v7760_v57  ;;  %v7856_v7 = vld [vmem:[#allocation8 + $0x188] sm:$0xf] }
 0x13b   :  { %3005 = vmatpush.bf16.msra.mxu2 %v7945_v13  ;;  %v7725_v62 = vor.u32 %v10110_v54, %v7722_v55  ;;  %v7674_v13 = vld [vmem:[#allocation8 + $0x30] sm:$0xf0]  ;;  %v10094_v23 = vld [vmem:[#allocation8 + $0x4] sm:$0xf]  ;;  %v10153_v54 = vld [vmem:[#allocation8 + $0x1d4] sm:$0xf0] }
 0x13c   :  { %v10126_v33 = vld [vmem:[#allocation8 + $0x104] sm:$0xf]  ;;  %v7661_v11 = vor.u32 %v10094_v23, %v7658_v24  ;;  %v10141_v24 = vld [vmem:[#allocation8 + $0x174] sm:$0xf0] }
 0x13d   :  { %2978 = vmatpush.bf16.msra.mxu0 %v7673_v42  ;;  %v10138_v42 = vld [vmem:[#allocation8 + $0x164] sm:$0xf]  ;;  %v7789_v0 = vor.u32 %v10126_v33, %v7786_v26  ;;  %v10212_v33 = vld [vmem:[#allocation8 + $0x3ac] sm:$0xf0] }
 0x13e   :  { %2992 = vmatpush.bf16.msra.mxu1 %v7801_v10  ;;  %v7709_v10 = vor.u32 %v10106_v3, %v7706_v58  ;;  %v7837_v4 = vor.u32 %v10138_v42, %v7834_v17  ;;  %v10166_v34 = vld [vmem:[#allocation8 + $0x244] sm:$0xf]  ;;  %v7872_v3 = vld [vmem:[#allocation8 + $0x1a8] sm:$0xf]  ;;  %v7914_v42 = vld [vmem:[#allocation8 + $0x210] sm:$0xf0] }
 0x13f   :  { %3006 = vmatpush.bf16.msra.mxu2 %v7929_v29  ;;  %v10125_v29 = vld [vmem:[#allocation8 + $0xf4] sm:$0xf0]  ;;  %v7949_v40 = vor.u32 %v10166_v34, %v7946_v35  ;;  %v10158_v58 = vld [vmem:[#allocation8 + $0x204] sm:$0xf] }
 0x140   :  { %v7777_v49 = vor.u32 %v10125_v29, %v7776_v27  ;;  %v10149_v17 = vld [vmem:[#allocation8 + $0x1b4] sm:$0xf0]  ;;  %v7917_v39 = vor.u32 %v10158_v58, %v7914_v42  ;;  %v7664_v58 = vld [vmem:[#allocation8 + $0x8] sm:$0xf] }
 0x141   :  { %2979 = vmatpush.bf16.msra.mxu0 %v7657_v16  ;;  %v1959_v16 = vpop.f32.mrf.mxu0  ;;  %v7873_v44 = vor.u32 %v10149_v17, %v7872_v3  ;;  %v10097_v42 = vld [vmem:[#allocation8 + $0x14] sm:$0xf0] }
 0x142   :  { %2993 = vmatpush.bf16.msra.mxu1 %v7785_v45  ;;  %v7962_v45 = vld [vmem:[#allocation8 + $0x270] sm:$0xf0] }
 0x143   :  { %3007 = vmatpush.bf16.msra.mxu2 %v7913_v50  ;;  %v7965_v22 = vor.u32 %v10170_v20, %v7962_v45  ;;  %v7729_v20 = vor.u32 %v10113_v43, %v7728_v6  ;;  %v10155_v6 = vld [vmem:[#allocation8 + $0x1ec] sm:$0xf]  ;;  %v7906_v43 = vld [vmem:[#allocation8 + $0x1f8] sm:$0xf0] }
 0x144   :  { %2980 = vmatmul.bf16.vlgmr.msra.gmra.mxu0 %v11110_v31 }
 0x145   :  { %3028 = vmatpush.bf16.msrb.mxu0 %v7773_v21  ;;  %2994 = vmatmul.bf16.vlgmr.msra.gmra.mxu1 %v11112_v48  ;;  %v1973_v21 = vpop.f32.mrf.mxu1 }
 0x146   :  { %3042 = vmatpush.bf16.msrb.mxu1 %v7901_v2  ;;  %v7677_v2 = vor.u32 %v10098_v12, %v7674_v13  ;;  %v10216_v12 = vld [vmem:[#allocation8 + $0x3cc] sm:$0xf0] }
 0x147   :  { %3056 = vmatpush.bf16.msrb.mxu2 %v8029_v30  ;;  %v10162_v30 = vld [vmem:[#allocation8 + $0x224] sm:$0xf] }
 0x149   :  { %3029 = vmatpush.bf16.msrb.mxu0 %v7757_v36  ;;  %v7904_v36 = vld [vmem:[#allocation8 + $0x1e8] sm:$0xf]  ;;  %v1987_v46 = vpop.f32.mrf.mxu2  ;;  %v1961_v1 = vpop.f32.mrf.mxu0 }
 0x14a   :  { %3043 = vmatpush.bf16.msrb.mxu1 %v7885_v41  ;;  %v1960_v41 = vadd.f32 %v1959_v16, %v400_v9  ;;  %v7905_v50 = vor.u32 %v10157_v37, %v7904_v36  ;;  %v2001_v38 = vpop.f32.mrf.mxu3  ;;  %v7696_v36 = vld [vmem:[#allocation8 + $0x48] sm:$0xf]  ;;  %v10105_v37 = vld [vmem:[#allocation8 + $0x54] sm:$0xf0] }
 0x14b   :  { %3057 = vmatpush.bf16.msrb.mxu2 %v8013_v32  ;;  %v7744_v32 = vld [vmem:[#allocation8 + $0xa8] sm:$0xf] }
 0x14c   :  { %v1974_v56 = vadd.f32 %v1973_v21, %v1960_v41  ;;  %v10137_v41 = vld [vmem:[#allocation8 + $0x154] sm:$0xf0] }
 0x14d   :  { %3030 = vmatpush.bf16.msrb.mxu0 %v7741_v52  ;;  %v7930_v52 = vld [vmem:[#allocation8 + $0x230] sm:$0xf0]  ;;  %v1975_v59 = vpop.f32.mrf.mxu1 }
 0x14e   :  { %3044 = vmatpush.bf16.msrb.mxu1 %v7869_v53  ;;  %v7888_v53 = vld [vmem:[#allocation8 + $0x1c8] sm:$0xf]  ;;  %v7933_v55 = vor.u32 %v10162_v30, %v7930_v52 }
 0x14f   :  { %3058 = vmatpush.bf16.msrb.mxu2 %v7997_v63  ;;  %v10220_v63 = vld [vmem:[#allocation8 + $0x3ec] sm:$0xf0] }
 0x150   :  { %v8153_v18 = vor.u32 %v10220_v63, %v8152_v60  ;;  %v10129_v60 = vld [vmem:[#allocation8 + $0x114] sm:$0xf0]  ;;  %v10123_v63 = vld [vmem:[#allocation8 + $0xec] sm:$0xf] }
 0x151   :  { %3031 = vmatpush.bf16.msrb.mxu0 %v7725_v62  ;;  %v10117_v62 = vld [vmem:[#allocation8 + $0xb4] sm:$0xf0] }
 0x152   :  { %3045 = vmatpush.bf16.msrb.mxu1 %v7853_v61  ;;  %v7889_v61 = vor.u32 %v10153_v54, %v7888_v53  ;;  %v7745_v5 = vor.u32 %v10117_v62, %v7744_v32  ;;  %3014 = vmatpush.bf16.msra.mxu3 %v8153_v18  ;;  %v2003_v16 = vpop.f32.mrf.mxu3  ;;  %v7680_v53 = vld [vmem:[#allocation8 + $0x28] sm:$0xf]  ;;  %v10101_v54 = vld [vmem:[#allocation8 + $0x34] sm:$0xf0]  ;;  %v10200_v18 = vld [vmem:[#allocation8 + $0x34c] sm:$0xf0] }
 0x153   :  { %3059 = vmatpush.bf16.msrb.mxu2 %v7981_v8  ;;  %v1989_v8 = vpop.f32.mrf.mxu2  ;;  %v7681_v3 = vor.u32 %v10101_v54, %v7680_v53  ;;  %v10185_v53 = vld [vmem:[#allocation8 + $0x2d4] sm:$0xf0] }
 0x155   :  { %3032 = vmatpush.bf16.msrb.mxu0 %v7709_v10  ;;  %v1988_v10 = vadd.f32 %v1987_v46, %v1974_v56  ;;  %v10133_v56 = vld [vmem:[#allocation8 + $0x134] sm:$0xf0] }
 0x156   :  { %3046 = vmatpush.bf16.msrb.mxu1 %v7837_v4  ;;  %v1962_v4 = vadd.f32 %v1961_v1, %v400_v9  ;;  %v10109_v9 = vld [vmem:[#allocation8 + $0x74] sm:$0xf0]  ;;  %v8088_v1 = vld [vmem:[#allocation8 + $0x360] sm:$0xf] }
 0x157   :  { %3060 = vmatpush.bf16.msrb.mxu2 %v7965_v22  ;;  %v2002_v13 = vadd.f32 %v2001_v38, %v1988_v10  ;;  %v7712_v22 = vld [vmem:[#allocation8 + $0x68] sm:$0xf]  ;;  %v7697_v38 = vor.u32 %v10105_v37, %v7696_v36  ;;  %v7778_v10 = vld [vmem:[#allocation8 + $0xf8] sm:$0xf0]  ;;  %v10115_v36 = vld [vmem:[#allocation8 + $0xac] sm:$0xf] }
 0x158   :  { %v1976_v15 = vadd.f32 %v1975_v59, %v1962_v4  ;;  %v7713_v34 = vor.u32 %v10109_v9, %v7712_v22  ;;  %v8072_v4 = vld [vmem:[#allocation8 + $0x340] sm:$0xf]  ;;  %v7746_v37 = vld [vmem:[#allocation8 + $0xb8] sm:$0xf0] }
 0x159   :  { %3033 = vmatpush.bf16.msrb.mxu0 %v7693_v28  ;;  %v10145_v28 = vld [vmem:[#allocation8 + $0x194] sm:$0xf0] }
 0x15a   :  { %3047 = vmatpush.bf16.msrb.mxu1 %v7821_v47  ;;  %v8136_v47 = vld [vmem:[#allocation8 + $0x3c0] sm:$0xf]  ;;  %v7857_v21 = vor.u32 %v10145_v28, %v7856_v7  ;;  %v1990_v26 = vadd.f32 %v1989_v8, %v1976_v15  ;;  %v8073_v7 = vor.u32 %v10200_v18, %v8072_v4  ;;  %v7665_v28 = vor.u32 %v10097_v42, %v7664_v58  ;;  %v8000_v58 = vld [vmem:[#allocation8 + $0x2a8] sm:$0xf]  ;;  %v10181_v42 = vld [vmem:[#allocation8 + $0x2b4] sm:$0xf0] }
 0x15b   :  { %3061 = vmatpush.bf16.msrb.mxu2 %v7949_v40  ;;  %v8137_v19 = vor.u32 %v10216_v12, %v8136_v47  ;;  %v7824_v40 = vld [vmem:[#allocation8 + $0x148] sm:$0xf]  ;;  %v7781_v15 = vor.u32 %v10123_v63, %v7778_v10  ;;  %v10139_v63 = vld [vmem:[#allocation8 + $0x16c] sm:$0xf]  ;;  %v7842_v10 = vld [vmem:[#allocation8 + $0x178] sm:$0xf0] }
 0x15c   :  { %v7825_v52 = vor.u32 %v10137_v41, %v7824_v40  ;;  %v10147_v40 = vld [vmem:[#allocation8 + $0x1ac] sm:$0xf]  ;;  %v10210_v4 = vld [vmem:[#allocation8 + $0x3a4] sm:$0xf]  ;;  %v8122_v18 = vld [vmem:[#allocation8 + $0x3b0] sm:$0xf0] }
 0x15d   :  { %3034 = vmatpush.bf16.msrb.mxu0 %v7677_v2  ;;  %v7840_v2 = vld [vmem:[#allocation8 + $0x168] sm:$0xf]  ;;  %3015 = vmatpush.bf16.msra.mxu3 %v8137_v19  ;;  %v7909_v19 = vor.u32 %v10155_v6, %v7906_v43 }
 0x15e   :  { %3048 = vmatpush.bf16.msrb.mxu1 %v7805_v25  ;;  %v8120_v25 = vld [vmem:[#allocation8 + $0x3a0] sm:$0xf]  ;;  %v7841_v35 = vor.u32 %v10141_v24, %v7840_v2  ;;  %v10151_v2 = vld [vmem:[#allocation8 + $0x1cc] sm:$0xf]  ;;  %v7984_v43 = vld [vmem:[#allocation8 + $0x288] sm:$0xf] }
 0x15f   :  { %3062 = vmatpush.bf16.msrb.mxu2 %v7933_v55  ;;  %v8121_v29 = vor.u32 %v10212_v33, %v8120_v25  ;;  %v7808_v55 = vld [vmem:[#allocation8 + $0x128] sm:$0xf]  ;;  %v10189_v33 = vld [vmem:[#allocation8 + $0x2f4] sm:$0xf0] }
 0x160   :  { %v7809_v17 = vor.u32 %v10133_v56, %v7808_v55  ;;  %v8032_v25 = vld [vmem:[#allocation8 + $0x2e8] sm:$0xf]  ;;  %v10111_v55 = vld [vmem:[#allocation8 + $0x8c] sm:$0xf]  ;;  %v7730_v56 = vld [vmem:[#allocation8 + $0x98] sm:$0xf0] }
 0x161   :  { %3035 = vmatpush.bf16.msrb.mxu0 %v7661_v11  ;;  %v2015_v45 = vpop.f32.mrf.mxu0  ;;  %3016 = vmatpush.bf16.msra.mxu3 %v8121_v29  ;;  %v8104_v11 = vld [vmem:[#allocation8 + $0x380] sm:$0xf] }
 0x162   :  { %3049 = vmatpush.bf16.msrb.mxu1 %v7789_v0  ;;  %v2029_v23 = vpop.f32.mrf.mxu1  ;;  %v2016_v27 = vadd.f32 %v2015_v45, %v2002_v13  ;;  %v10208_v0 = vld [vmem:[#allocation8 + $0x38c] sm:$0xf0]  ;;  %v8056_v45 = vld [vmem:[#allocation8 + $0x320] sm:$0xf] }
 0x163   :  { %3063 = vmatpush.bf16.msrb.mxu2 %v7917_v39  ;;  %v8105_v57 = vor.u32 %v10208_v0, %v8104_v11  ;;  %v7792_v39 = vld [vmem:[#allocation8 + $0x108] sm:$0xf]  ;;  %v8040_v29 = vld [vmem:[#allocation8 + $0x300] sm:$0xf] }
 0x164   :  { %3036 = vmatmul.bf16.vlgmr.msrb.gmra.mxu0 %v11110_v31  ;;  %v2030_v46 = vadd.f32 %v2029_v23, %v2016_v27  ;;  %v7793_v13 = vor.u32 %v10129_v60, %v7792_v39  ;;  %v7890_v23 = vld [vmem:[#allocation8 + $0x1d8] sm:$0xf0]  ;;  %v10107_v39 = vld [vmem:[#allocation8 + $0x6c] sm:$0xf] }
 0x165   :  { %3084 = vmatpush.bf16.msra.mxu0 %v7777_v49  ;;  %3050 = vmatmul.bf16.vlgmr.msrb.gmra.mxu1 %v11112_v48  ;;  %v2004_v49 = vadd.f32 %v2003_v16, %v1990_v26  ;;  %v10119_v16 = vld [vmem:[#allocation8 + $0xcc] sm:$0xf]  ;;  %v7714_v60 = vld [vmem:[#allocation8 + $0x78] sm:$0xf0] }
 0x166   :  { %3098 = vmatpush.bf16.msra.mxu1 %v7905_v50  ;;  %3017 = vmatpush.bf16.msra.mxu3 %v8105_v57  ;;  %v8154_v57 = vld [vmem:[#allocation8 + $0x3f0] sm:$0xf0]  ;;  %v7717_v6 = vor.u32 %v10107_v39, %v7714_v60  ;;  %v10187_v39 = vld [vmem:[#allocation8 + $0x2ec] sm:$0xf]  ;;  %v8034_v60 = vld [vmem:[#allocation8 + $0x2f8] sm:$0xf0] }
 0x169   :  { %3085 = vmatpush.bf16.msra.mxu0 %v7761_v14  ;;  %v2043_v50 = vpop.f32.mrf.mxu2  ;;  %v2017_v51 = vpop.f32.mrf.mxu0  ;;  %v10204_v14 = vld [vmem:[#allocation8 + $0x36c] sm:$0xf0] }
 0x16a   :  { %3099 = vmatpush.bf16.msra.mxu1 %v7889_v61  ;;  %v2057_v30 = vpop.f32.mrf.mxu3  ;;  %v2044_v59 = vadd.f32 %v2043_v50, %v2030_v46  ;;  %v2018_v32 = vadd.f32 %v2017_v51, %v2004_v49  ;;  %v8089_v62 = vor.u32 %v10204_v14, %v8088_v1  ;;  %v2031_v61 = vpop.f32.mrf.mxu1  ;;  %v7874_v49 = vld [vmem:[#allocation8 + $0x1b8] sm:$0xf0]  ;;  %v10218_v46 = vld [vmem:[#allocation8 + $0x3e4] sm:$0xf]  ;;  %v8033_v50 = vor.u32 %v10189_v33, %v8032_v25  ;;  %v10143_v1 = vld [vmem:[#allocation8 + $0x18c] sm:$0xf] }
 0x16b   :  { %v7877_v54 = vor.u32 %v10147_v40, %v7874_v49  ;;  %v7858_v14 = vld [vmem:[#allocation8 + $0x198] sm:$0xf0]  ;;  %v10202_v33 = vld [vmem:[#allocation8 + $0x364] sm:$0xf] }
 0x16c   :  { %3018 = vmatpush.bf16.msra.mxu3 %v8089_v62  ;;  %v7810_v25 = vld [vmem:[#allocation8 + $0x138] sm:$0xf0] }
 0x16d   :  { %3086 = vmatpush.bf16.msra.mxu0 %v7745_v5  ;;  %v2058_v5 = vadd.f32 %v2057_v30, %v2044_v59  ;;  %v7749_v30 = vor.u32 %v10115_v36, %v7746_v37  ;;  %v10214_v59 = vld [vmem:[#allocation8 + $0x3c4] sm:$0xf]  ;;  %v10169_v36 = vld [vmem:[#allocation8 + $0x254] sm:$0xf0]  ;;  %v7794_v49 = vld [vmem:[#allocation8 + $0x118] sm:$0xf0] }
 0x16e   :  { %3100 = vmatpush.bf16.msra.mxu1 %v7873_v44  ;;  %v2032_v44 = vadd.f32 %v2031_v61, %v2018_v32  ;;  %v8138_v32 = vld [vmem:[#allocation8 + $0x3d0] sm:$0xf0] }
 0x16f   :  { %v2176_v22 = vmul.f32 0.01, %v2058_v5  ;;  %v8141_v61 = vor.u32 %v10214_v59, %v8138_v32  ;;  %v8058_v59 = vld [vmem:[#allocation8 + $0x330] sm:$0xf0] }
 0x170   :  { %3019 = vmatpush.bf16.msra.mxu3 %v8073_v7  ;;  %v10177_v7 = vld [vmem:[#allocation8 + $0x294] sm:$0xf0] }
 0x171   :  { %3087 = vmatpush.bf16.msra.mxu0 %v7729_v20  ;;  %v2045_v8 = vpop.f32.mrf.mxu2  ;;  %v7762_v20 = vld [vmem:[#allocation8 + $0xd8] sm:$0xf0]  ;;  %v2184_v11 = vmax.f32 %v2058_v5, %v2176_v22  ;;  %v8001_v5 = vor.u32 %v10181_v42, %v8000_v58  ;;  %v10173_v22 = vld [vmem:[#allocation8 + $0x274] sm:$0xf0] }
 0x172   :  { %3101 = vmatpush.bf16.msra.mxu1 %v7857_v21  ;;  %v2046_v47 = vadd.f32 %v2045_v8, %v2032_v44  ;;  %v2059_v12 = vpop.f32.mrf.mxu3  ;;  %v10196_v21 = vld [vmem:[#allocation8 + $0x32c] sm:$0xf0]  ;;  %v7765_v27 = vor.u32 %v10119_v16, %v7762_v20  ;;  %v8125_v44 = vor.u32 %v10210_v4, %v8122_v18  ;;  %v7845_v8 = vor.u32 %v10139_v63, %v7842_v10  ;;  %v8106_v16 = vld [vmem:[#allocation8 + $0x390] sm:$0xf0]  ;;  %v10161_v58 = vld [vmem:[#allocation8 + $0x214] sm:$0xf0] }
 0x173   :  { %v8057_v24 = vor.u32 %v10196_v21, %v8056_v45  ;;  %v7968_v21 = vld [vmem:[#allocation8 + $0x268] sm:$0xf]  ;;  %v10190_v63 = vld [vmem:[#allocation8 + $0x304] sm:$0xf]  ;;  %v8042_v10 = vld [vmem:[#allocation8 + $0x310] sm:$0xf0] }
 0x174   :  { %v2060_v9 = vadd.f32 %v2059_v12, %v2046_v47  ;;  %v7698_v47 = vld [vmem:[#allocation8 + $0x58] sm:$0xf0]  ;;  %v10135_v12 = vld [vmem:[#allocation8 + $0x14c] sm:$0xf] }
 0x175   :  { %3088 = vmatpush.bf16.msra.mxu0 %v7713_v34  ;;  %v10192_v34 = vld [vmem:[#allocation8 + $0x30c] sm:$0xf0]  ;;  %3020 = vmatpush.bf16.msra.mxu3 %v8057_v24  ;;  %v10131_v24 = vld [vmem:[#allocation8 + $0x12c] sm:$0xf] }
 0x176   :  { %3102 = vmatpush.bf16.msra.mxu1 %v7841_v35  ;;  %v2180_v26 = vmul.f32 0.01, %v2060_v9  ;;  %v7893_v35 = vor.u32 %v10151_v2, %v7890_v23  ;;  %v8041_v41 = vor.u32 %v10192_v34, %v8040_v29  ;;  %v10099_v2 = vld [vmem:[#allocation8 + $0x2c] sm:$0xf]  ;;  %v7682_v23 = vld [vmem:[#allocation8 + $0x38] sm:$0xf0]  ;;  %v7813_v40 = vor.u32 %v10131_v24, %v7810_v25 }
 0x177   :  { %v7685_v34 = vor.u32 %v10099_v2, %v7682_v23  ;;  %v10171_v25 = vld [vmem:[#allocation8 + $0x26c] sm:$0xf] }
 0x178   :  { %v2188_v0 = vmax.f32 %v2060_v9, %v2180_v26  ;;  %v8090_v26 = vld [vmem:[#allocation8 + $0x370] sm:$0xf0] }
 0x179   :  { %3089 = vmatpush.bf16.msra.mxu0 %v7697_v38  ;;  %v8157_v38 = vor.u32 %v10218_v46, %v8154_v57  ;;  %3021 = vmatpush.bf16.msra.mxu3 %v8041_v41  ;;  %v8093_v29 = vor.u32 %v10202_v33, %v8090_v26  ;;  %v10095_v41 = vld [vmem:[#allocation8 + $0xc] sm:$0xf]  ;;  %v10198_v46 = vld [vmem:[#allocation8 + $0x344] sm:$0xf]  ;;  %v8074_v57 = vld [vmem:[#allocation8 + $0x350] sm:$0xf0] }
 0x17a   :  { %3103 = vmatpush.bf16.msra.mxu1 %v7825_v52  ;;  %v11121_v51 = vpack.c.bf16 %v2188_v0, %v2184_v11  ;;  %v8016_v52 = vld [vmem:[#allocation8 + $0x2c8] sm:$0xf]  ;;  %v7666_v11 = vld [vmem:[#allocation8 + $0x18] sm:$0xf0]  ;;  %v10127_v0 = vld [vmem:[#allocation8 + $0x10c] sm:$0xf] }
 0x17b   :  { %v8017_v62 = vor.u32 %v10185_v53, %v8016_v52  ;;  %v7669_v52 = vor.u32 %v10095_v41, %v7666_v11  ;;  %v7936_v53 = vld [vmem:[#allocation8 + $0x228] sm:$0xf]  ;;  %v7970_v33 = vld [vmem:[#allocation8 + $0x278] sm:$0xf0]  ;;  %v10167_v41 = vld [vmem:[#allocation8 + $0x24c] sm:$0xf] }
 0x17c   :  { %3008 = vmatmul.bf16.vlgmr.msra.gmra.mxu2 %v11121_v51  ;;  %v7954_v11 = vld [vmem:[#allocation8 + $0x258] sm:$0xf0] }
 0x17d   :  { %3090 = vmatpush.bf16.msra.mxu0 %v7681_v3  ;;  %3070 = vmatpush.bf16.msrb.mxu3 %v8157_v38  ;;  %v7733_v3 = vor.u32 %v10111_v55, %v7730_v56  ;;  %v8077_v38 = vor.u32 %v10198_v46, %v8074_v57  ;;  %v10722_v55 = vld [vmem:[#allocation7] sm:$0xf] }
 0x17e   :  { %3104 = vmatpush.bf16.msra.mxu1 %v7809_v17  ;;  %3112 = vmatpush.bf16.msra.mxu2 %v8033_v50  ;;  %v7861_v17 = vor.u32 %v10143_v1, %v7858_v14  ;;  %v401_v56 = vperm.slane %v10722_v55, 3  ;;  %v7797_v1 = vor.u32 %v10127_v0, %v7794_v49  ;;  %v10194_v14 = vld [vmem:[#allocation8 + $0x324] sm:$0xf]  ;;  %v7957_v49 = vor.u32 %v10167_v41, %v7954_v11  ;;  %v8066_v41 = vld [vmem:[#allocation8 + $0x338] sm:$0xf0] }
 0x181   :  { %3091 = vmatpush.bf16.msra.mxu0 %v7665_v28  ;;  %3071 = vmatpush.bf16.msrb.mxu3 %v8141_v61  ;;  %v10103_v28 = vld [vmem:[#allocation8 + $0x4c] sm:$0xf]  ;;  %v2071_v37 = vpop.f32.mrf.mxu0 }
 0x182   :  { %3105 = vmatpush.bf16.msra.mxu1 %v7793_v13  ;;  %3113 = vmatpush.bf16.msra.mxu2 %v8017_v62  ;;  %v7826_v13 = vld [vmem:[#allocation8 + $0x158] sm:$0xf0]  ;;  %v7701_v45 = vor.u32 %v10103_v28, %v7698_v47  ;;  %v8061_v62 = vor.u32 %v10194_v14, %v8058_v59  ;;  %v2072_v42 = vadd.f32 %v2071_v37, %v401_v56 }
 0x183   :  { %v7829_v9 = vor.u32 %v10135_v12, %v7826_v13  ;;  %v10179_v13 = vld [vmem:[#allocation8 + $0x2ac] sm:$0xf]  ;;  %v7922_v14 = vld [vmem:[#allocation8 + $0x218] sm:$0xf0] }
 0x184   :  { %3092 = vmatmul.bf16.vlgmr.msra.gmra.mxu0 %v11110_v31 }
 0x185   :  { %3140 = vmatpush.bf16.msrb.mxu0 %v7781_v15  ;;  %3106 = vmatmul.bf16.vlgmr.msra.gmra.mxu1 %v11112_v48  ;;  %v10206_v15 = vld [vmem:[#allocation8 + $0x384] sm:$0xf] }
 0x186   :  { %3154 = vmatpush.bf16.msrb.mxu1 %v7909_v19  ;;  %3072 = vmatpush.bf16.msrb.mxu3 %v8125_v44  ;;  %v7985_v19 = vor.u32 %v10177_v7, %v7984_v43  ;;  %v8109_v20 = vor.u32 %v10206_v15, %v8106_v16  ;;  %v8037_v44 = vor.u32 %v10187_v39, %v8034_v60  ;;  %v10183_v43 = vld [vmem:[#allocation8 + $0x2cc] sm:$0xf]  ;;  %v8018_v7 = vld [vmem:[#allocation8 + $0x2d8] sm:$0xf0]  ;;  %v8144_v39 = vld [vmem:[#allocation8 + $0x3c8] sm:$0xf] }
 0x187   :  { %3114 = vmatpush.bf16.msra.mxu2 %v8001_v5  ;;  %v8045_v5 = vor.u32 %v10190_v63, %v8042_v10  ;;  %v8021_v47 = vor.u32 %v10183_v43, %v8018_v7  ;;  %v8002_v15 = vld [vmem:[#allocation8 + $0x2b8] sm:$0xf0]  ;;  %v10217_v60 = vld [vmem:[#allocation8 + $0x3d4] sm:$0xf0]  ;;  %v8128_v10 = vld [vmem:[#allocation8 + $0x3a8] sm:$0xf] }
 0x188   :  { %v8145_v63 = vor.u32 %v10217_v60, %v8144_v39  ;;  %v8096_v43 = vld [vmem:[#allocation8 + $0x368] sm:$0xf]  ;;  %v10205_v7 = vld [vmem:[#allocation8 + $0x374] sm:$0xf0]  ;;  %v10232_v39 = vld [vmem:[#allocation8 + $0x44c] sm:$0xf0] }
 0x189   :  { %3141 = vmatpush.bf16.msrb.mxu0 %v7765_v27  ;;  %v7969_v27 = vor.u32 %v10173_v22, %v7968_v21  ;;  %v2099_v61 = vpop.f32.mrf.mxu2  ;;  %v2073_v4 = vpop.f32.mrf.mxu0  ;;  %v10175_v21 = vld [vmem:[#allocation8 + $0x28c] sm:$0xf]  ;;  %v7986_v22 = vld [vmem:[#allocation8 + $0x298] sm:$0xf0]  ;;  %v8392_v60 = vld [vmem:[#allocation8 + $0x5c0] sm:$0xf] }
 0x18a   :  { %3155 = vmatpush.bf16.msrb.mxu1 %v7893_v35  ;;  %3073 = vmatpush.bf16.msrb.mxu3 %v8109_v20  ;;  %v7952_v35 = vld [vmem:[#allocation8 + $0x248] sm:$0xf]  ;;  %v2074_v28 = vadd.f32 %v2073_v4, %v401_v56  ;;  %v7989_v24 = vor.u32 %v10175_v21, %v7986_v22  ;;  %v10213_v4 = vld [vmem:[#allocation8 + $0x3b4] sm:$0xf0]  ;;  %v10215_v21 = vld [vmem:[#allocation8 + $0x3cc] sm:$0xf] }
 0x18b   :  { %3115 = vmatpush.bf16.msra.mxu2 %v7985_v19  ;;  %v7953_v50 = vor.u32 %v10169_v36, %v7952_v35  ;;  %v7973_v36 = vor.u32 %v10171_v25, %v7970_v33  ;;  %v8146_v22 = vld [vmem:[#allocation8 + $0x3d8] sm:$0xf0]  ;;  %v10207_v25 = vld [vmem:[#allocation8 + $0x38c] sm:$0xf] }
 0x18c   :  { %3064 = vmatmul.bf16.vlgmr.msrb.gmra.mxu2 %v11121_v51  ;;  %v8114_v33 = vld [vmem:[#allocation8 + $0x398] sm:$0xf0] }
 0x18d   :  { %3142 = vmatpush.bf16.msrb.mxu0 %v7749_v30  ;;  %v2085_v30 = vpop.f32.mrf.mxu1 }
 0x18e   :  { %3156 = vmatpush.bf16.msrb.mxu1 %v7877_v54  ;;  %3074 = vmatpush.bf16.msrb.mxu3 %v8093_v29  ;;  %v10165_v54 = vld [vmem:[#allocation8 + $0x234] sm:$0xf0] }
 0x18f   :  { %3116 = vmatpush.bf16.msra.mxu2 %v7969_v27  ;;  %v7937_v32 = vor.u32 %v10165_v54, %v7936_v53 }
 0x191   :  { %3143 = vmatpush.bf16.msrb.mxu0 %v7733_v3  ;;  %v7920_v3 = vld [vmem:[#allocation8 + $0x208] sm:$0xf]  ;;  %v2101_v16 = vpop.f32.mrf.mxu2 }
 0x192   :  { %3157 = vmatpush.bf16.msrb.mxu1 %v7861_v17  ;;  %3075 = vmatpush.bf16.msrb.mxu3 %v8077_v38  ;;  %v2113_v17 = vpop.f32.mrf.mxu3  ;;  %v7921_v18 = vor.u32 %v10161_v58, %v7920_v3  ;;  %v7938_v38 = vld [vmem:[#allocation8 + $0x238] sm:$0xf0] }
 0x193   :  { %3117 = vmatpush.bf16.msra.mxu2 %v7953_v50  ;;  %v10163_v50 = vld [vmem:[#allocation8 + $0x22c] sm:$0xf] }
 0x194   :  { %v7941_v54 = vor.u32 %v10163_v50, %v7938_v38  ;;  %v10252_v50 = vld [vmem:[#allocation8 + $0x4ec] sm:$0xf0] }
 0x195   :  { %3144 = vmatpush.bf16.msrb.mxu0 %v7717_v6  ;;  %v2086_v6 = vadd.f32 %v2085_v30, %v2072_v42 }
 0x196   :  { %3158 = vmatpush.bf16.msrb.mxu1 %v7845_v8  ;;  %3076 = vmatpush.bf16.msrb.mxu3 %v8061_v62  ;;  %v2087_v8 = vpop.f32.mrf.mxu1  ;;  %v10221_v62 = vld [vmem:[#allocation8 + $0x3f4] sm:$0xf0] }
 0x197   :  { %3118 = vmatpush.bf16.msra.mxu2 %v7937_v32  ;;  %v2100_v12 = vadd.f32 %v2099_v61, %v2086_v6  ;;  %v8160_v32 = vld [vmem:[#allocation8 + $0x3e8] sm:$0xf] }
 0x198   :  { %v8161_v42 = vor.u32 %v10221_v62, %v8160_v32  ;;  %v8216_v32 = vld [vmem:[#allocation8 + $0x460] sm:$0xf]  ;;  %v10236_v62 = vld [vmem:[#allocation8 + $0x46c] sm:$0xf0] }
 0x199   :  { %3145 = vmatpush.bf16.msrb.mxu0 %v7701_v45  ;;  %v2114_v45 = vadd.f32 %v2113_v17, %v2100_v12 }
 0x19a   :  { %3159 = vmatpush.bf16.msrb.mxu1 %v7829_v9  ;;  %3077 = vmatpush.bf16.msrb.mxu3 %v8045_v5  ;;  %v2115_v19 = vpop.f32.mrf.mxu3  ;;  %v8112_v5 = vld [vmem:[#allocation8 + $0x388] sm:$0xf] }
 0x19b   :  { %3119 = vmatpush.bf16.msra.mxu2 %v7921_v18  ;;  %v8129_v18 = vor.u32 %v10213_v4, %v8128_v10  ;;  %v10280_v10 = vld [vmem:[#allocation8 + $0x5cc] sm:$0xf0] }
 0x19c   :  { %v8393_v4 = vor.u32 %v10280_v10, %v8392_v60 }
 0x19d   :  { %3146 = vmatpush.bf16.msrb.mxu0 %v7685_v34 }
 0x19e   :  { %3160 = vmatpush.bf16.msrb.mxu1 %v7813_v40  ;;  %3120 = vmatmul.bf16.vlgmr.msra.gmra.mxu2 %v11121_v51 }
 0x19f   :  { %3168 = vmatpush.bf16.msrb.mxu2 %v8037_v44  ;;  %v10209_v44 = vld [vmem:[#allocation8 + $0x394] sm:$0xf0] }
 0x1a0   :  { %v8113_v6 = vor.u32 %v10209_v44, %v8112_v5  ;;  %v10228_v5 = vld [vmem:[#allocation8 + $0x42c] sm:$0xf0]  ;;  %v8376_v44 = vld [vmem:[#allocation8 + $0x5a0] sm:$0xf] }
 0x1a1   :  { %3147 = vmatpush.bf16.msrb.mxu0 %v7669_v52  ;;  %v2127_v20 = vpop.f32.mrf.mxu0 }
 0x1a2   :  { %3161 = vmatpush.bf16.msrb.mxu1 %v7797_v1  ;;  %v2141_v9 = vpop.f32.mrf.mxu1  ;;  %v2128_v23 = vadd.f32 %v2127_v20, %v2114_v45  ;;  %v10159_v1 = vld [vmem:[#allocation8 + $0x20c] sm:$0xf]  ;;  %v8162_v20 = vld [vmem:[#allocation8 + $0x3f8] sm:$0xf0] }
 0x1a3   :  { %3169 = vmatpush.bf16.msrb.mxu2 %v8021_v47  ;;  %v7925_v61 = vor.u32 %v10159_v1, %v7922_v14  ;;  %v10201_v47 = vld [vmem:[#allocation8 + $0x354] sm:$0xf0]  ;;  %v8232_v1 = vld [vmem:[#allocation8 + $0x480] sm:$0xf]  ;;  %v10240_v14 = vld [vmem:[#allocation8 + $0x48c] sm:$0xf0] }
 0x1a4   :  { %3148 = vmatmul.bf16.vlgmr.msrb.gmra.mxu0 %v11110_v31  ;;  %v2088_v31 = vadd.f32 %v2087_v8, %v2074_v28  ;;  %v2142_v29 = vadd.f32 %v2141_v9, %v2128_v23  ;;  %v8097_v8 = vor.u32 %v10205_v7, %v8096_v43  ;;  %v8080_v28 = vld [vmem:[#allocation8 + $0x348] sm:$0xf]  ;;  %v8149_v9 = vor.u32 %v10215_v21, %v8146_v22  ;;  %v8130_v23 = vld [vmem:[#allocation8 + $0x3b8] sm:$0xf0]  ;;  %v10276_v43 = vld [vmem:[#allocation8 + $0x5ac] sm:$0xf0] }
 0x1a5   :  { %3162 = vmatmul.bf16.vlgmr.msrb.gmra.mxu1 %v11112_v48  ;;  %v8005_v48 = vor.u32 %v10179_v13, %v8002_v15  ;;  %v8081_v12 = vor.u32 %v10201_v47, %v8080_v28  ;;  %v8064_v13 = vld [vmem:[#allocation8 + $0x328] sm:$0xf]  ;;  %v8377_v7 = vor.u32 %v10276_v43, %v8376_v44  ;;  %v10224_v28 = vld [vmem:[#allocation8 + $0x40c] sm:$0xf0]  ;;  %v8360_v47 = vld [vmem:[#allocation8 + $0x580] sm:$0xf] }
 0x1a6   :  { %v2102_v2 = vadd.f32 %v2101_v16, %v2088_v31  ;;  %v8048_v16 = vld [vmem:[#allocation8 + $0x308] sm:$0xf]  ;;  %v10193_v31 = vld [vmem:[#allocation8 + $0x314] sm:$0xf0]  ;;  %v8520_v21 = vld [vmem:[#allocation8 + $0x6c0] sm:$0xf] }
 0x1a7   :  { %3170 = vmatpush.bf16.msrb.mxu2 %v8005_v48  ;;  %v8049_v48 = vor.u32 %v10193_v31, %v8048_v16  ;;  %v10316_v16 = vld [vmem:[#allocation8 + $0x6ec] sm:$0xf0]  ;;  %v10226_v44 = vld [vmem:[#allocation8 + $0x424] sm:$0xf] }
 0x1a8   :  { %v2116_v27 = vadd.f32 %v2115_v19, %v2102_v2  ;;  %v10219_v19 = vld [vmem:[#allocation8 + $0x3ec] sm:$0xf]  ;;  %v10312_v22 = vld [vmem:[#allocation8 + $0x6cc] sm:$0xf0]  ;;  %v10274_v43 = vld [vmem:[#allocation8 + $0x5a4] sm:$0xf] }
 0x1a9   :  { %v2155_v26 = vpop.f32.mrf.mxu2  ;;  %v2129_v35 = vpop.f32.mrf.mxu0  ;;  %v8165_v45 = vor.u32 %v10219_v19, %v8162_v20  ;;  %v10211_v2 = vld [vmem:[#allocation8 + $0x3ac] sm:$0xf] }
 0x1aa   :  { %v2169_v34 = vpop.f32.mrf.mxu3  ;;  %v2156_v37 = vadd.f32 %v2155_v26, %v2142_v29  ;;  %v2130_v40 = vadd.f32 %v2129_v35, %v2116_v27  ;;  %v2143_v0 = vpop.f32.mrf.mxu1  ;;  %v8117_v26 = vor.u32 %v10207_v25, %v8114_v33  ;;  %v10203_v27 = vld [vmem:[#allocation8 + $0x36c] sm:$0xf]  ;;  %v8098_v29 = vld [vmem:[#allocation8 + $0x378] sm:$0xf0] }
 0x1ab   :  { %3171 = vmatpush.bf16.msrb.mxu2 %v7989_v24  ;;  %v8133_v24 = vor.u32 %v10211_v2, %v8130_v23  ;;  %v10199_v35 = vld [vmem:[#allocation8 + $0x34c] sm:$0xf]  ;;  %v10246_v2 = vld [vmem:[#allocation8 + $0x4c4] sm:$0xf]  ;;  %v8266_v23 = vld [vmem:[#allocation8 + $0x4d0] sm:$0xf0] }
 0x1ac   :  { %v2170_v46 = vadd.f32 %v2169_v34, %v2156_v37  ;;  %v2144_v57 = vadd.f32 %v2143_v0, %v2130_v40  ;;  %v8101_v34 = vor.u32 %v10203_v27, %v8098_v29  ;;  %v10195_v40 = vld [vmem:[#allocation8 + $0x32c] sm:$0xf]  ;;  %v8269_v33 = vor.u32 %v10246_v2, %v8266_v23  ;;  %v10264_v27 = vld [vmem:[#allocation8 + $0x54c] sm:$0xf0]  ;;  %v10242_v29 = vld [vmem:[#allocation8 + $0x4a4] sm:$0xf] }
 0x1ad   :  { %v8069_v11 = vor.u32 %v10195_v40, %v8066_v41  ;;  %v10191_v0 = vld [vmem:[#allocation8 + $0x30c] sm:$0xf]  ;;  %v10260_v40 = vld [vmem:[#allocation8 + $0x52c] sm:$0xf0]  ;;  %v8504_v41 = vld [vmem:[#allocation8 + $0x6a0] sm:$0xf] }
 0x1ae   :  { %v2177_v55 = vmul.f32 0.01, %v2170_v46  ;;  %v10348_v23 = vld [vmem:[#allocation8 + $0x7ec] sm:$0xf0] }
 0x1af   :  { %3172 = vmatpush.bf16.msrb.mxu2 %v7973_v36  ;;  %v8082_v36 = vld [vmem:[#allocation8 + $0x358] sm:$0xf0] }
 0x1b0   :  { %v2185_v3 = vmax.f32 %v2170_v46, %v2177_v55  ;;  %v8085_v37 = vor.u32 %v10199_v35, %v8082_v36  ;;  %v10244_v55 = vld [vmem:[#allocation8 + $0x4ac] sm:$0xf0] }
 0x1b1   :  { %v2157_v30 = vpop.f32.mrf.mxu2 }
 0x1b2   :  { %v2158_v52 = vadd.f32 %v2157_v30, %v2144_v57  ;;  %v2171_v53 = vpop.f32.mrf.mxu3  ;;  %v8280_v57 = vld [vmem:[#allocation8 + $0x4e0] sm:$0xf] }
 0x1b3   :  { %3173 = vmatpush.bf16.msrb.mxu2 %v7957_v49  ;;  %v8050_v49 = vld [vmem:[#allocation8 + $0x318] sm:$0xf0]  ;;  %v8281_v38 = vor.u32 %v10252_v50, %v8280_v57  ;;  %v8264_v30 = vld [vmem:[#allocation8 + $0x4c0] sm:$0xf] }
 0x1b4   :  { %v2172_v56 = vadd.f32 %v2171_v53, %v2158_v52  ;;  %v8053_v46 = vor.u32 %v10191_v0, %v8050_v49  ;;  %v10248_v52 = vld [vmem:[#allocation8 + $0x4cc] sm:$0xf0]  ;;  %v10238_v49 = vld [vmem:[#allocation8 + $0x484] sm:$0xf] }
 0x1b5   :  { %3988 = vmatpush.bf16.msra.mxu0 %v8281_v38  ;;  %v8265_v53 = vor.u32 %v10248_v52, %v8264_v30  ;;  %v10308_v0 = vld [vmem:[#allocation8 + $0x6ac] sm:$0xf0]  ;;  %v8296_v38 = vld [vmem:[#allocation8 + $0x500] sm:$0xf] }
 0x1b6   :  { %v2181_v59 = vmul.f32 0.01, %v2172_v56  ;;  %v8505_v57 = vor.u32 %v10308_v0, %v8504_v41  ;;  %v10256_v30 = vld [vmem:[#allocation8 + $0x50c] sm:$0xf0]  ;;  %v8488_v52 = vld [vmem:[#allocation8 + $0x680] sm:$0xf] }
 0x1b7   :  { %3174 = vmatpush.bf16.msrb.mxu2 %v7941_v54  ;;  %v8248_v54 = vld [vmem:[#allocation8 + $0x4a0] sm:$0xf]  ;;  %v8330_v0 = vld [vmem:[#allocation8 + $0x550] sm:$0xf0] }
 0x1b8   :  { %v2189_v58 = vmax.f32 %v2172_v56, %v2181_v59  ;;  %v8249_v56 = vor.u32 %v10244_v55, %v8248_v54  ;;  %v8233_v59 = vor.u32 %v10240_v14, %v8232_v1  ;;  %v10304_v54 = vld [vmem:[#allocation8 + $0x68c] sm:$0xf0]  ;;  %v10234_v55 = vld [vmem:[#allocation8 + $0x464] sm:$0xf] }
 0x1b9   :  { %3989 = vmatpush.bf16.msra.mxu0 %v8265_v53  ;;  %v8297_v53 = vor.u32 %v10256_v30, %v8296_v38  ;;  %v8489_v1 = vor.u32 %v10304_v54, %v8488_v52  ;;  %v10340_v54 = vld [vmem:[#allocation8 + $0x7ac] sm:$0xf0] }
 0x1ba   :  { %v11128_v17 = vpack.c.bf16 %v2189_v58, %v2185_v3  ;;  %v8217_v3 = vor.u32 %v10236_v62, %v8216_v32  ;;  %v10284_v58 = vld [vmem:[#allocation8 + $0x5ec] sm:$0xf0]  ;;  %v8410_v32 = vld [vmem:[#allocation8 + $0x5f0] sm:$0xf0] }
 0x1bb   :  { %3175 = vmatpush.bf16.msrb.mxu2 %v7925_v61  ;;  %v8408_v61 = vld [vmem:[#allocation8 + $0x5e0] sm:$0xf] }
 0x1bc   :  { %3022 = vmatmul.bf16.vlgmr.msra.gmra.mxu3 %v11128_v17 }
 0x1bd   :  { %3126 = vmatpush.bf16.msra.mxu3 %v8161_v42  ;;  %3990 = vmatpush.bf16.msra.mxu0 %v8249_v56  ;;  %v8409_v42 = vor.u32 %v10284_v58, %v8408_v61  ;;  %v8218_v56 = vld [vmem:[#allocation8 + $0x470] sm:$0xf0]  ;;  %v8472_v61 = vld [vmem:[#allocation8 + $0x660] sm:$0xf] }
 0x1be   :  { %3176 = vmatmul.bf16.vlgmr.msrb.gmra.mxu2 %v11121_v51  ;;  %v10197_v51 = vld [vmem:[#allocation8 + $0x334] sm:$0xf0]  ;;  %v8221_v14 = vor.u32 %v10234_v55, %v8218_v56  ;;  %v10258_v56 = vld [vmem:[#allocation8 + $0x524] sm:$0xf] }
 0x1bf   :  { %v8065_v15 = vor.u32 %v10197_v51, %v8064_v13  ;;  %4002 = vmatpush.bf16.msra.mxu1 %v8409_v42  ;;  %v10250_v13 = vld [vmem:[#allocation8 + $0x4e4] sm:$0xf]  ;;  %v8282_v51 = vld [vmem:[#allocation8 + $0x4f0] sm:$0xf0] }
 0x1c0   :  { %v10230_v42 = vld [vmem:[#allocation8 + $0x444] sm:$0xf] }
 0x1c1   :  { %3127 = vmatpush.bf16.msra.mxu3 %v8145_v63  ;;  %3991 = vmatpush.bf16.msra.mxu0 %v8233_v59  ;;  %v10282_v59 = vld [vmem:[#allocation8 + $0x5e4] sm:$0xf] }
 0x1c2   :  { %v8413_v62 = vor.u32 %v10282_v59, %v8410_v32  ;;  %v8506_v32 = vld [vmem:[#allocation8 + $0x6b0] sm:$0xf0] }
 0x1c3   :  { %4003 = vmatpush.bf16.msra.mxu1 %v8393_v4  ;;  %v8456_v4 = vld [vmem:[#allocation8 + $0x640] sm:$0xf] }
 0x1c5   :  { %3128 = vmatpush.bf16.msra.mxu3 %v8129_v18  ;;  %3992 = vmatpush.bf16.msra.mxu0 %v8217_v3  ;;  %v8184_v18 = vld [vmem:[#allocation8 + $0x420] sm:$0xf]  ;;  %v10300_v3 = vld [vmem:[#allocation8 + $0x66c] sm:$0xf0] }
 0x1c6   :  { %v8473_v58 = vor.u32 %v10300_v3, %v8472_v61 }
 0x1c7   :  { %4004 = vmatpush.bf16.msra.mxu1 %v8377_v7 }
 0x1c9   :  { %3129 = vmatpush.bf16.msra.mxu3 %v8113_v6  ;;  %v8185_v6 = vor.u32 %v10228_v5, %v8184_v18  ;;  %v10296_v18 = vld [vmem:[#allocation8 + $0x64c] sm:$0xf0] }
 0x1ca   :  { %v8457_v5 = vor.u32 %v10296_v18, %v8456_v4 }
 0x1cc   :  { %3078 = vmatmul.bf16.vlgmr.msrb.gmra.mxu3 %v11128_v17 }
 0x1cd   :  { %3130 = vmatpush.bf16.msra.mxu3 %v8097_v8  ;;  %v8168_v8 = vld [vmem:[#allocation8 + $0x400] sm:$0xf] }
 0x1ce   :  { %v8169_v31 = vor.u32 %v10224_v28, %v8168_v8  ;;  %v8378_v8 = vld [vmem:[#allocation8 + $0x5b0] sm:$0xf0] }
 0x1cf   :  { %v8381_v28 = vor.u32 %v10274_v43, %v8378_v8  ;;  %v8600_v8 = vld [vmem:[#allocation8 + $0x760] sm:$0xf] }
 0x1d1   :  { %3131 = vmatpush.bf16.msra.mxu3 %v8081_v12  ;;  %v10272_v12 = vld [vmem:[#allocation8 + $0x58c] sm:$0xf0] }
 0x1d2   :  { %v8361_v20 = vor.u32 %v10272_v12, %v8360_v47  ;;  %v2981_v47 = vpop.f32.mrf.mxu0  ;;  %v8440_v12 = vld [vmem:[#allocation8 + $0x620] sm:$0xf] }
 0x1d4   :  { %4005 = vmatpush.bf16.msra.mxu1 %v8361_v20 }
 0x1d5   :  { %3132 = vmatpush.bf16.msra.mxu3 %v8065_v15  ;;  %v8536_v15 = vld [vmem:[#allocation8 + $0x6e0] sm:$0xf] }
 0x1d6   :  { %v8537_v19 = vor.u32 %v10316_v16, %v8536_v15  ;;  %v10222_v15 = vld [vmem:[#allocation8 + $0x404] sm:$0xf]  ;;  %v8170_v16 = vld [vmem:[#allocation8 + $0x410] sm:$0xf0] }
 0x1d7   :  { %v8173_v20 = vor.u32 %v10222_v15, %v8170_v16 }
 0x1d8   :  { %4016 = vmatpush.bf16.msra.mxu2 %v8537_v19 }
 0x1d9   :  { %3133 = vmatpush.bf16.msra.mxu3 %v8049_v48  ;;  %v8285_v48 = vor.u32 %v10250_v13, %v8282_v51  ;;  %v10292_v13 = vld [vmem:[#allocation8 + $0x62c] sm:$0xf0] }
 0x1da   :  { %v8441_v51 = vor.u32 %v10292_v13, %v8440_v12  ;;  %v10298_v13 = vld [vmem:[#allocation8 + $0x664] sm:$0xf] }
 0x1dc   :  { %3134 = vmatmul.bf16.vlgmr.msra.gmra.mxu3 %v11128_v17 }
 0x1dd   :  { %3182 = vmatpush.bf16.msrb.mxu3 %v8165_v45  ;;  %v8344_v45 = vld [vmem:[#allocation8 + $0x560] sm:$0xf] }
 0x1e1   :  { %3183 = vmatpush.bf16.msrb.mxu3 %v8149_v9  ;;  %v10268_v9 = vld [vmem:[#allocation8 + $0x56c] sm:$0xf0] }
 0x1e2   :  { %v8345_v25 = vor.u32 %v10268_v9, %v8344_v45  ;;  %v8664_v9 = vld [vmem:[#allocation8 + $0x7e0] sm:$0xf] }
 0x1e4   :  { %4006 = vmatpush.bf16.msra.mxu1 %v8345_v25  ;;  %v8346_v25 = vld [vmem:[#allocation8 + $0x570] sm:$0xf0] }
 0x1e5   :  { %3184 = vmatpush.bf16.msrb.mxu3 %v8133_v24  ;;  %v8521_v24 = vor.u32 %v10312_v22, %v8520_v21  ;;  %v8424_v21 = vld [vmem:[#allocation8 + $0x600] sm:$0xf]  ;;  %v10288_v22 = vld [vmem:[#allocation8 + $0x60c] sm:$0xf0] }
 0x1e6   :  { %v8425_v2 = vor.u32 %v10288_v22, %v8424_v21  ;;  %v8584_v21 = vld [vmem:[#allocation8 + $0x740] sm:$0xf]  ;;  %v10328_v22 = vld [vmem:[#allocation8 + $0x74c] sm:$0xf0] }
 0x1e7   :  { %4017 = vmatpush.bf16.msra.mxu2 %v8521_v24  ;;  %v10266_v24 = vld [vmem:[#allocation8 + $0x564] sm:$0xf] }
 0x1e9   :  { %3185 = vmatpush.bf16.msrb.mxu3 %v8117_v26  ;;  %v8328_v26 = vld [vmem:[#allocation8 + $0x540] sm:$0xf] }
 0x1ea   :  { %v8329_v35 = vor.u32 %v10264_v27, %v8328_v26  ;;  %v8665_v26 = vor.u32 %v10348_v23, %v8664_v9  ;;  %v8349_v27 = vor.u32 %v10266_v24, %v8346_v25  ;;  %v8458_v23 = vld [vmem:[#allocation8 + $0x650] sm:$0xf0] }
 0x1eb   :  { %4018 = vmatpush.bf16.msra.mxu2 %v8505_v57 }
 0x1ec   :  { %4007 = vmatpush.bf16.msra.mxu1 %v8329_v35 }
 0x1ed   :  { %3186 = vmatpush.bf16.msrb.mxu3 %v8101_v34  ;;  %v8250_v34 = vld [vmem:[#allocation8 + $0x4b0] sm:$0xf0] }
 0x1ee   :  { %v8253_v36 = vor.u32 %v10242_v29, %v8250_v34  ;;  %v10314_v29 = vld [vmem:[#allocation8 + $0x6e4] sm:$0xf]  ;;  %v8538_v34 = vld [vmem:[#allocation8 + $0x6f0] sm:$0xf0] }
 0x1ef   :  { %4019 = vmatpush.bf16.msra.mxu2 %v8489_v1  ;;  %v8541_v35 = vor.u32 %v10314_v29, %v8538_v34  ;;  %v8314_v1 = vld [vmem:[#allocation8 + $0x530] sm:$0xf0]  ;;  %v10290_v34 = vld [vmem:[#allocation8 + $0x624] sm:$0xf] }
 0x1f0   :  { %v8317_v59 = vor.u32 %v10258_v56, %v8314_v1  ;;  %v10346_v56 = vld [vmem:[#allocation8 + $0x7e4] sm:$0xf] }
 0x1f1   :  { %3187 = vmatpush.bf16.msrb.mxu3 %v8085_v37  ;;  %v8312_v37 = vld [vmem:[#allocation8 + $0x520] sm:$0xf] }
 0x1f3   :  { %4020 = vmatpush.bf16.msra.mxu2 %v8473_v58 }
 0x1f5   :  { %3188 = vmatpush.bf16.msrb.mxu3 %v8069_v11  ;;  %v8313_v11 = vor.u32 %v10260_v40, %v8312_v37  ;;  %v8648_v37 = vld [vmem:[#allocation8 + $0x7c0] sm:$0xf]  ;;  %v10344_v40 = vld [vmem:[#allocation8 + $0x7cc] sm:$0xf0] }
 0x1f6   :  { %v8649_v41 = vor.u32 %v10344_v40, %v8648_v37  ;;  %v8288_v40 = vld [vmem:[#allocation8 + $0x4e8] sm:$0xf] }
 0x1f7   :  { %4008 = vmatpush.bf16.msra.mxu1 %v8313_v11  ;;  %4021 = vmatpush.bf16.msra.mxu2 %v8457_v5  ;;  %v10262_v11 = vld [vmem:[#allocation8 + $0x544] sm:$0xf] }
 0x1f8   :  { %v8333_v57 = vor.u32 %v10262_v11, %v8330_v0 }
 0x1f9   :  { %3189 = vmatpush.bf16.msrb.mxu3 %v8053_v46  ;;  %v8234_v46 = vld [vmem:[#allocation8 + $0x490] sm:$0xf0] }
 0x1fa   :  { %v8237_v50 = vor.u32 %v10238_v49, %v8234_v46  ;;  %v10310_v49 = vld [vmem:[#allocation8 + $0x6c4] sm:$0xf]  ;;  %v2983_v46 = vpop.f32.mrf.mxu0 }
 0x1fb   :  { %4009 = vmatpush.bf16.msra.mxu1 %v8297_v53  ;;  %4022 = vmatpush.bf16.msra.mxu2 %v8441_v51  ;;  %v8632_v53 = vld [vmem:[#allocation8 + $0x7a0] sm:$0xf]  ;;  %v8474_v51 = vld [vmem:[#allocation8 + $0x670] sm:$0xf0] }
 0x1fc   :  { %3190 = vmatmul.bf16.vlgmr.msrb.gmra.mxu3 %v11128_v17  ;;  %v8200_v17 = vld [vmem:[#allocation8 + $0x440] sm:$0xf]  ;;  %v8633_v55 = vor.u32 %v10340_v54, %v8632_v53  ;;  %v10286_v54 = vld [vmem:[#allocation8 + $0x604] sm:$0xf] }
 0x1fd   :  { %v8201_v63 = vor.u32 %v10232_v39, %v8200_v17  ;;  %v8202_v17 = vld [vmem:[#allocation8 + $0x450] sm:$0xf0]  ;;  %v10278_v39 = vld [vmem:[#allocation8 + $0x5c4] sm:$0xf]  ;;  %4030 = vmatpush.bf16.msra.mxu3 %v8665_v26  ;;  %v8568_v26 = vld [vmem:[#allocation8 + $0x720] sm:$0xf] }
 0x1fe   :  { %v8205_v60 = vor.u32 %v10230_v42, %v8202_v17  ;;  %v8616_v42 = vld [vmem:[#allocation8 + $0x780] sm:$0xf]  ;;  %v10336_v17 = vld [vmem:[#allocation8 + $0x78c] sm:$0xf0] }
 0x1ff   :  { %3993 = vmatpush.bf16.msra.mxu0 %v8201_v63  ;;  %4058 = vmatpush.bf16.msrb.mxu1 %v8413_v62  ;;  %v8394_v63 = vld [vmem:[#allocation8 + $0x5d0] sm:$0xf0]  ;;  %v11135_v19 = vpop.f32.mrf.mxu2 }
 0x200   :  { %v8397_v10 = vor.u32 %v10278_v39, %v8394_v63  ;;  %4023 = vmatpush.bf16.msra.mxu2 %v8425_v2  ;;  %v8617_v39 = vor.u32 %v10336_v17, %v8616_v42  ;;  %v8298_v63 = vld [vmem:[#allocation8 + $0x510] sm:$0xf0]  ;;  %v10294_v2 = vld [vmem:[#allocation8 + $0x644] sm:$0xf] }
 0x201   :  { %4031 = vmatpush.bf16.msra.mxu3 %v8649_v41  ;;  %v8461_v25 = vor.u32 %v10294_v2, %v8458_v23  ;;  %v10253_v41 = vld [vmem:[#allocation8 + $0x4f4] sm:$0xf0]  ;;  %v10334_v2 = vld [vmem:[#allocation8 + $0x784] sm:$0xf]  ;;  %v8618_v23 = vld [vmem:[#allocation8 + $0x790] sm:$0xf0] }
 0x202   :  { %v3037_v18 = vpop.f32.mrf.mxu0 }
 0x203   :  { %3994 = vmatpush.bf16.msra.mxu0 %v8185_v6  ;;  %4059 = vmatpush.bf16.msrb.mxu1 %v8397_v10  ;;  %v8186_v6 = vld [vmem:[#allocation8 + $0x430] sm:$0xf0]  ;;  %v10302_v10 = vld [vmem:[#allocation8 + $0x684] sm:$0xf] }
 0x204   :  { %v8189_v7 = vor.u32 %v10226_v44, %v8186_v6  ;;  %4072 = vmatpush.bf16.msrb.mxu2 %v8541_v35  ;;  %v8490_v44 = vld [vmem:[#allocation8 + $0x690] sm:$0xf0] }
 0x205   :  { %4032 = vmatpush.bf16.msra.mxu3 %v8633_v55  ;;  %v8493_v43 = vor.u32 %v10302_v10, %v8490_v44  ;;  %v8442_v35 = vld [vmem:[#allocation8 + $0x630] sm:$0xf0] }
 0x206   :  { %v8445_v11 = vor.u32 %v10290_v34, %v8442_v35  ;;  %v8426_v55 = vld [vmem:[#allocation8 + $0x610] sm:$0xf0]  ;;  %v8208_v35 = vld [vmem:[#allocation8 + $0x448] sm:$0xf] }
 0x207   :  { %3995 = vmatpush.bf16.msra.mxu0 %v8169_v31  ;;  %4060 = vmatpush.bf16.msrb.mxu1 %v8381_v28  ;;  %v10270_v31 = vld [vmem:[#allocation8 + $0x584] sm:$0xf]  ;;  %v3011_v52 = vpop.f32.mrf.mxu2  ;;  %v10332_v28 = vld [vmem:[#allocation8 + $0x76c] sm:$0xf0] }
 0x208   :  { %v8601_v12 = vor.u32 %v10332_v28, %v8600_v8 }
 0x209   :  { %4033 = vmatpush.bf16.msra.mxu3 %v8617_v39 }
 0x20b   :  { %4044 = vmatpush.bf16.msrb.mxu0 %v8285_v48  ;;  %v8362_v48 = vld [vmem:[#allocation8 + $0x590] sm:$0xf0] }
 0x20c   :  { %v8365_v45 = vor.u32 %v10270_v31, %v8362_v48  ;;  %v8477_v31 = vor.u32 %v10298_v13, %v8474_v51  ;;  %v10241_v51 = vld [vmem:[#allocation8 + $0x494] sm:$0xf0] }
 0x20d   :  { %4034 = vmatpush.bf16.msra.mxu3 %v8601_v12 }
 0x20e   :  { %4061 = vmatpush.bf16.msrb.mxu1 %v8365_v45 }
 0x20f   :  { %4045 = vmatpush.bf16.msrb.mxu0 %v8269_v33  ;;  %v2995_v33 = vpop.f32.mrf.mxu1  ;;  %v3065_v15 = vpop.f32.mrf.mxu2 }
 0x212   :  { %4062 = vmatpush.bf16.msrb.mxu1 %v8349_v27  ;;  %v10324_v27 = vld [vmem:[#allocation8 + $0x72c] sm:$0xf0] }
 0x213   :  { %4046 = vmatpush.bf16.msrb.mxu0 %v8253_v36  ;;  %v11137_v36 = vld [vmem:[#allocation10] sm:$0xf]  ;;  %v8569_v29 = vor.u32 %v10324_v27, %v8568_v26 }
 0x214   :  { %v2324_v30 = vperm.slane %v11137_v36, 0  ;;  %v2325_v24 = vperm.slane %v11137_v36, 1 }
 0x216   :  { %4063 = vmatpush.bf16.msrb.mxu1 %v8333_v57  ;;  %v2982_v61 = vadd.f32 %v2981_v47, %v2324_v30  ;;  %v2984_v6 = vadd.f32 %v2983_v46, %v2324_v30  ;;  %v3038_v37 = vadd.f32 %v3037_v18, %v2325_v24  ;;  %v8552_v57 = vld [vmem:[#allocation8 + $0x700] sm:$0xf]  ;;  %v10342_v18 = vld [vmem:[#allocation8 + $0x7c4] sm:$0xf] }
 0x217   :  { %4047 = vmatpush.bf16.msrb.mxu0 %v8237_v50  ;;  %v8522_v50 = vld [vmem:[#allocation8 + $0x6d0] sm:$0xf0]  ;;  %v2997_v3 = vpop.f32.mrf.mxu1 }
 0x218   :  { %v8525_v38 = vor.u32 %v10310_v49, %v8522_v50  ;;  %v2996_v4 = vadd.f32 %v2995_v33, %v2982_v61  ;;  %v2998_v47 = vadd.f32 %v2997_v3, %v2984_v6  ;;  %v3039_v33 = vpop.f32.mrf.mxu0  ;;  %v3067_v49 = vpop.f32.mrf.mxu2  ;;  %v10320_v50 = vld [vmem:[#allocation8 + $0x70c] sm:$0xf0]  ;;  %v8429_v61 = vor.u32 %v10286_v54, %v8426_v55  ;;  %v8666_v3 = vld [vmem:[#allocation8 + $0x7f0] sm:$0xf0]  ;;  %v8192_v55 = vld [vmem:[#allocation8 + $0x428] sm:$0xf] }
 0x219   :  { %v3040_v30 = vadd.f32 %v3039_v33, %v2325_v24  ;;  %v8553_v53 = vor.u32 %v10320_v50, %v8552_v57  ;;  %v8621_v24 = vor.u32 %v10334_v2, %v8618_v23 }
 0x21a   :  { %4073 = vmatpush.bf16.msrb.mxu2 %v8525_v38  ;;  %4064 = vmatpush.bf16.msrb.mxu1 %v8317_v59 }
 0x21b   :  { %4048 = vmatpush.bf16.msrb.mxu0 %v8221_v14  ;;  %v10306_v14 = vld [vmem:[#allocation8 + $0x6a4] sm:$0xf] }
 0x21c   :  { %v8509_v62 = vor.u32 %v10306_v14, %v8506_v32  ;;  %v8272_v32 = vld [vmem:[#allocation8 + $0x4c8] sm:$0xf] }
 0x21e   :  { %4074 = vmatpush.bf16.msrb.mxu2 %v8509_v62  ;;  %v10249_v62 = vld [vmem:[#allocation8 + $0x4d4] sm:$0xf0] }
 0x21f   :  { %4049 = vmatpush.bf16.msrb.mxu0 %v8205_v60  ;;  %v10254_v60 = vld [vmem:[#allocation8 + $0x504] sm:$0xf]  ;;  %v3051_v48 = vpop.f32.mrf.mxu1 }
 0x220   :  { %v8301_v5 = vor.u32 %v10254_v60, %v8298_v63  ;;  %v3052_v1 = vadd.f32 %v3051_v48, %v3038_v37  ;;  %v3093_v42 = vpop.f32.mrf.mxu0  ;;  %v8273_v60 = vor.u32 %v10249_v62, %v8272_v32  ;;  %v8256_v63 = vld [vmem:[#allocation8 + $0x4a8] sm:$0xf]  ;;  %v10233_v37 = vld [vmem:[#allocation8 + $0x454] sm:$0xf0]  ;;  %v10326_v62 = vld [vmem:[#allocation8 + $0x744] sm:$0xf] }
 0x221   :  { %v3121_v13 = vpop.f32.mrf.mxu2  ;;  %v8224_v48 = vld [vmem:[#allocation8 + $0x468] sm:$0xf]  ;;  %v10277_v32 = vld [vmem:[#allocation8 + $0x5b4] sm:$0xf0] }
 0x222   :  { %4065 = vmatpush.bf16.msrb.mxu1 %v8301_v5  ;;  %4075 = vmatpush.bf16.msrb.mxu2 %v8493_v43  ;;  %v3066_v17 = vadd.f32 %v3065_v15, %v3052_v1  ;;  %v8650_v5 = vld [vmem:[#allocation8 + $0x7d0] sm:$0xf0]  ;;  %v10338_v15 = vld [vmem:[#allocation8 + $0x7a4] sm:$0xf]  ;;  %v8384_v1 = vld [vmem:[#allocation8 + $0x5a8] sm:$0xf] }
 0x223   :  { %4050 = vmatpush.bf16.msrb.mxu0 %v8189_v7  ;;  %v3010_v7 = vadd.f32 %v11135_v19, %v2996_v4  ;;  %v8585_v19 = vor.u32 %v10328_v22, %v8584_v21  ;;  %v10245_v4 = vld [vmem:[#allocation8 + $0x4b4] sm:$0xf0]  ;;  %v8653_v6 = vor.u32 %v10342_v18, %v8650_v5  ;;  %v8416_v21 = vld [vmem:[#allocation8 + $0x5e8] sm:$0xf]  ;;  %v10322_v5 = vld [vmem:[#allocation8 + $0x724] sm:$0xf] }
 0x224   :  { %v8257_v28 = vor.u32 %v10245_v4, %v8256_v63  ;;  %v8176_v63 = vld [vmem:[#allocation8 + $0x408] sm:$0xf]  ;;  %v10273_v18 = vld [vmem:[#allocation8 + $0x594] sm:$0xf0] }
 0x225   :  { %4035 = vmatpush.bf16.msra.mxu3 %v8585_v19  ;;  %v10285_v19 = vld [vmem:[#allocation8 + $0x5f4] sm:$0xf0]  ;;  %v8368_v4 = vld [vmem:[#allocation8 + $0x588] sm:$0xf] }
 0x226   :  { %4076 = vmatpush.bf16.msrb.mxu2 %v8477_v31  ;;  %v8417_v34 = vor.u32 %v10285_v19, %v8416_v21 }
 0x227   :  { %4051 = vmatpush.bf16.msrb.mxu0 %v8173_v20  ;;  %v3012_v20 = vadd.f32 %v3011_v52, %v2998_v47  ;;  %v8289_v52 = vor.u32 %v10253_v41, %v8288_v40  ;;  %v3053_v14 = vpop.f32.mrf.mxu1  ;;  %v8240_v47 = vld [vmem:[#allocation8 + $0x488] sm:$0xf] }
 0x228   :  { %v3054_v39 = vadd.f32 %v3053_v14, %v3040_v30  ;;  %v8400_v40 = vld [vmem:[#allocation8 + $0x5c8] sm:$0xf] }
 0x229   :  { %4036 = vmatpush.bf16.msra.mxu3 %v8569_v29  ;;  %v3123_v30 = vpop.f32.mrf.mxu2 }
 0x22a   :  { %4077 = vmatpush.bf16.msrb.mxu2 %v8461_v25  ;;  %v3068_v44 = vadd.f32 %v3067_v49, %v3054_v39  ;;  %v10330_v49 = vld [vmem:[#allocation8 + $0x764] sm:$0xf] }
 0x22d   :  { %4037 = vmatpush.bf16.msra.mxu3 %v8553_v53  ;;  %v8209_v53 = vor.u32 %v10233_v37, %v8208_v35  ;;  %v2327_v35 = vperm.slane %v11137_v36, 3 }
 0x22e   :  { %4078 = vmatpush.bf16.msrb.mxu2 %v8445_v11 }
 0x22f   :  { %v3107_v12 = vpop.f32.mrf.mxu1 }
 0x232   :  { %4079 = vmatpush.bf16.msrb.mxu2 %v8429_v61  ;;  %v8586_v61 = vld [vmem:[#allocation8 + $0x750] sm:$0xf0] }
 0x237   :  { %v3109_v50 = vpop.f32.mrf.mxu1 }
 0x23f   :  { %v3023_v58 = vpop.f32.mrf.mxu3 }
 0x240   :  { %v3024_v16 = vadd.f32 %v3023_v58, %v3010_v7  ;;  %v8669_v58 = vor.u32 %v10346_v56, %v8666_v3  ;;  %v2326_v7 = vperm.slane %v11137_v36, 2  ;;  %v10229_v56 = vld [vmem:[#allocation8 + $0x434] sm:$0xf0] }
 0x241   :  { %v8193_v39 = vor.u32 %v10229_v56, %v8192_v55  ;;  %v8304_v55 = vld [vmem:[#allocation8 + $0x508] sm:$0xf]  ;;  %v10257_v56 = vld [vmem:[#allocation8 + $0x514] sm:$0xf0] }
 0x242   :  { %10658 = vtanh.f32 %v3024_v16  ;;  %4086 = vmatpush.bf16.msrb.mxu3 %v8669_v58  ;;  %v8634_v16 = vld [vmem:[#allocation8 + $0x7b0] sm:$0xf0]  ;;  %v3094_v22 = vadd.f32 %v3093_v42, %v2326_v7  ;;  %v8589_v58 = vor.u32 %v10326_v62, %v8586_v61  ;;  %v10305_v62 = vld [vmem:[#allocation8 + $0x694] sm:$0xf0]  ;;  %v10235_v61 = vld [vmem:[#allocation8 + $0x46c] sm:$0xf] }
 0x243   :  { %v8637_v31 = vor.u32 %v10338_v15, %v8634_v16  ;;  %v10318_v15 = vld [vmem:[#allocation8 + $0x704] sm:$0xf]  ;;  %v8554_v16 = vld [vmem:[#allocation8 + $0x710] sm:$0xf0] }
 0x244   :  { %v3108_v41 = vadd.f32 %v3107_v12, %v3094_v22  ;;  %v10269_v12 = vld [vmem:[#allocation8 + $0x574] sm:$0xf0] }
 0x246   :  { %4087 = vmatpush.bf16.msrb.mxu3 %v8653_v6  ;;  %v10251_v6 = vld [vmem:[#allocation8 + $0x4ec] sm:$0xf] }
 0x247   :  { %v3025_v45 = vpop.f32.mrf.mxu3 }
 0x248   :  { %v3026_v9 = vadd.f32 %v3025_v45, %v3012_v20  ;;  %v10659_v0 = vpop.eup %10658  ;;  %v8241_v20 = vor.u32 %v10241_v51, %v8240_v47  ;;  %v10237_v45 = vld [vmem:[#allocation8 + $0x474] sm:$0xf0]  ;;  %v8352_v47 = vld [vmem:[#allocation8 + $0x568] sm:$0xf] }
 0x249   :  { %v8225_v29 = vor.u32 %v10237_v45, %v8224_v48  ;;  %v8544_v51 = vld [vmem:[#allocation8 + $0x6e8] sm:$0xf]  ;;  %v8274_v48 = vld [vmem:[#allocation8 + $0x4d8] sm:$0xf0]  ;;  %v8557_v45 = vor.u32 %v10318_v15, %v8554_v16  ;;  %v8353_v19 = vor.u32 %v10269_v12, %v8352_v47 }
 0x24a   :  { %10660 = vtanh.f32 %v3026_v9  ;;  %v3095_v9 = vpop.f32.mrf.mxu0  ;;  %4088 = vmatpush.bf16.msrb.mxu3 %v8637_v31  ;;  %v10317_v31 = vld [vmem:[#allocation8 + $0x6f4] sm:$0xf0]  ;;  %v8464_v16 = vld [vmem:[#allocation8 + $0x648] sm:$0xf] }
 0x24b   :  { %v3096_v27 = vadd.f32 %v3095_v9, %v2326_v7  ;;  %v8545_v23 = vor.u32 %v10317_v31, %v8544_v51 }
 0x24e   :  { %4089 = vmatpush.bf16.msrb.mxu3 %v8621_v24 }
 0x24f   :  { %v3079_v46 = vpop.f32.mrf.mxu3 }
 0x250   :  { %v10661_v38 = vpop.eup %10660  ;;  %v3080_v10 = vadd.f32 %v3079_v46, %v3066_v17  ;;  %v8602_v46 = vld [vmem:[#allocation8 + $0x770] sm:$0xf0] }
 0x251   :  { %v11142_v59 = vpack.c.bf16 %v10661_v38, %v10659_v0  ;;  %v10281_v0 = vld [vmem:[#allocation8 + $0x5d4] sm:$0xf0]  ;;  %v8605_v57 = vor.u32 %v10330_v49, %v8602_v46  ;;  %v3122_v38 = vadd.f32 %v3121_v13, %v3108_v41  ;;  %v8512_v46 = vld [vmem:[#allocation8 + $0x6a8] sm:$0xf] }
 0x252   :  { %10662 = vtanh.f32 %v3080_v10  ;;  %v8401_v54 = vor.u32 %v10281_v0, %v8400_v40  ;;  %v10225_v10 = vld [vmem:[#allocation8 + $0x414] sm:$0xf0]  ;;  %v3149_v9 = vpop.f32.mrf.mxu0  ;;  %v8320_v0 = vld [vmem:[#allocation8 + $0x528] sm:$0xf] }
 0x253   :  { %3996 = vmatmul.bf16.vlgmr.msra.gmra.mxu0 %v11142_v59  ;;  %4090 = vmatpush.bf16.msrb.mxu3 %v8605_v57  ;;  %v10261_v49 = vld [vmem:[#allocation8 + $0x534] sm:$0xf0]  ;;  %v3163_v57 = vpop.f32.mrf.mxu1 }
 0x254   :  { %4100 = vmatpush.bf16.msra.mxu0 %v8289_v52  ;;  %v3110_v52 = vadd.f32 %v3109_v50, %v3096_v27  ;;  %v10313_v27 = vld [vmem:[#allocation8 + $0x6d4] sm:$0xf0]  ;;  %v3177_v50 = vpop.f32.mrf.mxu2 }
 0x256   :  { %v3124_v3 = vadd.f32 %v3123_v30, %v3110_v52  ;;  %v10239_v30 = vld [vmem:[#allocation8 + $0x48c] sm:$0xf]  ;;  %v8242_v52 = vld [vmem:[#allocation8 + $0x498] sm:$0xf0] }
 0x257   :  { %v3081_v43 = vpop.f32.mrf.mxu3  ;;  %4091 = vmatpush.bf16.msrb.mxu3 %v8589_v58  ;;  %v10283_v58 = vld [vmem:[#allocation8 + $0x5ec] sm:$0xf] }
 0x258   :  { %v3082_v8 = vadd.f32 %v3081_v43, %v3068_v44  ;;  %4101 = vmatpush.bf16.msra.mxu0 %v8273_v60  ;;  %v10663_v25 = vpop.eup %10662  ;;  %v8385_v60 = vor.u32 %v10277_v32, %v8384_v1  ;;  %v8570_v44 = vld [vmem:[#allocation8 + $0x730] sm:$0xf0]  ;;  %v8290_v43 = vld [vmem:[#allocation8 + $0x4f8] sm:$0xf0]  ;;  %v8496_v1 = vld [vmem:[#allocation8 + $0x688] sm:$0xf] }
 0x259   :  { %v8573_v7 = vor.u32 %v10322_v5, %v8570_v44  ;;  %v8293_v13 = vor.u32 %v10251_v6, %v8290_v43  ;;  %v10301_v44 = vld [vmem:[#allocation8 + $0x674] sm:$0xf0]  ;;  %v10231_v6 = vld [vmem:[#allocation8 + $0x44c] sm:$0xf]  ;;  %v8210_v43 = vld [vmem:[#allocation8 + $0x458] sm:$0xf0] }
 0x25a   :  { %10664 = vtanh.f32 %v3082_v8  ;;  %v8177_v8 = vor.u32 %v10225_v10, %v8176_v63  ;;  %v3151_v32 = vpop.f32.mrf.mxu0  ;;  %v8497_v63 = vor.u32 %v10305_v62, %v8496_v1  ;;  %v8213_v15 = vor.u32 %v10231_v6, %v8210_v43  ;;  %v10307_v6 = vld [vmem:[#allocation8 + $0x6ac] sm:$0xf]  ;;  %v8514_v43 = vld [vmem:[#allocation8 + $0x6b8] sm:$0xf0] }
 0x25b   :  { %4092 = vmatpush.bf16.msrb.mxu3 %v8573_v7  ;;  %v10279_v7 = vld [vmem:[#allocation8 + $0x5cc] sm:$0xf] }
 0x25c   :  { %4102 = vmatpush.bf16.msra.mxu0 %v8257_v28  ;;  %v8369_v28 = vor.u32 %v10273_v18, %v8368_v4  ;;  %v8480_v4 = vld [vmem:[#allocation8 + $0x668] sm:$0xf]  ;;  %v3179_v12 = vpop.f32.mrf.mxu2 }
 0x25d   :  { %v8481_v51 = vor.u32 %v10301_v44, %v8480_v4  ;;  %v8640_v4 = vld [vmem:[#allocation8 + $0x7a8] sm:$0xf]  ;;  %v8322_v44 = vld [vmem:[#allocation8 + $0x538] sm:$0xf0] }
 0x25f   :  { %v3135_v33 = vpop.f32.mrf.mxu3  ;;  %4093 = vmatpush.bf16.msrb.mxu3 %v8557_v45  ;;  %v10227_v45 = vld [vmem:[#allocation8 + $0x42c] sm:$0xf] }
 0x260   :  { %v10665_v26 = vpop.eup %10664  ;;  %4103 = vmatpush.bf16.msra.mxu0 %v8241_v20  ;;  %v3136_v14 = vadd.f32 %v3135_v33, %v3122_v38  ;;  %v10247_v20 = vld [vmem:[#allocation8 + $0x4cc] sm:$0xf]  ;;  %v10265_v33 = vld [vmem:[#allocation8 + $0x554] sm:$0xf0] }
 0x261   :  { %v11146_v11 = vpack.c.bf16 %v10665_v26, %v10663_v25  ;;  %v8277_v24 = vor.u32 %v10247_v20, %v8274_v48  ;;  %v8336_v25 = vld [vmem:[#allocation8 + $0x548] sm:$0xf]  ;;  %v10309_v38 = vld [vmem:[#allocation8 + $0x6b4] sm:$0xf0] }
 0x262   :  { %10666 = vtanh.f32 %v3136_v14  ;;  %v8528_v26 = vld [vmem:[#allocation8 + $0x6c8] sm:$0xf]  ;;  %v8337_v37 = vor.u32 %v10265_v33, %v8336_v25  ;;  %v8513_v36 = vor.u32 %v10309_v38, %v8512_v46  ;;  %v3150_v14 = vadd.f32 %v3149_v9, %v2327_v35  ;;  %v10297_v48 = vld [vmem:[#allocation8 + $0x654] sm:$0xf0]  ;;  %v10275_v9 = vld [vmem:[#allocation8 + $0x5ac] sm:$0xf] }
 0x263   :  { %4010 = vmatmul.bf16.vlgmr.msra.gmra.mxu1 %v11146_v11  ;;  %4052 = vmatmul.bf16.vlgmr.msrb.gmra.mxu0 %v11142_v59  ;;  %v8529_v40 = vor.u32 %v10313_v27, %v8528_v26  ;;  %v8465_v25 = vor.u32 %v10297_v48, %v8464_v16  ;;  %v8448_v26 = vld [vmem:[#allocation8 + $0x628] sm:$0xf]  ;;  %v10289_v46 = vld [vmem:[#allocation8 + $0x614] sm:$0xf0] }
 0x264   :  { %4104 = vmatpush.bf16.msra.mxu0 %v8225_v29  ;;  %4114 = vmatpush.bf16.msra.mxu1 %v8417_v34  ;;  %v10243_v29 = vld [vmem:[#allocation8 + $0x4ac] sm:$0xf]  ;;  %v8258_v34 = vld [vmem:[#allocation8 + $0x4b8] sm:$0xf0]  ;;  %v3164_v18 = vadd.f32 %v3163_v57, %v3150_v14  ;;  %v10349_v38 = vld [vmem:[#allocation8 + $0x7f4] sm:$0xf0] }
 0x265   :  { %v8261_v41 = vor.u32 %v10243_v29, %v8258_v34  ;;  %v10293_v29 = vld [vmem:[#allocation8 + $0x634] sm:$0xf0]  ;;  %v10223_v34 = vld [vmem:[#allocation8 + $0x40c] sm:$0xf]  ;;  %v8608_v48 = vld [vmem:[#allocation8 + $0x768] sm:$0xf] }
 0x266   :  { %v3178_v47 = vadd.f32 %v3177_v50, %v3164_v18  ;;  %v8672_v50 = vld [vmem:[#allocation8 + $0x7e8] sm:$0xf]  ;;  %v10341_v18 = vld [vmem:[#allocation8 + $0x7b4] sm:$0xf0] }
 0x267   :  { %v3137_v42 = vpop.f32.mrf.mxu3  ;;  %v8673_v1 = vor.u32 %v10349_v38, %v8672_v50  ;;  %v10347_v50 = vld [vmem:[#allocation8 + $0x7ec] sm:$0xf]  ;;  %v8674_v38 = vld [vmem:[#allocation8 + $0x7f8] sm:$0xf0] }
 0x268   :  { %v3138_v17 = vadd.f32 %v3137_v42, %v3124_v3  ;;  %4105 = vmatpush.bf16.msra.mxu0 %v8209_v53  ;;  %4115 = vmatpush.bf16.msra.mxu1 %v8401_v54  ;;  %v10667_v21 = vpop.eup %10666  ;;  %v8321_v53 = vor.u32 %v10261_v49, %v8320_v0  ;;  %v8245_v54 = vor.u32 %v10239_v30, %v8242_v52  ;;  %v8226_v3 = vld [vmem:[#allocation8 + $0x478] sm:$0xf0]  ;;  %v8432_v49 = vld [vmem:[#allocation8 + $0x608] sm:$0xf]  ;;  %v10267_v30 = vld [vmem:[#allocation8 + $0x56c] sm:$0xf] }
 0x269   :  { %v8418_v42 = vld [vmem:[#allocation8 + $0x5f8] sm:$0xf0]  ;;  %v8229_v10 = vor.u32 %v10235_v61, %v8226_v3  ;;  %v8656_v61 = vld [vmem:[#allocation8 + $0x7c8] sm:$0xf]  ;;  %v10345_v3 = vld [vmem:[#allocation8 + $0x7d4] sm:$0xf0] }
 0x26a   :  { %10668 = vtanh.f32 %v3138_v17  ;;  %v8421_v5 = vor.u32 %v10283_v58, %v8418_v42  ;;  %v8354_v52 = vld [vmem:[#allocation8 + $0x578] sm:$0xf0]  ;;  %v10263_v58 = vld [vmem:[#allocation8 + $0x54c] sm:$0xf] }
 0x26b   :  { %v8338_v42 = vld [vmem:[#allocation8 + $0x558] sm:$0xf0] }
 0x26c   :  { %4106 = vmatpush.bf16.msra.mxu0 %v8193_v39  ;;  %4116 = vmatpush.bf16.msra.mxu1 %v8385_v60  ;;  %v8305_v39 = vor.u32 %v10257_v56, %v8304_v55  ;;  %v3152_v60 = vadd.f32 %v3151_v32, %v2327_v35  ;;  %v8178_v35 = vld [vmem:[#allocation8 + $0x418] sm:$0xf0]  ;;  %v8433_v56 = vor.u32 %v10289_v46, %v8432_v49  ;;  %v10321_v49 = vld [vmem:[#allocation8 + $0x714] sm:$0xf0]  ;;  %v10287_v46 = vld [vmem:[#allocation8 + $0x60c] sm:$0xf] }
 0x26d   :  { %v8181_v0 = vor.u32 %v10223_v34, %v8178_v35  ;;  %v8357_v32 = vor.u32 %v10267_v30, %v8354_v52  ;;  %v10325_v34 = vld [vmem:[#allocation8 + $0x734] sm:$0xf0]  ;;  %v10291_v35 = vld [vmem:[#allocation8 + $0x62c] sm:$0xf]  ;;  %v8677_v52 = vor.u32 %v10347_v50, %v8674_v38  ;;  %v8856_v38 = vld [vmem:[#allocation8 + $0x960] sm:$0xf] }
 0x270   :  { %v10669_v22 = vpop.eup %10668  ;;  %4107 = vmatpush.bf16.msra.mxu0 %v8177_v8  ;;  %4117 = vmatpush.bf16.msra.mxu1 %v8369_v28  ;;  %v8402_v8 = vld [vmem:[#allocation8 + $0x5d8] sm:$0xf0]  ;;  %v3165_v28 = vpop.f32.mrf.mxu1 }
 0x271   :  { %v11150_v2 = vpack.c.bf16 %v10669_v22, %v10667_v21  ;;  %v8405_v20 = vor.u32 %v10279_v7, %v8402_v8  ;;  %v8194_v21 = vld [vmem:[#allocation8 + $0x438] sm:$0xf0]  ;;  %v8641_v7 = vor.u32 %v10341_v18, %v8640_v4  ;;  %v8517_v8 = vor.u32 %v10307_v6, %v8514_v43  ;;  %v10319_v18 = vld [vmem:[#allocation8 + $0x70c] sm:$0xf]  ;;  %v10380_v6 = vld [vmem:[#allocation8 + $0x8ec] sm:$0xf0] }
 0x272   :  { %v8197_v33 = vor.u32 %v10227_v45, %v8194_v21  ;;  %v10333_v45 = vld [vmem:[#allocation8 + $0x774] sm:$0xf0]  ;;  %v10299_v21 = vld [vmem:[#allocation8 + $0x66c] sm:$0xf] }
 0x273   :  { %4024 = vmatmul.bf16.vlgmr.msra.gmra.mxu2 %v11150_v2  ;;  %4066 = vmatmul.bf16.vlgmr.msrb.gmra.mxu1 %v11146_v11 }
 0x274   :  { %4156 = vmatpush.bf16.msrb.mxu0 %v8293_v13  ;;  %4118 = vmatpush.bf16.msra.mxu1 %v8353_v19  ;;  %v3166_v13 = vadd.f32 %v3165_v28, %v3152_v60  ;;  %v8386_v19 = vld [vmem:[#allocation8 + $0x5b8] sm:$0xf0]  ;;  %v8657_v60 = vor.u32 %v10345_v3, %v8656_v61  ;;  %v8624_v28 = vld [vmem:[#allocation8 + $0x788] sm:$0xf]  ;;  %v10331_v3 = vld [vmem:[#allocation8 + $0x76c] sm:$0xf] }
 0x275   :  { %4108 = vmatmul.bf16.vlgmr.msra.gmra.mxu0 %v11142_v59  ;;  %4128 = vmatpush.bf16.msra.mxu2 %v8545_v23  ;;  %v8389_v27 = vor.u32 %v10275_v9, %v8386_v19  ;;  %v8609_v9 = vor.u32 %v10333_v45, %v8608_v48  ;;  %v10412_v45 = vld [vmem:[#allocation8 + $0x9ec] sm:$0xf0] }
 0x276   :  { %v3180_v22 = vadd.f32 %v3179_v12, %v3166_v13  ;;  %v10255_v12 = vld [vmem:[#allocation8 + $0x50c] sm:$0xf]  ;;  %v8306_v13 = vld [vmem:[#allocation8 + $0x518] sm:$0xf0] }
 0x278   :  { %4157 = vmatpush.bf16.msrb.mxu0 %v8277_v24  ;;  %4119 = vmatpush.bf16.msra.mxu1 %v8337_v37  ;;  %v10271_v37 = vld [vmem:[#allocation8 + $0x58c] sm:$0xf] }
 0x279   :  { %4129 = vmatpush.bf16.msra.mxu2 %v8529_v40  ;;  %v8370_v40 = vld [vmem:[#allocation8 + $0x598] sm:$0xf0] }
 0x27a   :  { %v8373_v57 = vor.u32 %v10271_v37, %v8370_v40  ;;  %v8450_v37 = vld [vmem:[#allocation8 + $0x638] sm:$0xf0] }
 0x27c   :  { %4158 = vmatpush.bf16.msrb.mxu0 %v8261_v41  ;;  %4120 = vmatpush.bf16.msra.mxu1 %v8321_v53  ;;  %v8449_v41 = vor.u32 %v10293_v29, %v8448_v26  ;;  %v10315_v53 = vld [vmem:[#allocation8 + $0x6ec] sm:$0xf]  ;;  %v8576_v29 = vld [vmem:[#allocation8 + $0x728] sm:$0xf] }
 0x27d   :  { %4130 = vmatpush.bf16.msra.mxu2 %v8513_v36  ;;  %v8546_v36 = vld [vmem:[#allocation8 + $0x6f8] sm:$0xf0]  ;;  %v8577_v40 = vor.u32 %v10325_v34, %v8576_v29  ;;  %v10404_v29 = vld [vmem:[#allocation8 + $0x9ac] sm:$0xf0] }
 0x27e   :  { %v8549_v62 = vor.u32 %v10315_v53, %v8546_v36  ;;  %v10343_v53 = vld [vmem:[#allocation8 + $0x7cc] sm:$0xf]  ;;  %v8658_v36 = vld [vmem:[#allocation8 + $0x7d8] sm:$0xf0] }
 0x27f   :  { %v3191_v17 = vpop.f32.mrf.mxu3 }
 0x280   :  { %4159 = vmatpush.bf16.msrb.mxu0 %v8245_v54  ;;  %4121 = vmatpush.bf16.msra.mxu1 %v8305_v39  ;;  %v3192_v31 = vadd.f32 %v3191_v17, %v3178_v47  ;;  %v10311_v17 = vld [vmem:[#allocation8 + $0x6cc] sm:$0xf]  ;;  %v8530_v39 = vld [vmem:[#allocation8 + $0x6d8] sm:$0xf0]  ;;  %v10337_v47 = vld [vmem:[#allocation8 + $0x794] sm:$0xf0] }
 0x281   :  { %4131 = vmatpush.bf16.msra.mxu2 %v8497_v63  ;;  %v8341_v63 = vor.u32 %v10263_v58, %v8338_v42  ;;  %v8625_v16 = vor.u32 %v10337_v47, %v8624_v28  ;;  %v8610_v58 = vld [vmem:[#allocation8 + $0x778] sm:$0xf0]  ;;  %v8760_v28 = vld [vmem:[#allocation8 + $0x8a0] sm:$0xf]  ;;  %v10372_v47 = vld [vmem:[#allocation8 + $0x8ac] sm:$0xf0] }
 0x282   :  { %10670 = vtanh.f32 %v3192_v31  ;;  %v8309_v31 = vor.u32 %v10255_v12, %v8306_v13  ;;  %v8613_v42 = vor.u32 %v10331_v3, %v8610_v58  ;;  %v8761_v12 = vor.u32 %v10372_v47, %v8760_v28  ;;  %v8744_v13 = vld [vmem:[#allocation8 + $0x880] sm:$0xf]  ;;  %v10440_v3 = vld [vmem:[#allocation8 + $0xacc] sm:$0xf0]  ;;  %v10370_v58 = vld [vmem:[#allocation8 + $0x8a4] sm:$0xf] }
 0x283   :  { %4080 = vmatmul.bf16.vlgmr.msrb.gmra.mxu2 %v11150_v2  ;;  %4122 = vmatmul.bf16.vlgmr.msra.gmra.mxu1 %v11146_v11  ;;  %v10432_v28 = vld [vmem:[#allocation8 + $0xa8c] sm:$0xf0]  ;;  %v10362_v47 = vld [vmem:[#allocation8 + $0x864] sm:$0xf] }
 0x284   :  { %4160 = vmatpush.bf16.msrb.mxu0 %v8229_v10  ;;  %4170 = vmatpush.bf16.msrb.mxu1 %v8421_v5  ;;  %v8533_v10 = vor.u32 %v10311_v17, %v8530_v39  ;;  %v10259_v5 = vld [vmem:[#allocation8 + $0x52c] sm:$0xf]  ;;  %v8594_v39 = vld [vmem:[#allocation8 + $0x758] sm:$0xf0] }
 0x285   :  { %4132 = vmatpush.bf16.msra.mxu2 %v8481_v51  ;;  %v10303_v51 = vld [vmem:[#allocation8 + $0x68c] sm:$0xf] }
 0x286   :  { %v10327_v17 = vld [vmem:[#allocation8 + $0x74c] sm:$0xf] }
 0x287   :  { %v3193_v23 = vpop.f32.mrf.mxu3 }
 0x288   :  { %v3194_v24 = vadd.f32 %v3193_v23, %v3180_v22  ;;  %4161 = vmatpush.bf16.msrb.mxu0 %v8213_v15  ;;  %4171 = vmatpush.bf16.msrb.mxu1 %v8405_v20  ;;  %v10671_v54 = vpop.eup %10670  ;;  %v8498_v15 = vld [vmem:[#allocation8 + $0x698] sm:$0xf0]  ;;  %v8592_v23 = vld [vmem:[#allocation8 + $0x748] sm:$0xf] }
 0x289   :  { %4133 = vmatpush.bf16.msra.mxu2 %v8465_v25  ;;  %v8501_v20 = vor.u32 %v10303_v51, %v8498_v15  ;;  %v8482_v22 = vld [vmem:[#allocation8 + $0x678] sm:$0xf0]  ;;  %v10295_v25 = vld [vmem:[#allocation8 + $0x64c] sm:$0xf]  ;;  %v10368_v51 = vld [vmem:[#allocation8 + $0x88c] sm:$0xf0] }
 0x28a   :  { %10672 = vtanh.f32 %v3194_v24  ;;  %v8485_v19 = vor.u32 %v10299_v21, %v8482_v22  ;;  %v10329_v24 = vld [vmem:[#allocation8 + $0x754] sm:$0xf0]  ;;  %v8745_v15 = vor.u32 %v10368_v51, %v8744_v13  ;;  %v10360_v22 = vld [vmem:[#allocation8 + $0x84c] sm:$0xf0] }
 0x28b   :  { %v8593_v26 = vor.u32 %v10329_v24, %v8592_v23  ;;  %v10408_v23 = vld [vmem:[#allocation8 + $0x9cc] sm:$0xf0] }
 0x28c   :  { %4162 = vmatpush.bf16.msrb.mxu0 %v8197_v33  ;;  %4172 = vmatpush.bf16.msrb.mxu1 %v8389_v27  ;;  %v8466_v33 = vld [vmem:[#allocation8 + $0x658] sm:$0xf0] }
 0x28d   :  { %4134 = vmatpush.bf16.msra.mxu2 %v8449_v41  ;;  %v8469_v27 = vor.u32 %v10295_v25, %v8466_v33  ;;  %v8453_v41 = vor.u32 %v10291_v35, %v8450_v37  ;;  %v8696_v25 = vld [vmem:[#allocation8 + $0x820] sm:$0xf]  ;;  %v10356_v33 = vld [vmem:[#allocation8 + $0x82c] sm:$0xf0] }
 0x28e   :  { %v8680_v35 = vld [vmem:[#allocation8 + $0x800] sm:$0xf]  ;;  %v10352_v37 = vld [vmem:[#allocation8 + $0x80c] sm:$0xf0] }
 0x290   :  { %v10673_v55 = vpop.eup %10672  ;;  %4163 = vmatpush.bf16.msrb.mxu0 %v8181_v0  ;;  %4173 = vmatpush.bf16.msrb.mxu1 %v8373_v57  ;;  %v8560_v0 = vld [vmem:[#allocation8 + $0x708] sm:$0xf]  ;;  %v8434_v57 = vld [vmem:[#allocation8 + $0x618] sm:$0xf0] }
 0x291   :  { %v11158_v14 = vpack.c.bf16 %v10673_v55, %v10671_v54  ;;  %4135 = vmatpush.bf16.msra.mxu2 %v8433_v56  ;;  %v8561_v30 = vor.u32 %v10321_v49, %v8560_v0  ;;  %v8661_v54 = vor.u32 %v10343_v53, %v8658_v36  ;;  %v10339_v55 = vld [vmem:[#allocation8 + $0x7ac] sm:$0xf]  ;;  %v8642_v56 = vld [vmem:[#allocation8 + $0x7b8] sm:$0xf0]  ;;  %v10400_v0 = vld [vmem:[#allocation8 + $0x98c] sm:$0xf0] }
 0x292   :  { %v10378_v49 = vld [vmem:[#allocation8 + $0x8e4] sm:$0xf]  ;;  %v10444_v53 = vld [vmem:[#allocation8 + $0xaec] sm:$0xf0] }
 0x293   :  { %4038 = vmatmul.bf16.vlgmr.msra.gmra.mxu3 %v11158_v14  ;;  %4164 = vmatmul.bf16.vlgmr.msrb.gmra.mxu0 %v11142_v59  ;;  %v8325_v59 = vor.u32 %v10259_v5, %v8322_v44  ;;  %v8792_v44 = vld [vmem:[#allocation8 + $0x8e0] sm:$0xf]  ;;  %v10374_v36 = vld [vmem:[#allocation8 + $0x8c4] sm:$0xf] }
 0x294   :  { %4142 = vmatpush.bf16.msra.mxu3 %v8673_v1  ;;  %4174 = vmatpush.bf16.msrb.mxu1 %v8357_v32  ;;  %v8645_v1 = vor.u32 %v10339_v55, %v8642_v56  ;;  %v10335_v32 = vld [vmem:[#allocation8 + $0x78c] sm:$0xf]  ;;  %v8793_v43 = vor.u32 %v10380_v6, %v8792_v44 }
 0x295   :  { %4184 = vmatpush.bf16.msrb.mxu2 %v8549_v62  ;;  %v8626_v62 = vld [vmem:[#allocation8 + $0x798] sm:$0xf0] }
 0x296   :  { %4136 = vmatmul.bf16.vlgmr.msra.gmra.mxu2 %v11150_v2  ;;  %v8629_v61 = vor.u32 %v10335_v32, %v8626_v62  ;;  %5004 = vmatpush.bf16.msra.mxu0 %v8793_v43  ;;  %v10392_v32 = vld [vmem:[#allocation8 + $0x94c] sm:$0xf0]  ;;  %v9032_v62 = vld [vmem:[#allocation8 + $0xac0] sm:$0xf] }
 0x297   :  { %v8808_v43 = vld [vmem:[#allocation8 + $0x900] sm:$0xf] }
 0x298   :  { %4143 = vmatpush.bf16.msra.mxu3 %v8657_v60  ;;  %4175 = vmatpush.bf16.msrb.mxu1 %v8341_v63  ;;  %v8597_v60 = vor.u32 %v10327_v17, %v8594_v39  ;;  %v10323_v63 = vld [vmem:[#allocation8 + $0x72c] sm:$0xf]  ;;  %v9033_v17 = vor.u32 %v10440_v3, %v9032_v62  ;;  %v8858_v62 = vld [vmem:[#allocation8 + $0x970] sm:$0xf0] }
 0x299   :  { %4185 = vmatpush.bf16.msrb.mxu2 %v8533_v10  ;;  %v8578_v10 = vld [vmem:[#allocation8 + $0x738] sm:$0xf0] }
 0x29a   :  { %v8581_v4 = vor.u32 %v10323_v63, %v8578_v10  ;;  %v10388_v63 = vld [vmem:[#allocation8 + $0x92c] sm:$0xf0]  ;;  %v9016_v10 = vld [vmem:[#allocation8 + $0xaa0] sm:$0xf] }
 0x29c   :  { %4144 = vmatpush.bf16.msra.mxu3 %v8641_v7  ;;  %4176 = vmatpush.bf16.msrb.mxu1 %v8325_v59  ;;  %v8776_v7 = vld [vmem:[#allocation8 + $0x8c0] sm:$0xf]  ;;  %v10376_v59 = vld [vmem:[#allocation8 + $0x8cc] sm:$0xf0] }
 0x29d   :  { %4186 = vmatpush.bf16.msrb.mxu2 %v8517_v8  ;;  %v8777_v8 = vor.u32 %v10376_v59, %v8776_v7  ;;  %v10384_v7 = vld [vmem:[#allocation8 + $0x90c] sm:$0xf0]  ;;  %v9000_v59 = vld [vmem:[#allocation8 + $0xa80] sm:$0xf] }
 0x29e   :  { %v9001_v13 = vor.u32 %v10432_v28, %v9000_v59  ;;  %v9144_v28 = vld [vmem:[#allocation8 + $0xba0] sm:$0xf] }
 0x29f   :  { %5005 = vmatpush.bf16.msra.mxu0 %v8777_v8  ;;  %v8809_v8 = vor.u32 %v10384_v7, %v8808_v43  ;;  %v9034_v43 = vld [vmem:[#allocation8 + $0xad0] sm:$0xf0] }
 0x2a0   :  { %4145 = vmatpush.bf16.msra.mxu3 %v8625_v16  ;;  %4177 = vmatpush.bf16.msrb.mxu1 %v8309_v31  ;;  %v8728_v16 = vld [vmem:[#allocation8 + $0x860] sm:$0xf]  ;;  %v10364_v31 = vld [vmem:[#allocation8 + $0x86c] sm:$0xf0] }
 0x2a1   :  { %4187 = vmatpush.bf16.msrb.mxu2 %v8501_v20  ;;  %v8920_v20 = vld [vmem:[#allocation8 + $0x9e0] sm:$0xf]  ;;  %v8729_v48 = vor.u32 %v10364_v31, %v8728_v16  ;;  %v8922_v16 = vld [vmem:[#allocation8 + $0x9f0] sm:$0xf0] }
 0x2a2   :  { %v8921_v21 = vor.u32 %v10412_v45, %v8920_v20  ;;  %v8984_v20 = vld [vmem:[#allocation8 + $0xa60] sm:$0xf] }
 0x2a3   :  { %4094 = vmatmul.bf16.vlgmr.msrb.gmra.mxu3 %v11158_v14  ;;  %4178 = vmatmul.bf16.vlgmr.msrb.gmra.mxu1 %v11146_v11  ;;  %v8437_v11 = vor.u32 %v10287_v46, %v8434_v57  ;;  %v8794_v46 = vld [vmem:[#allocation8 + $0x8f0] sm:$0xf0] }
 0x2a4   :  { %4146 = vmatpush.bf16.msra.mxu3 %v8609_v9  ;;  %5006 = vmatpush.bf16.msra.mxu0 %v8761_v12  ;;  %v8904_v9 = vld [vmem:[#allocation8 + $0x9c0] sm:$0xf]  ;;  %v8797_v50 = vor.u32 %v10378_v49, %v8794_v46  ;;  %v8730_v12 = vld [vmem:[#allocation8 + $0x870] sm:$0xf0]  ;;  %v10420_v49 = vld [vmem:[#allocation8 + $0xa2c] sm:$0xf0] }
 0x2a5   :  { %4188 = vmatpush.bf16.msrb.mxu2 %v8485_v19  ;;  %5018 = vmatpush.bf16.msra.mxu1 %v8921_v21  ;;  %v8905_v24 = vor.u32 %v10408_v23, %v8904_v9  ;;  %v8733_v51 = vor.u32 %v10362_v47, %v8730_v12  ;;  %v10358_v21 = vld [vmem:[#allocation8 + $0x844] sm:$0xf]  ;;  %v10468_v47 = vld [vmem:[#allocation8 + $0xbac] sm:$0xf0] }
 0x2a6   :  { %v9145_v12 = vor.u32 %v10468_v47, %v9144_v28  ;;  %v10414_v28 = vld [vmem:[#allocation8 + $0xa04] sm:$0xf]  ;;  %v8938_v47 = vld [vmem:[#allocation8 + $0xa10] sm:$0xf0] }
 0x2a8   :  { %4147 = vmatpush.bf16.msra.mxu3 %v8593_v26  ;;  %5007 = vmatpush.bf16.msra.mxu0 %v8745_v15  ;;  %v8888_v26 = vld [vmem:[#allocation8 + $0x9a0] sm:$0xf]  ;;  %v10410_v15 = vld [vmem:[#allocation8 + $0x9e4] sm:$0xf] }
 0x2a9   :  { %4189 = vmatpush.bf16.msrb.mxu2 %v8469_v27  ;;  %v8697_v27 = vor.u32 %v10356_v33, %v8696_v25  ;;  %5019 = vmatpush.bf16.msra.mxu1 %v8905_v24  ;;  %v8889_v34 = vor.u32 %v10404_v29, %v8888_v26  ;;  %v8925_v31 = vor.u32 %v10410_v15, %v8922_v16  ;;  %v8968_v24 = vld [vmem:[#allocation8 + $0xa40] sm:$0xf]  ;;  %v10424_v25 = vld [vmem:[#allocation8 + $0xa4c] sm:$0xf0]  ;;  %v10354_v26 = vld [vmem:[#allocation8 + $0x824] sm:$0xf] }
 0x2aa   :  { %v8969_v33 = vor.u32 %v10424_v25, %v8968_v24  ;;  %v10402_v29 = vld [vmem:[#allocation8 + $0x9a4] sm:$0xf] }
 0x2ab   :  { %v10434_v15 = vld [vmem:[#allocation8 + $0xaa4] sm:$0xf] }
 0x2ac   :  { %4148 = vmatpush.bf16.msra.mxu3 %v8577_v40  ;;  %5008 = vmatpush.bf16.msra.mxu0 %v8729_v48  ;;  %v8872_v40 = vld [vmem:[#allocation8 + $0x980] sm:$0xf]  ;;  %v10428_v48 = vld [vmem:[#allocation8 + $0xa6c] sm:$0xf0] }
 0x2ad   :  { %4190 = vmatpush.bf16.msrb.mxu2 %v8453_v41  ;;  %5020 = vmatpush.bf16.msra.mxu1 %v8889_v34  ;;  %v8681_v41 = vor.u32 %v10352_v37, %v8680_v35  ;;  %v8873_v57 = vor.u32 %v10400_v0, %v8872_v40  ;;  %v8985_v45 = vor.u32 %v10428_v48, %v8984_v20  ;;  %v8890_v37 = vld [vmem:[#allocation8 + $0x9b0] sm:$0xf0]  ;;  %v8952_v0 = vld [vmem:[#allocation8 + $0xa20] sm:$0xf] }
 0x2ae   :  { %v8893_v40 = vor.u32 %v10402_v29, %v8890_v37  ;;  %v8953_v46 = vor.u32 %v10420_v49, %v8952_v0  ;;  %v9112_v37 = vld [vmem:[#allocation8 + $0xb60] sm:$0xf] }
 0x2b0   :  { %4149 = vmatpush.bf16.msra.mxu3 %v8561_v30  ;;  %v10396_v30 = vld [vmem:[#allocation8 + $0x96c] sm:$0xf0] }
 0x2b1   :  { %4191 = vmatpush.bf16.msrb.mxu2 %v8437_v11  ;;  %5021 = vmatpush.bf16.msra.mxu1 %v8873_v57  ;;  %v9048_v11 = vld [vmem:[#allocation8 + $0xae0] sm:$0xf]  ;;  %v10350_v57 = vld [vmem:[#allocation8 + $0x804] sm:$0xf] }
 0x2b2   :  { %v9049_v55 = vor.u32 %v10444_v53, %v9048_v11 }
 0x2b3   :  { %4150 = vmatmul.bf16.vlgmr.msra.gmra.mxu3 %v11158_v14 }
 0x2b4   :  { %4198 = vmatpush.bf16.msrb.mxu3 %v8677_v52  ;;  %4192 = vmatmul.bf16.vlgmr.msrb.gmra.mxu2 %v11150_v2  ;;  %v8562_v2 = vld [vmem:[#allocation8 + $0x718] sm:$0xf0]  ;;  %v8857_v52 = vor.u32 %v10396_v30, %v8856_v38  ;;  %v10398_v38 = vld [vmem:[#allocation8 + $0x984] sm:$0xf] }
 0x2b5   :  { %v8565_v5 = vor.u32 %v10319_v18, %v8562_v2  ;;  %5032 = vmatpush.bf16.msra.mxu2 %v9049_v55  ;;  %v10436_v18 = vld [vmem:[#allocation8 + $0xaac] sm:$0xf0]  ;;  %v10366_v2 = vld [vmem:[#allocation8 + $0x884] sm:$0xf]  ;;  %v9176_v55 = vld [vmem:[#allocation8 + $0xbe0] sm:$0xf] }
 0x2b6   :  { %5022 = vmatpush.bf16.msra.mxu1 %v8857_v52  ;;  %v9017_v44 = vor.u32 %v10436_v18, %v9016_v10  ;;  %v8874_v52 = vld [vmem:[#allocation8 + $0x990] sm:$0xf0]  ;;  %v10472_v10 = vld [vmem:[#allocation8 + $0xbcc] sm:$0xf0]  ;;  %v10390_v18 = vld [vmem:[#allocation8 + $0x944] sm:$0xf] }
 0x2b7   :  { %v8877_v53 = vor.u32 %v10398_v38, %v8874_v52 }
 0x2b8   :  { %4199 = vmatpush.bf16.msrb.mxu3 %v8661_v54  ;;  %v8778_v54 = vld [vmem:[#allocation8 + $0x8d0] sm:$0xf0] }
 0x2b9   :  { %v8781_v56 = vor.u32 %v10374_v36, %v8778_v54  ;;  %5033 = vmatpush.bf16.msra.mxu2 %v9033_v17  ;;  %v8936_v36 = vld [vmem:[#allocation8 + $0xa00] sm:$0xf]  ;;  %v10416_v54 = vld [vmem:[#allocation8 + $0xa0c] sm:$0xf0] }
 0x2bc   :  { %4200 = vmatpush.bf16.msrb.mxu3 %v8645_v1  ;;  %v8840_v1 = vld [vmem:[#allocation8 + $0x940] sm:$0xf] }
 0x2bd   :  { %5034 = vmatpush.bf16.msra.mxu2 %v9017_v44 }
 0x2c0   :  { %4201 = vmatpush.bf16.msrb.mxu3 %v8629_v61  ;;  %v8841_v61 = vor.u32 %v10392_v32, %v8840_v1  ;;  %v10476_v1 = vld [vmem:[#allocation8 + $0xbec] sm:$0xf0]  ;;  %v10394_v32 = vld [vmem:[#allocation8 + $0x964] sm:$0xf] }
 0x2c1   :  { %5035 = vmatpush.bf16.msra.mxu2 %v9001_v13  ;;  %v8861_v3 = vor.u32 %v10394_v32, %v8858_v62  ;;  %v10386_v13 = vld [vmem:[#allocation8 + $0x924] sm:$0xf] }
 0x2c2   :  { %5023 = vmatpush.bf16.msra.mxu1 %v8841_v61  ;;  %v9177_v61 = vor.u32 %v10476_v1, %v9176_v55  ;;  %v10422_v55 = vld [vmem:[#allocation8 + $0xa44] sm:$0xf] }
 0x2c4   :  { %4202 = vmatpush.bf16.msrb.mxu3 %v8613_v42  ;;  %v8762_v42 = vld [vmem:[#allocation8 + $0x8b0] sm:$0xf0] }
 0x2c5   :  { %v8765_v39 = vor.u32 %v10370_v58, %v8762_v42  ;;  %5036 = vmatpush.bf16.msra.mxu2 %v8985_v45  ;;  %v10442_v58 = vld [vmem:[#allocation8 + $0xae4] sm:$0xf]  ;;  %v9050_v42 = vld [vmem:[#allocation8 + $0xaf0] sm:$0xf0] }
 0x2c6   :  { %v9053_v17 = vor.u32 %v10442_v58, %v9050_v42  ;;  %v10418_v42 = vld [vmem:[#allocation8 + $0xa24] sm:$0xf] }
 0x2c8   :  { %4203 = vmatpush.bf16.msrb.mxu3 %v8597_v60  ;;  %v8824_v60 = vld [vmem:[#allocation8 + $0x920] sm:$0xf] }
 0x2c9   :  { %5037 = vmatpush.bf16.msra.mxu2 %v8969_v33 }
 0x2cc   :  { %4204 = vmatpush.bf16.msrb.mxu3 %v8581_v4  ;;  %v8825_v4 = vor.u32 %v10388_v63, %v8824_v60  ;;  %v9160_v63 = vld [vmem:[#allocation8 + $0xbc0] sm:$0xf] }
 0x2cd   :  { %5038 = vmatpush.bf16.msra.mxu2 %v8953_v46  ;;  %v10426_v46 = vld [vmem:[#allocation8 + $0xa64] sm:$0xf] }
 0x2ce   :  { %5024 = vmatpush.bf16.msra.mxu1 %v8825_v4  ;;  %v9161_v4 = vor.u32 %v10472_v10, %v9160_v63  ;;  %v8800_v63 = vld [vmem:[#allocation8 + $0x8e8] sm:$0xf]  ;;  %v10381_v10 = vld [vmem:[#allocation8 + $0x8f4] sm:$0xf0] }
 0x2d0   :  { %4205 = vmatpush.bf16.msrb.mxu3 %v8565_v5  ;;  %v8746_v5 = vld [vmem:[#allocation8 + $0x890] sm:$0xf0]  ;;  %v11168_v34 = vpop.f32.mrf.mxu0 }
 0x2d1   :  { %v8749_v6 = vor.u32 %v10366_v2, %v8746_v5  ;;  %v8842_v2 = vld [vmem:[#allocation8 + $0x950] sm:$0xf0]  ;;  %v10438_v5 = vld [vmem:[#allocation8 + $0xac4] sm:$0xf] }
 0x2d2   :  { %5025 = vmatpush.bf16.msra.mxu1 %v8809_v8  ;;  %v9037_v7 = vor.u32 %v10438_v5, %v9034_v43  ;;  %v10448_v43 = vld [vmem:[#allocation8 + $0xb0c] sm:$0xf0] }
 0x2d3   :  { %4206 = vmatmul.bf16.vlgmr.msrb.gmra.mxu3 %v11158_v14  ;;  %v8712_v14 = vld [vmem:[#allocation8 + $0x840] sm:$0xf] }
 0x2d4   :  { %v8713_v19 = vor.u32 %v10360_v22, %v8712_v14  ;;  %v8714_v14 = vld [vmem:[#allocation8 + $0x850] sm:$0xf0]  ;;  %v10406_v22 = vld [vmem:[#allocation8 + $0x9c4] sm:$0xf]  ;;  %5046 = vmatpush.bf16.msra.mxu3 %v9177_v61  ;;  %v9080_v61 = vld [vmem:[#allocation8 + $0xb20] sm:$0xf] }
 0x2d5   :  { %v8717_v9 = vor.u32 %v10358_v21, %v8714_v14  ;;  %v9128_v21 = vld [vmem:[#allocation8 + $0xb80] sm:$0xf]  ;;  %v10464_v14 = vld [vmem:[#allocation8 + $0xb8c] sm:$0xf0] }
 0x2d6   :  { %5009 = vmatpush.bf16.msra.mxu0 %v8713_v19  ;;  %5074 = vmatpush.bf16.msrb.mxu1 %v8925_v31  ;;  %v8906_v19 = vld [vmem:[#allocation8 + $0x9d0] sm:$0xf0] }
 0x2d7   :  { %v8909_v23 = vor.u32 %v10406_v22, %v8906_v19  ;;  %v9018_v31 = vld [vmem:[#allocation8 + $0xab0] sm:$0xf0]  ;;  %v9129_v22 = vor.u32 %v10464_v14, %v9128_v21 }
 0x2d8   :  { %v3999_v60 = vpop.f32.mrf.mxu0  ;;  %5047 = vmatpush.bf16.msra.mxu3 %v9161_v4  ;;  %v9021_v20 = vor.u32 %v10434_v15, %v9018_v31  ;;  %v8810_v19 = vld [vmem:[#allocation8 + $0x910] sm:$0xf0]  ;;  %v8784_v15 = vld [vmem:[#allocation8 + $0x8c8] sm:$0xf]  ;;  %v8941_v31 = vor.u32 %v10414_v28, %v8938_v47 }
 0x2d9   :  { %v8704_v47 = vld [vmem:[#allocation8 + $0x828] sm:$0xf] }
 0x2da   :  { %5010 = vmatpush.bf16.msra.mxu0 %v8697_v27  ;;  %5075 = vmatpush.bf16.msrb.mxu1 %v8909_v23  ;;  %v8698_v27 = vld [vmem:[#allocation8 + $0x830] sm:$0xf0]  ;;  %v10430_v23 = vld [vmem:[#allocation8 + $0xa84] sm:$0xf] }
 0x2db   :  { %v8701_v35 = vor.u32 %v10354_v26, %v8698_v27  ;;  %v9002_v26 = vld [vmem:[#allocation8 + $0xa90] sm:$0xf0] }
 0x2dc   :  { %5048 = vmatpush.bf16.msra.mxu3 %v9145_v12  ;;  %v9005_v29 = vor.u32 %v10430_v23, %v9002_v26  ;;  %v10474_v12 = vld [vmem:[#allocation8 + $0xbe4] sm:$0xf] }
 0x2de   :  { %5011 = vmatpush.bf16.msra.mxu0 %v8681_v41  ;;  %5076 = vmatpush.bf16.msrb.mxu1 %v8893_v40  ;;  %v10460_v40 = vld [vmem:[#allocation8 + $0xb6c] sm:$0xf0] }
 0x2df   :  { %v9113_v49 = vor.u32 %v10460_v40, %v9112_v37  ;;  %v8752_v40 = vld [vmem:[#allocation8 + $0x888] sm:$0xf] }
 0x2e0   :  { %v11170_v41 = vpop.f32.mrf.mxu1  ;;  %v4053_v25 = vpop.f32.mrf.mxu0  ;;  %5049 = vmatpush.bf16.msra.mxu3 %v9129_v22 }
 0x2e2   :  { %5060 = vmatpush.bf16.msrb.mxu0 %v8797_v50  ;;  %v8682_v50 = vld [vmem:[#allocation8 + $0x810] sm:$0xf0]  ;;  %5077 = vmatpush.bf16.msrb.mxu1 %v8877_v53  ;;  %v9096_v53 = vld [vmem:[#allocation8 + $0xb40] sm:$0xf] }
 0x2e3   :  { %v8685_v11 = vor.u32 %v10350_v57, %v8682_v50  ;;  %v8986_v57 = vld [vmem:[#allocation8 + $0xa70] sm:$0xf0] }
 0x2e4   :  { %5050 = vmatpush.bf16.msra.mxu3 %v9113_v49  ;;  %v10369_v49 = vld [vmem:[#allocation8 + $0x894] sm:$0xf0] }
 0x2e6   :  { %5061 = vmatpush.bf16.msrb.mxu0 %v8781_v56  ;;  %v8937_v56 = vor.u32 %v10416_v54, %v8936_v36  ;;  %5078 = vmatpush.bf16.msrb.mxu1 %v8861_v3  ;;  %v10456_v36 = vld [vmem:[#allocation8 + $0xb4c] sm:$0xf0] }
 0x2e7   :  { %v10452_v3 = vld [vmem:[#allocation8 + $0xb2c] sm:$0xf0] }
 0x2e8   :  { %5039 = vmatpush.bf16.msra.mxu2 %v8937_v56  ;;  %v4013_v44 = vpop.f32.mrf.mxu1  ;;  %v8970_v56 = vld [vmem:[#allocation8 + $0xa50] sm:$0xf0]  ;;  %v4055_v62 = vpop.f32.mrf.mxu0  ;;  %v9081_v58 = vor.u32 %v10452_v3, %v9080_v61 }
 0x2e9   :  { %v8973_v1 = vor.u32 %v10422_v55, %v8970_v56 }
 0x2ea   :  { %5062 = vmatpush.bf16.msrb.mxu0 %v8765_v39  ;;  %v11174_v39 = vld [vmem:[#allocation10 + $0x4] sm:$0xf] }
 0x2eb   :  { %v3340_v59 = vperm.slane %v11174_v39, 0  ;;  %v3341_v32 = vperm.slane %v11174_v39, 1 }
 0x2ec   :  { %5088 = vmatpush.bf16.msrb.mxu2 %v9053_v17  ;;  %v8954_v17 = vld [vmem:[#allocation8 + $0xa30] sm:$0xf0] }
 0x2ed   :  { %v3998_v48 = vadd.f32 %v11168_v34, %v3340_v59  ;;  %v4000_v27 = vadd.f32 %v3999_v60, %v3340_v59  ;;  %v8957_v4 = vor.u32 %v10418_v42, %v8954_v17  ;;  %v8801_v59 = vor.u32 %v10381_v10, %v8800_v63  ;;  %v8720_v42 = vld [vmem:[#allocation8 + $0x848] sm:$0xf]  ;;  %v10361_v17 = vld [vmem:[#allocation8 + $0x854] sm:$0xf0] }
 0x2ee   :  { %5063 = vmatpush.bf16.msrb.mxu0 %v8749_v6  ;;  %v8845_v6 = vor.u32 %v10390_v18, %v8842_v2  ;;  %v4054_v2 = vadd.f32 %v4053_v25, %v3341_v32  ;;  %v10470_v25 = vld [vmem:[#allocation8 + $0xbc4] sm:$0xf] }
 0x2ef   :  { %v4012_v24 = vadd.f32 %v11170_v41, %v3998_v48  ;;  %v4014_v0 = vadd.f32 %v4013_v44, %v4000_v27  ;;  %v8989_v41 = vor.u32 %v10426_v46, %v8986_v57  ;;  %v4056_v48 = vadd.f32 %v4055_v62, %v3341_v32  ;;  %v10466_v46 = vld [vmem:[#allocation8 + $0xba4] sm:$0xf]  ;;  %v9146_v57 = vld [vmem:[#allocation8 + $0xbb0] sm:$0xf0] }
 0x2f0   :  { %5079 = vmatpush.bf16.msrb.mxu1 %v8845_v6  ;;  %5089 = vmatpush.bf16.msrb.mxu2 %v9037_v7  ;;  %v9064_v6 = vld [vmem:[#allocation8 + $0xb00] sm:$0xf] }
 0x2f2   :  { %5064 = vmatpush.bf16.msrb.mxu0 %v8733_v51  ;;  %v8826_v51 = vld [vmem:[#allocation8 + $0x930] sm:$0xf0] }
 0x2f3   :  { %v8829_v16 = vor.u32 %v10386_v13, %v8826_v51 }
 0x2f4   :  { %5090 = vmatpush.bf16.msrb.mxu2 %v9021_v20  ;;  %v9178_v20 = vld [vmem:[#allocation8 + $0xbf0] sm:$0xf0] }
 0x2f5   :  { %5080 = vmatpush.bf16.msrb.mxu1 %v8829_v16  ;;  %v10377_v16 = vld [vmem:[#allocation8 + $0x8d4] sm:$0xf0] }
 0x2f6   :  { %5065 = vmatpush.bf16.msrb.mxu0 %v8717_v9  ;;  %v11172_v30 = vpop.f32.mrf.mxu2  ;;  %v10382_v9 = vld [vmem:[#allocation8 + $0x904] sm:$0xf]  ;;  %v8785_v22 = vor.u32 %v10377_v16, %v8784_v15  ;;  %v10405_v16 = vld [vmem:[#allocation8 + $0x9b4] sm:$0xf0] }
 0x2f7   :  { %v8813_v33 = vor.u32 %v10382_v9, %v8810_v19  ;;  %v4026_v34 = vadd.f32 %v11172_v30, %v4012_v24  ;;  %v9097_v30 = vor.u32 %v10456_v36, %v9096_v53  ;;  %v8768_v9 = vld [vmem:[#allocation8 + $0x8a8] sm:$0xf]  ;;  %v4109_v19 = vpop.f32.mrf.mxu0  ;;  %v10373_v24 = vld [vmem:[#allocation8 + $0x8b4] sm:$0xf0] }
 0x2f8   :  { %5091 = vmatpush.bf16.msrb.mxu2 %v9005_v29  ;;  %v8769_v37 = vor.u32 %v10373_v24, %v8768_v9  ;;  %v8928_v53 = vld [vmem:[#allocation8 + $0x9e8] sm:$0xf]  ;;  %v10413_v36 = vld [vmem:[#allocation8 + $0x9f4] sm:$0xf0] }
 0x2f9   :  { %5081 = vmatpush.bf16.msrb.mxu1 %v8813_v33  ;;  %5051 = vmatpush.bf16.msra.mxu3 %v9097_v30  ;;  %v9162_v33 = vld [vmem:[#allocation8 + $0xbd0] sm:$0xf0]  ;;  %v8880_v24 = vld [vmem:[#allocation8 + $0x988] sm:$0xf] }
 0x2fa   :  { %5066 = vmatpush.bf16.msrb.mxu0 %v8701_v35  ;;  %v4067_v35 = vpop.f32.mrf.mxu1  ;;  %v9165_v27 = vor.u32 %v10470_v25, %v9162_v33  ;;  %v9130_v30 = vld [vmem:[#allocation8 + $0xb90] sm:$0xf0]  ;;  %v10401_v25 = vld [vmem:[#allocation8 + $0x994] sm:$0xf0]  ;;  %v10450_v33 = vld [vmem:[#allocation8 + $0xb24] sm:$0xf] }
 0x2fb   :  { %v4068_v13 = vadd.f32 %v4067_v35, %v4054_v2  ;;  %v10458_v2 = vld [vmem:[#allocation8 + $0xb64] sm:$0xf] }
 0x2fc   :  { %5092 = vmatpush.bf16.msrb.mxu2 %v8989_v41  ;;  %v8753_v41 = vor.u32 %v10369_v49, %v8752_v40  ;;  %v8864_v40 = vld [vmem:[#allocation8 + $0x968] sm:$0xf] }
 0x2fd   :  { %5052 = vmatpush.bf16.msra.mxu3 %v9081_v58  ;;  %v8929_v58 = vor.u32 %v10413_v36, %v8928_v53 }
 0x2fe   :  { %5067 = vmatpush.bf16.msrb.mxu0 %v8685_v11  ;;  %v4027_v8 = vpop.f32.mrf.mxu2 }
 0x2ff   :  { %v4028_v11 = vadd.f32 %v4027_v8, %v4014_v0  ;;  %v9065_v8 = vor.u32 %v10448_v43, %v9064_v6  ;;  %v4111_v32 = vpop.f32.mrf.mxu0 }
 0x300   :  { %5093 = vmatpush.bf16.msrb.mxu2 %v8973_v1 }
 0x301   :  { %5053 = vmatpush.bf16.msra.mxu3 %v9065_v8  ;;  %v8721_v8 = vor.u32 %v10361_v17, %v8720_v42  ;;  %v8770_v42 = vld [vmem:[#allocation8 + $0x8b8] sm:$0xf0] }
 0x302   :  { %v4069_v60 = vpop.f32.mrf.mxu1 }
 0x303   :  { %v4070_v14 = vadd.f32 %v4069_v60, %v4056_v48  ;;  %v8912_v60 = vld [vmem:[#allocation8 + $0x9c8] sm:$0xf] }
 0x304   :  { %5094 = vmatpush.bf16.msrb.mxu2 %v8957_v4 }
 0x306   :  { %v4081_v50 = vpop.f32.mrf.mxu2 }
 0x307   :  { %v4082_v21 = vadd.f32 %v4081_v50, %v4068_v13  ;;  %v9149_v50 = vor.u32 %v10466_v46, %v9146_v57  ;;  %v8896_v13 = vld [vmem:[#allocation8 + $0x9a8] sm:$0xf]  ;;  %v10446_v57 = vld [vmem:[#allocation8 + $0xb04] sm:$0xf] }
 0x308   :  { %5095 = vmatpush.bf16.msrb.mxu2 %v8941_v31  ;;  %v10454_v31 = vld [vmem:[#allocation8 + $0xb44] sm:$0xf]  ;;  %v8897_v9 = vor.u32 %v10405_v16, %v8896_v13  ;;  %v9056_v46 = vld [vmem:[#allocation8 + $0xae8] sm:$0xf]  ;;  %v10385_v13 = vld [vmem:[#allocation8 + $0x914] sm:$0xf0] }
 0x309   :  { %v10433_v16 = vld [vmem:[#allocation8 + $0xa94] sm:$0xf0] }
 0x30a   :  { %v4123_v29 = vpop.f32.mrf.mxu1 }
 0x30e   :  { %v4083_v5 = vpop.f32.mrf.mxu2 }
 0x30f   :  { %v4084_v26 = vadd.f32 %v4083_v5, %v4070_v14  ;;  %v9114_v5 = vld [vmem:[#allocation8 + $0xb70] sm:$0xf0] }
 0x310   :  { %v9117_v6 = vor.u32 %v10458_v2, %v9114_v5  ;;  %v10389_v2 = vld [vmem:[#allocation8 + $0x934] sm:$0xf0]  ;;  %v9024_v5 = vld [vmem:[#allocation8 + $0xaa8] sm:$0xf] }
 0x312   :  { %v4125_v10 = vpop.f32.mrf.mxu1 }
 0x316   :  { %v4039_v45 = vpop.f32.mrf.mxu3 }
 0x317   :  { %v4040_v38 = vadd.f32 %v4039_v45, %v4026_v34  ;;  %v9181_v45 = vor.u32 %v10474_v12, %v9178_v20  ;;  %v10357_v12 = vld [vmem:[#allocation8 + $0x834] sm:$0xf0]  ;;  %v9098_v20 = vld [vmem:[#allocation8 + $0xb50] sm:$0xf0] }
 0x319   :  { %10674 = vtanh.f32 %v4040_v38  ;;  %5102 = vmatpush.bf16.msrb.mxu3 %v9181_v45  ;;  %v4137_v0 = vpop.f32.mrf.mxu2  ;;  %v3342_v38 = vperm.slane %v11174_v39, 2  ;;  %v9101_v45 = vor.u32 %v10454_v31, %v9098_v20  ;;  %v10363_v31 = vld [vmem:[#allocation8 + $0x86c] sm:$0xf]  ;;  %v8738_v20 = vld [vmem:[#allocation8 + $0x878] sm:$0xf0] }
 0x31b   :  { %v4110_v1 = vadd.f32 %v4109_v19, %v3342_v38  ;;  %v8688_v19 = vld [vmem:[#allocation8 + $0x808] sm:$0xf] }
 0x31d   :  { %5103 = vmatpush.bf16.msrb.mxu3 %v9165_v27  ;;  %v4124_v63 = vadd.f32 %v4123_v29, %v4110_v1  ;;  %v10379_v27 = vld [vmem:[#allocation8 + $0x8ec] sm:$0xf]  ;;  %v8802_v29 = vld [vmem:[#allocation8 + $0x8f8] sm:$0xf0]  ;;  %v8848_v1 = vld [vmem:[#allocation8 + $0x948] sm:$0xf] }
 0x31e   :  { %v4041_v52 = vpop.f32.mrf.mxu3  ;;  %v8805_v49 = vor.u32 %v10379_v27, %v8802_v29  ;;  %v10359_v27 = vld [vmem:[#allocation8 + $0x84c] sm:$0xf]  ;;  %v8722_v29 = vld [vmem:[#allocation8 + $0x858] sm:$0xf0] }
 0x31f   :  { %v4042_v54 = vadd.f32 %v4041_v52, %v4028_v11  ;;  %v10675_v18 = vpop.eup %10674  ;;  %v8736_v11 = vld [vmem:[#allocation8 + $0x868] sm:$0xf]  ;;  %v10365_v52 = vld [vmem:[#allocation8 + $0x874] sm:$0xf0]  ;;  %v4138_v43 = vadd.f32 %v4137_v0, %v4124_v63 }
 0x320   :  { %v8737_v3 = vor.u32 %v10365_v52, %v8736_v11  ;;  %v10397_v0 = vld [vmem:[#allocation8 + $0x974] sm:$0xf0]  ;;  %v8786_v11 = vld [vmem:[#allocation8 + $0x8d8] sm:$0xf0]  ;;  %v4179_v17 = vpop.f32.mrf.mxu1 }
 0x321   :  { %10676 = vtanh.f32 %v4042_v54  ;;  %5104 = vmatpush.bf16.msrb.mxu3 %v9149_v50  ;;  %v10462_v54 = vld [vmem:[#allocation8 + $0xb84] sm:$0xf]  ;;  %v9066_v50 = vld [vmem:[#allocation8 + $0xb10] sm:$0xf0] }
 0x322   :  { %v9133_v55 = vor.u32 %v10462_v54, %v9130_v30  ;;  %v9069_v52 = vor.u32 %v10446_v57, %v9066_v50  ;;  %v8865_v54 = vor.u32 %v10397_v0, %v8864_v40  ;;  %v8725_v57 = vor.u32 %v10359_v27, %v8722_v29  ;;  %v8976_v50 = vld [vmem:[#allocation8 + $0xa48] sm:$0xf]  ;;  %v10435_v27 = vld [vmem:[#allocation8 + $0xaac] sm:$0xf]  ;;  %v9026_v29 = vld [vmem:[#allocation8 + $0xab8] sm:$0xf0] }
 0x325   :  { %5105 = vmatpush.bf16.msrb.mxu3 %v9133_v55 }
 0x326   :  { %v4095_v44 = vpop.f32.mrf.mxu3 }
 0x327   :  { %v10677_v7 = vpop.eup %10676  ;;  %v4096_v23 = vadd.f32 %v4095_v44, %v4082_v21  ;;  %v4112_v44 = vadd.f32 %v4111_v32, %v3342_v38  ;;  %v10445_v38 = vld [vmem:[#allocation8 + $0xaf4] sm:$0xf0] }
 0x328   :  { %v11181_v51 = vpack.c.bf16 %v10677_v7, %v10675_v18  ;;  %v10409_v18 = vld [vmem:[#allocation8 + $0x9d4] sm:$0xf0]  ;;  %v4139_v7 = vpop.f32.mrf.mxu2  ;;  %v9057_v55 = vor.u32 %v10445_v38, %v9056_v46 }
 0x329   :  { %10678 = vtanh.f32 %v4096_v23  ;;  %v8913_v28 = vor.u32 %v10409_v18, %v8912_v60  ;;  %5106 = vmatpush.bf16.msrb.mxu3 %v9117_v6  ;;  %v10353_v23 = vld [vmem:[#allocation8 + $0x814] sm:$0xf0]  ;;  %v8832_v18 = vld [vmem:[#allocation8 + $0x928] sm:$0xf] }
 0x32a   :  { %5012 = vmatmul.bf16.vlgmr.msra.gmra.mxu0 %v11181_v51  ;;  %v10393_v32 = vld [vmem:[#allocation8 + $0x954] sm:$0xf0] }
 0x32b   :  { %5116 = vmatpush.bf16.msra.mxu0 %v8801_v59  ;;  %v4126_v59 = vadd.f32 %v4125_v10, %v4112_v44  ;;  %v8849_v60 = vor.u32 %v10393_v32, %v8848_v1  ;;  %v10437_v6 = vld [vmem:[#allocation8 + $0xab4] sm:$0xf0] }
 0x32d   :  { %v4140_v48 = vadd.f32 %v4139_v7, %v4126_v59  ;;  %5107 = vmatpush.bf16.msrb.mxu3 %v9101_v45  ;;  %v8754_v7 = vld [vmem:[#allocation8 + $0x898] sm:$0xf0]  ;;  %v3343_v59 = vperm.slane %v11174_v39, 3 }
 0x32e   :  { %v4097_v35 = vpop.f32.mrf.mxu3  ;;  %v8930_v45 = vld [vmem:[#allocation8 + $0x9f8] sm:$0xf0] }
 0x32f   :  { %v4098_v34 = vadd.f32 %v4097_v35, %v4084_v26  ;;  %5117 = vmatpush.bf16.msra.mxu0 %v8785_v22  ;;  %v10679_v56 = vpop.eup %10678  ;;  %v8705_v22 = vor.u32 %v10357_v12, %v8704_v47  ;;  %v9082_v26 = vld [vmem:[#allocation8 + $0xb30] sm:$0xf0]  ;;  %v8816_v12 = vld [vmem:[#allocation8 + $0x908] sm:$0xf] }
 0x330   :  { %v9085_v35 = vor.u32 %v10450_v33, %v9082_v26  ;;  %v10429_v26 = vld [vmem:[#allocation8 + $0xa74] sm:$0xf0] }
 0x331   :  { %10680 = vtanh.f32 %v4098_v34  ;;  %v8689_v34 = vor.u32 %v10353_v23, %v8688_v19  ;;  %v8741_v19 = vor.u32 %v10363_v31, %v8738_v20  ;;  %v8992_v23 = vld [vmem:[#allocation8 + $0xa68] sm:$0xf] }
 0x332   :  { %5108 = vmatpush.bf16.msrb.mxu3 %v9085_v35  ;;  %v8993_v46 = vor.u32 %v10429_v26, %v8992_v23  ;;  %v8834_v26 = vld [vmem:[#allocation8 + $0x938] sm:$0xf0] }
 0x333   :  { %5118 = vmatpush.bf16.msra.mxu0 %v8769_v37  ;;  %v8881_v37 = vor.u32 %v10401_v25, %v8880_v24  ;;  %v4181_v25 = vpop.f32.mrf.mxu1 }
 0x336   :  { %v4151_v62 = vpop.f32.mrf.mxu3  ;;  %5109 = vmatpush.bf16.msrb.mxu3 %v9069_v52  ;;  %v10355_v52 = vld [vmem:[#allocation8 + $0x82c] sm:$0xf] }
 0x337   :  { %v10681_v61 = vpop.eup %10680  ;;  %5119 = vmatpush.bf16.msra.mxu0 %v8753_v41  ;;  %v4152_v15 = vadd.f32 %v4151_v62, %v4138_v43  ;;  %v10375_v41 = vld [vmem:[#allocation8 + $0x8cc] sm:$0xf]  ;;  %v9040_v62 = vld [vmem:[#allocation8 + $0xac8] sm:$0xf]  ;;  %v4193_v44 = vpop.f32.mrf.mxu2 }
 0x338   :  { %v11185_v4 = vpack.c.bf16 %v10681_v61, %v10679_v56  ;;  %v8789_v56 = vor.u32 %v10375_v41, %v8786_v11  ;;  %v4165_v61 = vpop.f32.mrf.mxu0  ;;  %v10367_v43 = vld [vmem:[#allocation8 + $0x88c] sm:$0xf]  ;;  %v10425_v11 = vld [vmem:[#allocation8 + $0xa54] sm:$0xf0] }
 0x339   :  { %10682 = vtanh.f32 %v4152_v15  ;;  %v8757_v47 = vor.u32 %v10367_v43, %v8754_v7  ;;  %v9008_v15 = vld [vmem:[#allocation8 + $0xa88] sm:$0xf]  ;;  %v8977_v32 = vor.u32 %v10425_v11, %v8976_v50  ;;  %v10477_v43 = vld [vmem:[#allocation8 + $0xbf4] sm:$0xf0]  ;;  %v10395_v7 = vld [vmem:[#allocation8 + $0x96c] sm:$0xf] }
 0x33a   :  { %5026 = vmatmul.bf16.vlgmr.msra.gmra.mxu1 %v11185_v4  ;;  %5068 = vmatmul.bf16.vlgmr.msrb.gmra.mxu0 %v11181_v51  ;;  %v9009_v39 = vor.u32 %v10433_v16, %v9008_v15  ;;  %v9120_v11 = vld [vmem:[#allocation8 + $0xb68] sm:$0xf] }
 0x33b   :  { %5120 = vmatpush.bf16.msra.mxu0 %v8737_v3  ;;  %5130 = vmatpush.bf16.msra.mxu1 %v8929_v58  ;;  %v10441_v3 = vld [vmem:[#allocation8 + $0xad4] sm:$0xf0]  ;;  %v10371_v58 = vld [vmem:[#allocation8 + $0x8ac] sm:$0xf] }
 0x33c   :  { %v9041_v63 = vor.u32 %v10441_v3, %v9040_v62  ;;  %v8773_v10 = vor.u32 %v10371_v58, %v8770_v42  ;;  %v10421_v58 = vld [vmem:[#allocation8 + $0xa34] sm:$0xf0]  ;;  %v10351_v42 = vld [vmem:[#allocation8 + $0x80c] sm:$0xf] }
 0x33e   :  { %v4153_v21 = vpop.f32.mrf.mxu3 }
 0x33f   :  { %v4154_v14 = vadd.f32 %v4153_v21, %v4140_v48  ;;  %5121 = vmatpush.bf16.msra.mxu0 %v8721_v8  ;;  %5131 = vmatpush.bf16.msra.mxu1 %v8913_v28  ;;  %v10683_v53 = vpop.eup %10682  ;;  %v8833_v8 = vor.u32 %v10389_v2, %v8832_v18  ;;  %v9025_v28 = vor.u32 %v10437_v6, %v9024_v5  ;;  %v10411_v48 = vld [vmem:[#allocation8 + $0x9ec] sm:$0xf]  ;;  %v4195_v0 = vpop.f32.mrf.mxu2  ;;  %v8944_v2 = vld [vmem:[#allocation8 + $0xa08] sm:$0xf]  ;;  %v10417_v5 = vld [vmem:[#allocation8 + $0xa14] sm:$0xf0] }
 0x340   :  { %v4166_v21 = vadd.f32 %v4165_v61, %v3343_v59  ;;  %v8933_v33 = vor.u32 %v10411_v48, %v8930_v45  ;;  %v8960_v61 = vld [vmem:[#allocation8 + $0xa28] sm:$0xf]  ;;  %v10473_v45 = vld [vmem:[#allocation8 + $0xbd4] sm:$0xf0] }
 0x341   :  { %10684 = vtanh.f32 %v4154_v14  ;;  %v4167_v14 = vpop.f32.mrf.mxu0  ;;  %v9184_v6 = vld [vmem:[#allocation8 + $0xbe8] sm:$0xf] }
 0x342   :  { %v4180_v24 = vadd.f32 %v4179_v17, %v4166_v21  ;;  %v4168_v35 = vadd.f32 %v4167_v14, %v3343_v59  ;;  %v8690_v17 = vld [vmem:[#allocation8 + $0x818] sm:$0xf0]  ;;  %v9185_v15 = vor.u32 %v10477_v43, %v9184_v6  ;;  %v9168_v48 = vld [vmem:[#allocation8 + $0xbc8] sm:$0xf]  ;;  %v10391_v21 = vld [vmem:[#allocation8 + $0x94c] sm:$0xf] }
 0x343   :  { %5122 = vmatpush.bf16.msra.mxu0 %v8705_v22  ;;  %5132 = vmatpush.bf16.msra.mxu1 %v8897_v9  ;;  %v8817_v9 = vor.u32 %v10385_v13, %v8816_v12  ;;  %v8693_v18 = vor.u32 %v10351_v42, %v8690_v17  ;;  %v8866_v59 = vld [vmem:[#allocation8 + $0x978] sm:$0xf0]  ;;  %v8945_v13 = vor.u32 %v10417_v5, %v8944_v2  ;;  %v10453_v42 = vld [vmem:[#allocation8 + $0xb34] sm:$0xf0]  ;;  %v10419_v17 = vld [vmem:[#allocation8 + $0xa2c] sm:$0xf] }
 0x344   :  { %v4194_v40 = vadd.f32 %v4193_v44, %v4180_v24  ;;  %v8869_v31 = vor.u32 %v10395_v7, %v8866_v59  ;;  %v8850_v14 = vld [vmem:[#allocation8 + $0x958] sm:$0xf0]  ;;  %v9152_v24 = vld [vmem:[#allocation8 + $0xba8] sm:$0xf]  ;;  %v10449_v2 = vld [vmem:[#allocation8 + $0xb14] sm:$0xf0] }
 0x345   :  { %v10415_v5 = vld [vmem:[#allocation8 + $0xa0c] sm:$0xf]  ;;  %v9186_v43 = vld [vmem:[#allocation8 + $0xbf8] sm:$0xf0] }
 0x346   :  { %v10475_v6 = vld [vmem:[#allocation8 + $0xbec] sm:$0xf] }
 0x347   :  { %v10685_v36 = vpop.eup %10684  ;;  %5123 = vmatpush.bf16.msra.mxu0 %v8689_v34  ;;  %5133 = vmatpush.bf16.msra.mxu1 %v8881_v37  ;;  %v10407_v34 = vld [vmem:[#allocation8 + $0x9cc] sm:$0xf]  ;;  %v8914_v37 = vld [vmem:[#allocation8 + $0x9d8] sm:$0xf0]  ;;  %v9189_v59 = vor.u32 %v10475_v6, %v9186_v43  ;;  %v9368_v43 = vld [vmem:[#allocation8 + $0xd60] sm:$0xf] }
 0x348   :  { %v11189_v30 = vpack.c.bf16 %v10685_v36, %v10683_v53  ;;  %v8917_v41 = vor.u32 %v10407_v34, %v8914_v37  ;;  %v8706_v53 = vld [vmem:[#allocation8 + $0x838] sm:$0xf0]  ;;  %v9029_v34 = vor.u32 %v10435_v27, %v9026_v29  ;;  %v9136_v37 = vld [vmem:[#allocation8 + $0xb88] sm:$0xf]  ;;  %v10508_v27 = vld [vmem:[#allocation8 + $0xcec] sm:$0xf0] }
 0x349   :  { %v8709_v62 = vor.u32 %v10355_v52, %v8706_v53  ;;  %v10461_v52 = vld [vmem:[#allocation8 + $0xb74] sm:$0xf0]  ;;  %v10427_v53 = vld [vmem:[#allocation8 + $0xa6c] sm:$0xf] }
 0x34a   :  { %5040 = vmatmul.bf16.vlgmr.msra.gmra.mxu2 %v11189_v30  ;;  %5082 = vmatmul.bf16.vlgmr.msrb.gmra.mxu1 %v11185_v4 }
 0x34b   :  { %5172 = vmatpush.bf16.msrb.mxu0 %v8805_v49  ;;  %5134 = vmatpush.bf16.msra.mxu1 %v8865_v54  ;;  %v4182_v49 = vadd.f32 %v4181_v25, %v4168_v35  ;;  %v10403_v54 = vld [vmem:[#allocation8 + $0x9ac] sm:$0xf]  ;;  %v10469_v25 = vld [vmem:[#allocation8 + $0xbb4] sm:$0xf0] }
 0x34c   :  { %5124 = vmatmul.bf16.vlgmr.msra.gmra.mxu0 %v11181_v51  ;;  %5144 = vmatpush.bf16.msra.mxu2 %v9057_v55  ;;  %v8898_v55 = vld [vmem:[#allocation8 + $0x9b8] sm:$0xf0]  ;;  %v9153_v35 = vor.u32 %v10469_v25, %v9152_v24  ;;  %v10447_v25 = vld [vmem:[#allocation8 + $0xb0c] sm:$0xf] }
 0x34d   :  { %v4196_v36 = vadd.f32 %v4195_v0, %v4182_v49  ;;  %v8901_v3 = vor.u32 %v10403_v54, %v8898_v55  ;;  %v10383_v0 = vld [vmem:[#allocation8 + $0x90c] sm:$0xf]  ;;  %v8818_v49 = vld [vmem:[#allocation8 + $0x918] sm:$0xf0]  ;;  %v9121_v54 = vor.u32 %v10461_v52, %v9120_v11  ;;  %v10540_v52 = vld [vmem:[#allocation8 + $0xdec] sm:$0xf0] }
 0x34f   :  { %5173 = vmatpush.bf16.msrb.mxu0 %v8789_v56  ;;  %5135 = vmatpush.bf16.msra.mxu1 %v8849_v60  ;;  %v10399_v60 = vld [vmem:[#allocation8 + $0x98c] sm:$0xf] }
 0x350   :  { %5145 = vmatpush.bf16.msra.mxu2 %v9041_v63  ;;  %v8882_v63 = vld [vmem:[#allocation8 + $0x998] sm:$0xf0] }
 0x351   :  { %v8885_v44 = vor.u32 %v10399_v60, %v8882_v63  ;;  %v8962_v60 = vld [vmem:[#allocation8 + $0xa38] sm:$0xf0] }
 0x353   :  { %5174 = vmatpush.bf16.msrb.mxu0 %v8773_v10  ;;  %5136 = vmatpush.bf16.msra.mxu1 %v8833_v8  ;;  %v8961_v10 = vor.u32 %v10421_v58, %v8960_v61  ;;  %v10443_v8 = vld [vmem:[#allocation8 + $0xaec] sm:$0xf]  ;;  %v9088_v58 = vld [vmem:[#allocation8 + $0xb28] sm:$0xf] }
 0x354   :  { %5146 = vmatpush.bf16.msra.mxu2 %v9025_v28  ;;  %v9058_v28 = vld [vmem:[#allocation8 + $0xaf8] sm:$0xf0]  ;;  %v9089_v63 = vor.u32 %v10453_v42, %v9088_v58  ;;  %v10532_v58 = vld [vmem:[#allocation8 + $0xdac] sm:$0xf0] }
 0x355   :  { %v9061_v20 = vor.u32 %v10443_v8, %v9058_v28  ;;  %v10471_v8 = vld [vmem:[#allocation8 + $0xbcc] sm:$0xf]  ;;  %v9170_v28 = vld [vmem:[#allocation8 + $0xbd8] sm:$0xf0] }
 0x356   :  { %v4207_v22 = vpop.f32.mrf.mxu3 }
 0x357   :  { %5175 = vmatpush.bf16.msrb.mxu0 %v8757_v47  ;;  %5137 = vmatpush.bf16.msra.mxu1 %v8817_v9  ;;  %v4208_v38 = vadd.f32 %v4207_v22, %v4194_v40  ;;  %v10439_v22 = vld [vmem:[#allocation8 + $0xacc] sm:$0xf]  ;;  %v9042_v9 = vld [vmem:[#allocation8 + $0xad8] sm:$0xf0]  ;;  %v10465_v40 = vld [vmem:[#allocation8 + $0xb94] sm:$0xf0] }
 0x358   :  { %5147 = vmatpush.bf16.msra.mxu2 %v9009_v39  ;;  %v9169_v39 = vor.u32 %v10473_v45, %v9168_v48  ;;  %v9045_v23 = vor.u32 %v10439_v22, %v9042_v9  ;;  %v9137_v50 = vor.u32 %v10465_v40, %v9136_v37  ;;  %v10459_v45 = vld [vmem:[#allocation8 + $0xb6c] sm:$0xf]  ;;  %v9106_v9 = vld [vmem:[#allocation8 + $0xb58] sm:$0xf0]  ;;  %v9272_v37 = vld [vmem:[#allocation8 + $0xca0] sm:$0xf] }
 0x359   :  { %10686 = vtanh.f32 %v4208_v38  ;;  %v8821_v38 = vor.u32 %v10383_v0, %v8818_v49  ;;  %v10455_v22 = vld [vmem:[#allocation8 + $0xb4c] sm:$0xf]  ;;  %v10500_v40 = vld [vmem:[#allocation8 + $0xcac] sm:$0xf0]  ;;  %v9256_v49 = vld [vmem:[#allocation8 + $0xc80] sm:$0xf] }
 0x35a   :  { %5096 = vmatmul.bf16.vlgmr.msrb.gmra.mxu2 %v11189_v30  ;;  %5138 = vmatmul.bf16.vlgmr.msra.gmra.mxu1 %v11185_v4  ;;  %v9273_v0 = vor.u32 %v10500_v40, %v9272_v37  ;;  %v10560_v37 = vld [vmem:[#allocation8 + $0xe8c] sm:$0xf0]  ;;  %v10490_v40 = vld [vmem:[#allocation8 + $0xc64] sm:$0xf] }
 0x35b   :  { %5176 = vmatpush.bf16.msrb.mxu0 %v8741_v19  ;;  %5186 = vmatpush.bf16.msrb.mxu1 %v8933_v33  ;;  %v8853_v19 = vor.u32 %v10391_v21, %v8850_v14  ;;  %v10387_v33 = vld [vmem:[#allocation8 + $0x92c] sm:$0xf]  ;;  %v9122_v21 = vld [vmem:[#allocation8 + $0xb78] sm:$0xf0] }
 0x35c   :  { %5148 = vmatpush.bf16.msra.mxu2 %v8993_v46  ;;  %v10431_v46 = vld [vmem:[#allocation8 + $0xa8c] sm:$0xf]  ;;  %v9125_v14 = vor.u32 %v10459_v45, %v9122_v21  ;;  %v10568_v45 = vld [vmem:[#allocation8 + $0xecc] sm:$0xf0]  ;;  %v10498_v21 = vld [vmem:[#allocation8 + $0xca4] sm:$0xf] }
 0x35e   :  { %v4209_v56 = vpop.f32.mrf.mxu3 }
 0x35f   :  { %v4210_v1 = vadd.f32 %v4209_v56, %v4196_v36  ;;  %5177 = vmatpush.bf16.msrb.mxu0 %v8725_v57  ;;  %5187 = vmatpush.bf16.msrb.mxu1 %v8917_v41  ;;  %v10687_v47 = vpop.eup %10686  ;;  %v9010_v57 = vld [vmem:[#allocation8 + $0xa98] sm:$0xf0]  ;;  %v9104_v56 = vld [vmem:[#allocation8 + $0xb48] sm:$0xf] }
 0x360   :  { %5149 = vmatpush.bf16.msra.mxu2 %v8977_v32  ;;  %v9013_v41 = vor.u32 %v10431_v46, %v9010_v57  ;;  %v8994_v36 = vld [vmem:[#allocation8 + $0xa78] sm:$0xf0]  ;;  %v10423_v32 = vld [vmem:[#allocation8 + $0xa4c] sm:$0xf]  ;;  %v10496_v46 = vld [vmem:[#allocation8 + $0xc8c] sm:$0xf0] }
 0x361   :  { %10688 = vtanh.f32 %v4210_v1  ;;  %v8997_v55 = vor.u32 %v10427_v53, %v8994_v36  ;;  %v10457_v1 = vld [vmem:[#allocation8 + $0xb54] sm:$0xf0]  ;;  %v9257_v57 = vor.u32 %v10496_v46, %v9256_v49  ;;  %v10488_v36 = vld [vmem:[#allocation8 + $0xc4c] sm:$0xf0] }
 0x362   :  { %v9105_v61 = vor.u32 %v10457_v1, %v9104_v56  ;;  %v10536_v56 = vld [vmem:[#allocation8 + $0xdcc] sm:$0xf0] }
 0x363   :  { %5178 = vmatpush.bf16.msrb.mxu0 %v8709_v62  ;;  %5188 = vmatpush.bf16.msrb.mxu1 %v8901_v3  ;;  %v8978_v62 = vld [vmem:[#allocation8 + $0xa58] sm:$0xf0] }
 0x364   :  { %5150 = vmatpush.bf16.msra.mxu2 %v8961_v10  ;;  %v8981_v3 = vor.u32 %v10423_v32, %v8978_v62  ;;  %v8965_v10 = vor.u32 %v10419_v17, %v8962_v60  ;;  %v9208_v32 = vld [vmem:[#allocation8 + $0xc20] sm:$0xf]  ;;  %v10484_v62 = vld [vmem:[#allocation8 + $0xc2c] sm:$0xf0] }
 0x365   :  { %v9192_v17 = vld [vmem:[#allocation8 + $0xc00] sm:$0xf]  ;;  %v10480_v60 = vld [vmem:[#allocation8 + $0xc0c] sm:$0xf0] }
 0x367   :  { %v10689_v12 = vpop.eup %10688  ;;  %5179 = vmatpush.bf16.msrb.mxu0 %v8693_v18  ;;  %5189 = vmatpush.bf16.msrb.mxu1 %v8885_v44  ;;  %v9072_v18 = vld [vmem:[#allocation8 + $0xb08] sm:$0xf]  ;;  %v8946_v44 = vld [vmem:[#allocation8 + $0xa18] sm:$0xf0] }
 0x368   :  { %v11197_v16 = vpack.c.bf16 %v10689_v12, %v10687_v47  ;;  %5151 = vmatpush.bf16.msra.mxu2 %v8945_v13  ;;  %v9073_v7 = vor.u32 %v10449_v2, %v9072_v18  ;;  %v9173_v47 = vor.u32 %v10471_v8, %v9170_v28  ;;  %v10467_v12 = vld [vmem:[#allocation8 + $0xbac] sm:$0xf]  ;;  %v9154_v13 = vld [vmem:[#allocation8 + $0xbb8] sm:$0xf0]  ;;  %v10528_v18 = vld [vmem:[#allocation8 + $0xd8c] sm:$0xf0] }
 0x369   :  { %v10506_v2 = vld [vmem:[#allocation8 + $0xce4] sm:$0xf]  ;;  %v10572_v8 = vld [vmem:[#allocation8 + $0xeec] sm:$0xf0] }
 0x36a   :  { %5054 = vmatmul.bf16.vlgmr.msra.gmra.mxu3 %v11197_v16  ;;  %5180 = vmatmul.bf16.vlgmr.msrb.gmra.mxu0 %v11181_v51  ;;  %v8837_v51 = vor.u32 %v10387_v33, %v8834_v26  ;;  %v9304_v26 = vld [vmem:[#allocation8 + $0xce0] sm:$0xf]  ;;  %v10502_v28 = vld [vmem:[#allocation8 + $0xcc4] sm:$0xf] }
 0x36b   :  { %5158 = vmatpush.bf16.msra.mxu3 %v9185_v15  ;;  %5190 = vmatpush.bf16.msrb.mxu1 %v8869_v31  ;;  %v9157_v15 = vor.u32 %v10467_v12, %v9154_v13  ;;  %v10463_v31 = vld [vmem:[#allocation8 + $0xb8c] sm:$0xf]  ;;  %v9305_v29 = vor.u32 %v10508_v27, %v9304_v26 }
 0x36c   :  { %5200 = vmatpush.bf16.msrb.mxu2 %v9061_v20  ;;  %v9138_v20 = vld [vmem:[#allocation8 + $0xb98] sm:$0xf0] }
 0x36d   :  { %5152 = vmatmul.bf16.vlgmr.msra.gmra.mxu2 %v11189_v30  ;;  %v9141_v48 = vor.u32 %v10463_v31, %v9138_v20  ;;  %6020 = vmatpush.bf16.msra.mxu0 %v9305_v29  ;;  %v10520_v31 = vld [vmem:[#allocation8 + $0xd4c] sm:$0xf0]  ;;  %v9544_v20 = vld [vmem:[#allocation8 + $0xec0] sm:$0xf] }
 0x36e   :  { %v9320_v29 = vld [vmem:[#allocation8 + $0xd00] sm:$0xf] }
 0x36f   :  { %5159 = vmatpush.bf16.msra.mxu3 %v9169_v39  ;;  %5191 = vmatpush.bf16.msrb.mxu1 %v8853_v19  ;;  %v9109_v39 = vor.u32 %v10455_v22, %v9106_v9  ;;  %v10451_v19 = vld [vmem:[#allocation8 + $0xb2c] sm:$0xf]  ;;  %v9545_v22 = vor.u32 %v10568_v45, %v9544_v20  ;;  %v9370_v20 = vld [vmem:[#allocation8 + $0xd70] sm:$0xf0] }
 0x370   :  { %5201 = vmatpush.bf16.msrb.mxu2 %v9045_v23  ;;  %v9090_v23 = vld [vmem:[#allocation8 + $0xb38] sm:$0xf0] }
 0x371   :  { %v9093_v24 = vor.u32 %v10451_v19, %v9090_v23  ;;  %v10516_v19 = vld [vmem:[#allocation8 + $0xd2c] sm:$0xf0]  ;;  %v9528_v23 = vld [vmem:[#allocation8 + $0xea0] sm:$0xf] }
 0x373   :  { %5160 = vmatpush.bf16.msra.mxu3 %v9153_v35  ;;  %5192 = vmatpush.bf16.msrb.mxu1 %v8837_v51  ;;  %v9288_v35 = vld [vmem:[#allocation8 + $0xcc0] sm:$0xf]  ;;  %v10504_v51 = vld [vmem:[#allocation8 + $0xccc] sm:$0xf0] }
 0x374   :  { %5202 = vmatpush.bf16.msrb.mxu2 %v9029_v34  ;;  %v9289_v34 = vor.u32 %v10504_v51, %v9288_v35  ;;  %v10512_v35 = vld [vmem:[#allocation8 + $0xd0c] sm:$0xf0]  ;;  %v9512_v51 = vld [vmem:[#allocation8 + $0xe80] sm:$0xf] }
 0x375   :  { %v9513_v49 = vor.u32 %v10560_v37, %v9512_v51  ;;  %v9656_v37 = vld [vmem:[#allocation8 + $0xfa0] sm:$0xf] }
 0x376   :  { %6021 = vmatpush.bf16.msra.mxu0 %v9289_v34  ;;  %v9321_v34 = vor.u32 %v10512_v35, %v9320_v29  ;;  %v9546_v29 = vld [vmem:[#allocation8 + $0xed0] sm:$0xf0] }
 0x377   :  { %5161 = vmatpush.bf16.msra.mxu3 %v9137_v50  ;;  %5193 = vmatpush.bf16.msrb.mxu1 %v8821_v38  ;;  %v9240_v50 = vld [vmem:[#allocation8 + $0xc60] sm:$0xf]  ;;  %v10492_v38 = vld [vmem:[#allocation8 + $0xc6c] sm:$0xf0] }
 0x378   :  { %5203 = vmatpush.bf16.msrb.mxu2 %v9013_v41  ;;  %v9432_v41 = vld [vmem:[#allocation8 + $0xde0] sm:$0xf]  ;;  %v9241_v11 = vor.u32 %v10492_v38, %v9240_v50  ;;  %v9434_v50 = vld [vmem:[#allocation8 + $0xdf0] sm:$0xf0] }
 0x379   :  { %v9433_v53 = vor.u32 %v10540_v52, %v9432_v41  ;;  %v9496_v41 = vld [vmem:[#allocation8 + $0xe60] sm:$0xf] }
 0x37a   :  { %5110 = vmatmul.bf16.vlgmr.msrb.gmra.mxu3 %v11197_v16  ;;  %5194 = vmatmul.bf16.vlgmr.msrb.gmra.mxu1 %v11185_v4  ;;  %v8949_v4 = vor.u32 %v10415_v5, %v8946_v44  ;;  %v9306_v5 = vld [vmem:[#allocation8 + $0xcf0] sm:$0xf0] }
 0x37b   :  { %5162 = vmatpush.bf16.msra.mxu3 %v9121_v54  ;;  %6022 = vmatpush.bf16.msra.mxu0 %v9273_v0  ;;  %v9416_v54 = vld [vmem:[#allocation8 + $0xdc0] sm:$0xf]  ;;  %v9309_v6 = vor.u32 %v10506_v2, %v9306_v5  ;;  %v9242_v0 = vld [vmem:[#allocation8 + $0xc70] sm:$0xf0]  ;;  %v10548_v2 = vld [vmem:[#allocation8 + $0xe2c] sm:$0xf0] }
 0x37c   :  { %5204 = vmatpush.bf16.msrb.mxu2 %v8997_v55  ;;  %6034 = vmatpush.bf16.msra.mxu1 %v9433_v53  ;;  %v9417_v1 = vor.u32 %v10536_v56, %v9416_v54  ;;  %v9245_v46 = vor.u32 %v10490_v40, %v9242_v0  ;;  %v10486_v53 = vld [vmem:[#allocation8 + $0xc44] sm:$0xf]  ;;  %v10596_v40 = vld [vmem:[#allocation8 + $0xfac] sm:$0xf0] }
 0x37d   :  { %v9657_v0 = vor.u32 %v10596_v40, %v9656_v37  ;;  %v10542_v37 = vld [vmem:[#allocation8 + $0xe04] sm:$0xf]  ;;  %v9450_v40 = vld [vmem:[#allocation8 + $0xe10] sm:$0xf0] }
 0x37f   :  { %5163 = vmatpush.bf16.msra.mxu3 %v9105_v61  ;;  %6023 = vmatpush.bf16.msra.mxu0 %v9257_v57  ;;  %v9400_v61 = vld [vmem:[#allocation8 + $0xda0] sm:$0xf]  ;;  %v10538_v57 = vld [vmem:[#allocation8 + $0xde4] sm:$0xf] }
 0x380   :  { %5205 = vmatpush.bf16.msrb.mxu2 %v8981_v3  ;;  %v9209_v3 = vor.u32 %v10484_v62, %v9208_v32  ;;  %6035 = vmatpush.bf16.msra.mxu1 %v9417_v1  ;;  %v9401_v42 = vor.u32 %v10532_v58, %v9400_v61  ;;  %v9437_v38 = vor.u32 %v10538_v57, %v9434_v50  ;;  %v9480_v1 = vld [vmem:[#allocation8 + $0xe40] sm:$0xf]  ;;  %v10552_v32 = vld [vmem:[#allocation8 + $0xe4c] sm:$0xf0]  ;;  %v10482_v61 = vld [vmem:[#allocation8 + $0xc24] sm:$0xf] }
 0x381   :  { %v9481_v62 = vor.u32 %v10552_v32, %v9480_v1  ;;  %v10530_v58 = vld [vmem:[#allocation8 + $0xda4] sm:$0xf] }
 0x382   :  { %v10562_v57 = vld [vmem:[#allocation8 + $0xea4] sm:$0xf] }
 0x383   :  { %5164 = vmatpush.bf16.msra.mxu3 %v9089_v63  ;;  %6024 = vmatpush.bf16.msra.mxu0 %v9241_v11  ;;  %v9384_v63 = vld [vmem:[#allocation8 + $0xd80] sm:$0xf]  ;;  %v10556_v11 = vld [vmem:[#allocation8 + $0xe6c] sm:$0xf0] }
 0x384   :  { %5206 = vmatpush.bf16.msrb.mxu2 %v8965_v10  ;;  %6036 = vmatpush.bf16.msra.mxu1 %v9401_v42  ;;  %v9193_v10 = vor.u32 %v10480_v60, %v9192_v17  ;;  %v9385_v44 = vor.u32 %v10528_v18, %v9384_v63  ;;  %v9497_v52 = vor.u32 %v10556_v11, %v9496_v41  ;;  %v9402_v60 = vld [vmem:[#allocation8 + $0xdb0] sm:$0xf0]  ;;  %v9464_v18 = vld [vmem:[#allocation8 + $0xe20] sm:$0xf] }
 0x385   :  { %v9405_v63 = vor.u32 %v10530_v58, %v9402_v60  ;;  %v9465_v5 = vor.u32 %v10548_v2, %v9464_v18  ;;  %v9624_v60 = vld [vmem:[#allocation8 + $0xf60] sm:$0xf] }
 0x387   :  { %5165 = vmatpush.bf16.msra.mxu3 %v9073_v7  ;;  %v10524_v7 = vld [vmem:[#allocation8 + $0xd6c] sm:$0xf0] }
 0x388   :  { %5207 = vmatpush.bf16.msrb.mxu2 %v8949_v4  ;;  %6037 = vmatpush.bf16.msra.mxu1 %v9385_v44  ;;  %v9560_v4 = vld [vmem:[#allocation8 + $0xee0] sm:$0xf]  ;;  %v10478_v44 = vld [vmem:[#allocation8 + $0xc04] sm:$0xf] }
 0x389   :  { %v9561_v12 = vor.u32 %v10572_v8, %v9560_v4 }
 0x38a   :  { %5166 = vmatmul.bf16.vlgmr.msra.gmra.mxu3 %v11197_v16 }
 0x38b   :  { %5214 = vmatpush.bf16.msrb.mxu3 %v9189_v59  ;;  %5208 = vmatmul.bf16.vlgmr.msrb.gmra.mxu2 %v11189_v30  ;;  %v9074_v30 = vld [vmem:[#allocation8 + $0xb18] sm:$0xf0]  ;;  %v9369_v59 = vor.u32 %v10524_v7, %v9368_v43  ;;  %v10526_v43 = vld [vmem:[#allocation8 + $0xd84] sm:$0xf] }
 0x38c   :  { %v9077_v33 = vor.u32 %v10447_v25, %v9074_v30  ;;  %6048 = vmatpush.bf16.msra.mxu2 %v9561_v12  ;;  %v10564_v25 = vld [vmem:[#allocation8 + $0xeac] sm:$0xf0]  ;;  %v10494_v30 = vld [vmem:[#allocation8 + $0xc84] sm:$0xf]  ;;  %v9688_v12 = vld [vmem:[#allocation8 + $0xfe0] sm:$0xf] }
 0x38d   :  { %6038 = vmatpush.bf16.msra.mxu1 %v9369_v59  ;;  %v9529_v26 = vor.u32 %v10564_v25, %v9528_v23  ;;  %v9386_v59 = vld [vmem:[#allocation8 + $0xd90] sm:$0xf0]  ;;  %v10600_v23 = vld [vmem:[#allocation8 + $0xfcc] sm:$0xf0]  ;;  %v10518_v25 = vld [vmem:[#allocation8 + $0xd44] sm:$0xf] }
 0x38e   :  { %v9389_v8 = vor.u32 %v10526_v43, %v9386_v59 }
 0x38f   :  { %5215 = vmatpush.bf16.msrb.mxu3 %v9173_v47  ;;  %v9290_v47 = vld [vmem:[#allocation8 + $0xcd0] sm:$0xf0] }
 0x390   :  { %v9293_v13 = vor.u32 %v10502_v28, %v9290_v47  ;;  %6049 = vmatpush.bf16.msra.mxu2 %v9545_v22  ;;  %v9448_v28 = vld [vmem:[#allocation8 + $0xe00] sm:$0xf]  ;;  %v10544_v47 = vld [vmem:[#allocation8 + $0xe0c] sm:$0xf0] }
 0x393   :  { %5216 = vmatpush.bf16.msrb.mxu3 %v9157_v15  ;;  %v9352_v15 = vld [vmem:[#allocation8 + $0xd40] sm:$0xf] }
 0x394   :  { %6050 = vmatpush.bf16.msra.mxu2 %v9529_v26 }
 0x397   :  { %5217 = vmatpush.bf16.msrb.mxu3 %v9141_v48  ;;  %v9353_v48 = vor.u32 %v10520_v31, %v9352_v15  ;;  %v10604_v15 = vld [vmem:[#allocation8 + $0xfec] sm:$0xf0]  ;;  %v10522_v31 = vld [vmem:[#allocation8 + $0xd64] sm:$0xf] }
 0x398   :  { %6051 = vmatpush.bf16.msra.mxu2 %v9513_v49  ;;  %v9373_v45 = vor.u32 %v10522_v31, %v9370_v20  ;;  %v10514_v49 = vld [vmem:[#allocation8 + $0xd24] sm:$0xf] }
 0x399   :  { %6039 = vmatpush.bf16.msra.mxu1 %v9353_v48  ;;  %v9689_v48 = vor.u32 %v10604_v15, %v9688_v12  ;;  %v10550_v12 = vld [vmem:[#allocation8 + $0xe44] sm:$0xf] }
 0x39b   :  { %5218 = vmatpush.bf16.msrb.mxu3 %v9125_v14  ;;  %v9274_v14 = vld [vmem:[#allocation8 + $0xcb0] sm:$0xf0] }
 0x39c   :  { %v9277_v9 = vor.u32 %v10498_v21, %v9274_v14  ;;  %6052 = vmatpush.bf16.msra.mxu2 %v9497_v52  ;;  %v10570_v21 = vld [vmem:[#allocation8 + $0xee4] sm:$0xf]  ;;  %v9562_v14 = vld [vmem:[#allocation8 + $0xef0] sm:$0xf0] }
 0x39d   :  { %v9565_v22 = vor.u32 %v10570_v21, %v9562_v14  ;;  %v10546_v14 = vld [vmem:[#allocation8 + $0xe24] sm:$0xf] }
 0x39f   :  { %5219 = vmatpush.bf16.msrb.mxu3 %v9109_v39  ;;  %v9336_v39 = vld [vmem:[#allocation8 + $0xd20] sm:$0xf] }
 0x3a0   :  { %6053 = vmatpush.bf16.msra.mxu2 %v9481_v62 }
 0x3a3   :  { %5220 = vmatpush.bf16.msrb.mxu3 %v9093_v24  ;;  %v9337_v24 = vor.u32 %v10516_v19, %v9336_v39  ;;  %v9672_v19 = vld [vmem:[#allocation8 + $0xfc0] sm:$0xf] }
 0x3a4   :  { %6054 = vmatpush.bf16.msra.mxu2 %v9465_v5  ;;  %v10554_v5 = vld [vmem:[#allocation8 + $0xe64] sm:$0xf] }
 0x3a5   :  { %6040 = vmatpush.bf16.msra.mxu1 %v9337_v24  ;;  %v9673_v24 = vor.u32 %v10600_v23, %v9672_v19  ;;  %v9312_v19 = vld [vmem:[#allocation8 + $0xce8] sm:$0xf]  ;;  %v10509_v23 = vld [vmem:[#allocation8 + $0xcf4] sm:$0xf0] }
 0x3a7   :  { %5221 = vmatpush.bf16.msrb.mxu3 %v9077_v33  ;;  %v9258_v33 = vld [vmem:[#allocation8 + $0xc90] sm:$0xf0]  ;;  %v11207_v42 = vpop.f32.mrf.mxu0 }
 0x3a8   :  { %v9261_v27 = vor.u32 %v10494_v30, %v9258_v33  ;;  %v9354_v30 = vld [vmem:[#allocation8 + $0xd50] sm:$0xf0]  ;;  %v10566_v33 = vld [vmem:[#allocation8 + $0xec4] sm:$0xf] }
 0x3a9   :  { %6041 = vmatpush.bf16.msra.mxu1 %v9321_v34  ;;  %v9549_v35 = vor.u32 %v10566_v33, %v9546_v29  ;;  %v10576_v29 = vld [vmem:[#allocation8 + $0xf0c] sm:$0xf0] }
 0x3aa   :  { %5222 = vmatmul.bf16.vlgmr.msrb.gmra.mxu3 %v11197_v16  ;;  %v9224_v16 = vld [vmem:[#allocation8 + $0xc40] sm:$0xf] }
 0x3ab   :  { %v9225_v55 = vor.u32 %v10488_v36, %v9224_v16  ;;  %v9226_v16 = vld [vmem:[#allocation8 + $0xc50] sm:$0xf0]  ;;  %v10534_v36 = vld [vmem:[#allocation8 + $0xdc4] sm:$0xf]  ;;  %6062 = vmatpush.bf16.msra.mxu3 %v9689_v48  ;;  %v9592_v48 = vld [vmem:[#allocation8 + $0xf20] sm:$0xf] }
 0x3ac   :  { %v9229_v54 = vor.u32 %v10486_v53, %v9226_v16  ;;  %v9640_v53 = vld [vmem:[#allocation8 + $0xf80] sm:$0xf]  ;;  %v10592_v16 = vld [vmem:[#allocation8 + $0xf8c] sm:$0xf0] }
 0x3ad   :  { %6025 = vmatpush.bf16.msra.mxu0 %v9225_v55  ;;  %6090 = vmatpush.bf16.msrb.mxu1 %v9437_v38  ;;  %v9418_v55 = vld [vmem:[#allocation8 + $0xdd0] sm:$0xf0] }
 0x3ae   :  { %v9421_v56 = vor.u32 %v10534_v36, %v9418_v55  ;;  %v9530_v38 = vld [vmem:[#allocation8 + $0xeb0] sm:$0xf0]  ;;  %v9641_v36 = vor.u32 %v10592_v16, %v9640_v53 }
 0x3af   :  { %v5015_v39 = vpop.f32.mrf.mxu0  ;;  %6063 = vmatpush.bf16.msra.mxu3 %v9673_v24  ;;  %v9533_v41 = vor.u32 %v10562_v57, %v9530_v38  ;;  %v9322_v55 = vld [vmem:[#allocation8 + $0xd10] sm:$0xf0]  ;;  %v9296_v57 = vld [vmem:[#allocation8 + $0xcc8] sm:$0xf]  ;;  %v9453_v38 = vor.u32 %v10542_v37, %v9450_v40 }
 0x3b0   :  { %v9216_v40 = vld [vmem:[#allocation8 + $0xc28] sm:$0xf] }
 0x3b1   :  { %6026 = vmatpush.bf16.msra.mxu0 %v9209_v3  ;;  %6091 = vmatpush.bf16.msrb.mxu1 %v9421_v56  ;;  %v9210_v3 = vld [vmem:[#allocation8 + $0xc30] sm:$0xf0]  ;;  %v10558_v56 = vld [vmem:[#allocation8 + $0xe84] sm:$0xf] }
 0x3b2   :  { %v9213_v17 = vor.u32 %v10482_v61, %v9210_v3  ;;  %v9514_v61 = vld [vmem:[#allocation8 + $0xe90] sm:$0xf0] }
 0x3b3   :  { %6064 = vmatpush.bf16.msra.mxu3 %v9657_v0  ;;  %v9517_v58 = vor.u32 %v10558_v56, %v9514_v61  ;;  %v10602_v0 = vld [vmem:[#allocation8 + $0xfe4] sm:$0xf] }
 0x3b5   :  { %6027 = vmatpush.bf16.msra.mxu0 %v9193_v10  ;;  %6092 = vmatpush.bf16.msrb.mxu1 %v9405_v63  ;;  %v10588_v63 = vld [vmem:[#allocation8 + $0xf6c] sm:$0xf0] }
 0x3b6   :  { %v9625_v2 = vor.u32 %v10588_v63, %v9624_v60  ;;  %v9264_v63 = vld [vmem:[#allocation8 + $0xc88] sm:$0xf] }
 0x3b7   :  { %v11209_v10 = vpop.f32.mrf.mxu1  ;;  %v5069_v32 = vpop.f32.mrf.mxu0  ;;  %6065 = vmatpush.bf16.msra.mxu3 %v9641_v36 }
 0x3b9   :  { %6076 = vmatpush.bf16.msrb.mxu0 %v9309_v6  ;;  %v9194_v6 = vld [vmem:[#allocation8 + $0xc10] sm:$0xf0]  ;;  %6093 = vmatpush.bf16.msrb.mxu1 %v9389_v8  ;;  %v9608_v8 = vld [vmem:[#allocation8 + $0xf40] sm:$0xf] }
 0x3ba   :  { %v9197_v4 = vor.u32 %v10478_v44, %v9194_v6  ;;  %v9498_v44 = vld [vmem:[#allocation8 + $0xe70] sm:$0xf0] }
 0x3bb   :  { %6066 = vmatpush.bf16.msra.mxu3 %v9625_v2  ;;  %v10497_v2 = vld [vmem:[#allocation8 + $0xc94] sm:$0xf0] }
 0x3bd   :  { %6077 = vmatpush.bf16.msrb.mxu0 %v9293_v13  ;;  %v9449_v13 = vor.u32 %v10544_v47, %v9448_v28  ;;  %6094 = vmatpush.bf16.msrb.mxu1 %v9373_v45  ;;  %v10584_v28 = vld [vmem:[#allocation8 + $0xf4c] sm:$0xf0] }
 0x3be   :  { %v10580_v45 = vld [vmem:[#allocation8 + $0xf2c] sm:$0xf0] }
 0x3bf   :  { %6055 = vmatpush.bf16.msra.mxu2 %v9449_v13  ;;  %v5029_v26 = vpop.f32.mrf.mxu1  ;;  %v9482_v13 = vld [vmem:[#allocation8 + $0xe50] sm:$0xf0]  ;;  %v5071_v20 = vpop.f32.mrf.mxu0  ;;  %v9593_v21 = vor.u32 %v10580_v45, %v9592_v48 }
 0x3c0   :  { %v9485_v15 = vor.u32 %v10550_v12, %v9482_v13 }
 0x3c1   :  { %6078 = vmatpush.bf16.msrb.mxu0 %v9277_v9  ;;  %v11213_v9 = vld [vmem:[#allocation10 + $0x8] sm:$0xf] }
 0x3c2   :  { %v4356_v51 = vperm.slane %v11213_v9, 0  ;;  %v4357_v31 = vperm.slane %v11213_v9, 1 }
 0x3c3   :  { %6104 = vmatpush.bf16.msrb.mxu2 %v9565_v22  ;;  %v9466_v22 = vld [vmem:[#allocation8 + $0xe30] sm:$0xf0] }
 0x3c4   :  { %v5014_v11 = vadd.f32 %v11207_v42, %v4356_v51  ;;  %v5016_v3 = vadd.f32 %v5015_v39, %v4356_v51  ;;  %v9469_v24 = vor.u32 %v10546_v14, %v9466_v22  ;;  %v9313_v51 = vor.u32 %v10509_v23, %v9312_v19  ;;  %v9232_v14 = vld [vmem:[#allocation8 + $0xc48] sm:$0xf]  ;;  %v10489_v22 = vld [vmem:[#allocation8 + $0xc54] sm:$0xf0] }
 0x3c5   :  { %6079 = vmatpush.bf16.msrb.mxu0 %v9261_v27  ;;  %v9357_v27 = vor.u32 %v10518_v25, %v9354_v30  ;;  %v5070_v30 = vadd.f32 %v5069_v32, %v4357_v31  ;;  %v10598_v32 = vld [vmem:[#allocation8 + $0xfc4] sm:$0xf] }
 0x3c6   :  { %v5028_v1 = vadd.f32 %v11209_v10, %v5014_v11  ;;  %v5030_v18 = vadd.f32 %v5029_v26, %v5016_v3  ;;  %v9501_v10 = vor.u32 %v10554_v5, %v9498_v44  ;;  %v5072_v11 = vadd.f32 %v5071_v20, %v4357_v31  ;;  %v10594_v5 = vld [vmem:[#allocation8 + $0xfa4] sm:$0xf]  ;;  %v9658_v44 = vld [vmem:[#allocation8 + $0xfb0] sm:$0xf0] }
 0x3c7   :  { %6095 = vmatpush.bf16.msrb.mxu1 %v9357_v27  ;;  %6105 = vmatpush.bf16.msrb.mxu2 %v9549_v35  ;;  %v9576_v27 = vld [vmem:[#allocation8 + $0xf00] sm:$0xf] }
 0x3c9   :  { %6080 = vmatpush.bf16.msrb.mxu0 %v9245_v46  ;;  %v9338_v46 = vld [vmem:[#allocation8 + $0xd30] sm:$0xf0] }
 0x3ca   :  { %v9341_v50 = vor.u32 %v10514_v49, %v9338_v46 }
 0x3cb   :  { %6106 = vmatpush.bf16.msrb.mxu2 %v9533_v41  ;;  %v9690_v41 = vld [vmem:[#allocation8 + $0xff0] sm:$0xf0] }
 0x3cc   :  { %6096 = vmatpush.bf16.msrb.mxu1 %v9341_v50  ;;  %v10505_v50 = vld [vmem:[#allocation8 + $0xcd4] sm:$0xf0] }
 0x3cd   :  { %6081 = vmatpush.bf16.msrb.mxu0 %v9229_v54  ;;  %v11211_v7 = vpop.f32.mrf.mxu2  ;;  %v10510_v54 = vld [vmem:[#allocation8 + $0xd04] sm:$0xf]  ;;  %v9297_v36 = vor.u32 %v10505_v50, %v9296_v57  ;;  %v10533_v50 = vld [vmem:[#allocation8 + $0xdb4] sm:$0xf0] }
 0x3ce   :  { %v9325_v62 = vor.u32 %v10510_v54, %v9322_v55  ;;  %v5042_v42 = vadd.f32 %v11211_v7, %v5028_v1  ;;  %v9609_v7 = vor.u32 %v10584_v28, %v9608_v8  ;;  %v9280_v54 = vld [vmem:[#allocation8 + $0xca8] sm:$0xf]  ;;  %v5125_v55 = vpop.f32.mrf.mxu0  ;;  %v10501_v1 = vld [vmem:[#allocation8 + $0xcb4] sm:$0xf0] }
 0x3cf   :  { %6107 = vmatpush.bf16.msrb.mxu2 %v9517_v58  ;;  %v9281_v60 = vor.u32 %v10501_v1, %v9280_v54  ;;  %v9440_v8 = vld [vmem:[#allocation8 + $0xde8] sm:$0xf]  ;;  %v10541_v28 = vld [vmem:[#allocation8 + $0xdf4] sm:$0xf0] }
 0x3d0   :  { %6097 = vmatpush.bf16.msrb.mxu1 %v9325_v62  ;;  %6067 = vmatpush.bf16.msra.mxu3 %v9609_v7  ;;  %v9674_v62 = vld [vmem:[#allocation8 + $0xfd0] sm:$0xf0]  ;;  %v9392_v1 = vld [vmem:[#allocation8 + $0xd88] sm:$0xf] }
 0x3d1   :  { %6082 = vmatpush.bf16.msrb.mxu0 %v9213_v17  ;;  %v5083_v17 = vpop.f32.mrf.mxu1  ;;  %v9677_v3 = vor.u32 %v10598_v32, %v9674_v62  ;;  %v9642_v7 = vld [vmem:[#allocation8 + $0xf90] sm:$0xf0]  ;;  %v10529_v32 = vld [vmem:[#allocation8 + $0xd94] sm:$0xf0]  ;;  %v10578_v62 = vld [vmem:[#allocation8 + $0xf24] sm:$0xf] }
 0x3d2   :  { %v5084_v49 = vadd.f32 %v5083_v17, %v5070_v30  ;;  %v10586_v30 = vld [vmem:[#allocation8 + $0xf64] sm:$0xf] }
 0x3d3   :  { %6108 = vmatpush.bf16.msrb.mxu2 %v9501_v10  ;;  %v9265_v10 = vor.u32 %v10497_v2, %v9264_v63  ;;  %v9376_v63 = vld [vmem:[#allocation8 + $0xd68] sm:$0xf] }
 0x3d4   :  { %6068 = vmatpush.bf16.msra.mxu3 %v9593_v21  ;;  %v9441_v21 = vor.u32 %v10541_v28, %v9440_v8 }
 0x3d5   :  { %6083 = vmatpush.bf16.msrb.mxu0 %v9197_v4  ;;  %v5043_v34 = vpop.f32.mrf.mxu2 }
 0x3d6   :  { %v5044_v4 = vadd.f32 %v5043_v34, %v5030_v18  ;;  %v9577_v34 = vor.u32 %v10576_v29, %v9576_v27  ;;  %v5127_v31 = vpop.f32.mrf.mxu0 }
 0x3d7   :  { %6109 = vmatpush.bf16.msrb.mxu2 %v9485_v15 }
 0x3d8   :  { %6069 = vmatpush.bf16.msra.mxu3 %v9577_v34  ;;  %v9233_v34 = vor.u32 %v10489_v22, %v9232_v14  ;;  %v9282_v14 = vld [vmem:[#allocation8 + $0xcb8] sm:$0xf0] }
 0x3d9   :  { %v5085_v39 = vpop.f32.mrf.mxu1 }
 0x3da   :  { %v5086_v16 = vadd.f32 %v5085_v39, %v5072_v11  ;;  %v9424_v39 = vld [vmem:[#allocation8 + $0xdc8] sm:$0xf] }
 0x3db   :  { %6110 = vmatpush.bf16.msrb.mxu2 %v9469_v24 }
 0x3dd   :  { %v5097_v6 = vpop.f32.mrf.mxu2 }
 0x3de   :  { %v5098_v53 = vadd.f32 %v5097_v6, %v5084_v49  ;;  %v9661_v6 = vor.u32 %v10594_v5, %v9658_v44  ;;  %v9408_v49 = vld [vmem:[#allocation8 + $0xda8] sm:$0xf]  ;;  %v10574_v44 = vld [vmem:[#allocation8 + $0xf04] sm:$0xf] }
 0x3df   :  { %6111 = vmatpush.bf16.msrb.mxu2 %v9453_v38  ;;  %v10582_v38 = vld [vmem:[#allocation8 + $0xf44] sm:$0xf]  ;;  %v9409_v54 = vor.u32 %v10533_v50, %v9408_v49  ;;  %v9568_v5 = vld [vmem:[#allocation8 + $0xee8] sm:$0xf]  ;;  %v10513_v49 = vld [vmem:[#allocation8 + $0xd14] sm:$0xf0] }
 0x3e0   :  { %v10561_v50 = vld [vmem:[#allocation8 + $0xe94] sm:$0xf0] }
 0x3e1   :  { %v5139_v58 = vpop.f32.mrf.mxu1 }
 0x3e5   :  { %v5099_v33 = vpop.f32.mrf.mxu2 }
 0x3e6   :  { %v5100_v61 = vadd.f32 %v5099_v33, %v5086_v16  ;;  %v9626_v33 = vld [vmem:[#allocation8 + $0xf70] sm:$0xf0] }
 0x3e7   :  { %v9629_v27 = vor.u32 %v10586_v30, %v9626_v33  ;;  %v10517_v30 = vld [vmem:[#allocation8 + $0xd34] sm:$0xf0]  ;;  %v9536_v33 = vld [vmem:[#allocation8 + $0xea8] sm:$0xf] }
 0x3e9   :  { %v5141_v23 = vpop.f32.mrf.mxu1 }
 0x3ed   :  { %v5055_v52 = vpop.f32.mrf.mxu3 }
 0x3ee   :  { %v5056_v43 = vadd.f32 %v5055_v52, %v5042_v42  ;;  %v9693_v52 = vor.u32 %v10602_v0, %v9690_v41  ;;  %v10485_v0 = vld [vmem:[#allocation8 + $0xc34] sm:$0xf0]  ;;  %v9610_v41 = vld [vmem:[#allocation8 + $0xf50] sm:$0xf0] }
 0x3f0   :  { %10690 = vtanh.f32 %v5056_v43  ;;  %6118 = vmatpush.bf16.msrb.mxu3 %v9693_v52  ;;  %v5153_v18 = vpop.f32.mrf.mxu2  ;;  %v4358_v43 = vperm.slane %v11213_v9, 2  ;;  %v9613_v52 = vor.u32 %v10582_v38, %v9610_v41  ;;  %v10491_v38 = vld [vmem:[#allocation8 + $0xc6c] sm:$0xf]  ;;  %v9250_v41 = vld [vmem:[#allocation8 + $0xc78] sm:$0xf0] }
 0x3f2   :  { %v5126_v15 = vadd.f32 %v5125_v55, %v4358_v43  ;;  %v9200_v55 = vld [vmem:[#allocation8 + $0xc08] sm:$0xf] }
 0x3f4   :  { %6119 = vmatpush.bf16.msrb.mxu3 %v9677_v3  ;;  %v5140_v19 = vadd.f32 %v5139_v58, %v5126_v15  ;;  %v10507_v3 = vld [vmem:[#allocation8 + $0xcec] sm:$0xf]  ;;  %v9314_v58 = vld [vmem:[#allocation8 + $0xcf8] sm:$0xf0]  ;;  %v9360_v15 = vld [vmem:[#allocation8 + $0xd48] sm:$0xf] }
 0x3f5   :  { %v5057_v59 = vpop.f32.mrf.mxu3  ;;  %v9317_v2 = vor.u32 %v10507_v3, %v9314_v58  ;;  %v10487_v3 = vld [vmem:[#allocation8 + $0xc4c] sm:$0xf]  ;;  %v9234_v58 = vld [vmem:[#allocation8 + $0xc58] sm:$0xf0] }
 0x3f6   :  { %v5058_v47 = vadd.f32 %v5057_v59, %v5044_v4  ;;  %v10691_v25 = vpop.eup %10690  ;;  %v9248_v4 = vld [vmem:[#allocation8 + $0xc68] sm:$0xf]  ;;  %v10493_v59 = vld [vmem:[#allocation8 + $0xc74] sm:$0xf0]  ;;  %v5154_v29 = vadd.f32 %v5153_v18, %v5140_v19 }
 0x3f7   :  { %v9249_v45 = vor.u32 %v10493_v59, %v9248_v4  ;;  %v10525_v18 = vld [vmem:[#allocation8 + $0xd74] sm:$0xf0]  ;;  %v9298_v4 = vld [vmem:[#allocation8 + $0xcd8] sm:$0xf0]  ;;  %v5195_v22 = vpop.f32.mrf.mxu1 }
 0x3f8   :  { %10692 = vtanh.f32 %v5058_v47  ;;  %6120 = vmatpush.bf16.msrb.mxu3 %v9661_v6  ;;  %v10590_v47 = vld [vmem:[#allocation8 + $0xf84] sm:$0xf]  ;;  %v9578_v6 = vld [vmem:[#allocation8 + $0xf10] sm:$0xf0] }
 0x3f9   :  { %v9645_v12 = vor.u32 %v10590_v47, %v9642_v7  ;;  %v9581_v59 = vor.u32 %v10574_v44, %v9578_v6  ;;  %v9377_v47 = vor.u32 %v10525_v18, %v9376_v63  ;;  %v9237_v44 = vor.u32 %v10487_v3, %v9234_v58  ;;  %v9488_v6 = vld [vmem:[#allocation8 + $0xe48] sm:$0xf]  ;;  %v10563_v3 = vld [vmem:[#allocation8 + $0xeac] sm:$0xf]  ;;  %v9538_v58 = vld [vmem:[#allocation8 + $0xeb8] sm:$0xf0] }
 0x3fc   :  { %6121 = vmatpush.bf16.msrb.mxu3 %v9645_v12 }
 0x3fd   :  { %v5111_v26 = vpop.f32.mrf.mxu3 }
 0x3fe   :  { %v10693_v35 = vpop.eup %10692  ;;  %v5112_v56 = vadd.f32 %v5111_v26, %v5098_v53  ;;  %v5128_v26 = vadd.f32 %v5127_v31, %v4358_v43  ;;  %v10573_v43 = vld [vmem:[#allocation8 + $0xef4] sm:$0xf0] }
 0x3ff   :  { %v11220_v46 = vpack.c.bf16 %v10693_v35, %v10691_v25  ;;  %v10537_v25 = vld [vmem:[#allocation8 + $0xdd4] sm:$0xf0]  ;;  %v5155_v35 = vpop.f32.mrf.mxu2  ;;  %v9569_v12 = vor.u32 %v10573_v43, %v9568_v5 }
 0x400   :  { %10694 = vtanh.f32 %v5112_v56  ;;  %v9425_v37 = vor.u32 %v10537_v25, %v9424_v39  ;;  %6122 = vmatpush.bf16.msrb.mxu3 %v9629_v27  ;;  %v10481_v56 = vld [vmem:[#allocation8 + $0xc14] sm:$0xf0]  ;;  %v9344_v25 = vld [vmem:[#allocation8 + $0xd28] sm:$0xf] }
 0x401   :  { %6028 = vmatmul.bf16.vlgmr.msra.gmra.mxu0 %v11220_v46  ;;  %v10521_v31 = vld [vmem:[#allocation8 + $0xd54] sm:$0xf0] }
 0x402   :  { %6132 = vmatpush.bf16.msra.mxu0 %v9313_v51  ;;  %v5142_v51 = vadd.f32 %v5141_v23, %v5128_v26  ;;  %v9361_v39 = vor.u32 %v10521_v31, %v9360_v15  ;;  %v10565_v27 = vld [vmem:[#allocation8 + $0xeb4] sm:$0xf0] }
 0x404   :  { %v5156_v11 = vadd.f32 %v5155_v35, %v5142_v51  ;;  %6123 = vmatpush.bf16.msrb.mxu3 %v9613_v52  ;;  %v9266_v35 = vld [vmem:[#allocation8 + $0xc98] sm:$0xf0]  ;;  %v4359_v51 = vperm.slane %v11213_v9, 3 }
 0x405   :  { %v5113_v17 = vpop.f32.mrf.mxu3  ;;  %v9442_v52 = vld [vmem:[#allocation8 + $0xdf8] sm:$0xf0] }
 0x406   :  { %v5114_v42 = vadd.f32 %v5113_v17, %v5100_v61  ;;  %6133 = vmatpush.bf16.msra.mxu0 %v9297_v36  ;;  %v10695_v13 = vpop.eup %10694  ;;  %v9217_v36 = vor.u32 %v10485_v0, %v9216_v40  ;;  %v9594_v61 = vld [vmem:[#allocation8 + $0xf30] sm:$0xf0]  ;;  %v9328_v0 = vld [vmem:[#allocation8 + $0xd08] sm:$0xf] }
 0x407   :  { %v9597_v17 = vor.u32 %v10578_v62, %v9594_v61  ;;  %v10557_v61 = vld [vmem:[#allocation8 + $0xe74] sm:$0xf0] }
 0x408   :  { %10696 = vtanh.f32 %v5114_v42  ;;  %v9201_v42 = vor.u32 %v10481_v56, %v9200_v55  ;;  %v9253_v55 = vor.u32 %v10491_v38, %v9250_v41  ;;  %v9504_v56 = vld [vmem:[#allocation8 + $0xe68] sm:$0xf] }
 0x409   :  { %6124 = vmatpush.bf16.msrb.mxu3 %v9597_v17  ;;  %v9505_v5 = vor.u32 %v10557_v61, %v9504_v56  ;;  %v9346_v61 = vld [vmem:[#allocation8 + $0xd38] sm:$0xf0] }
 0x40a   :  { %6134 = vmatpush.bf16.msra.mxu0 %v9281_v60  ;;  %v9393_v60 = vor.u32 %v10529_v32, %v9392_v1  ;;  %v5197_v32 = vpop.f32.mrf.mxu1 }
 0x40d   :  { %v5167_v20 = vpop.f32.mrf.mxu3  ;;  %6125 = vmatpush.bf16.msrb.mxu3 %v9581_v59  ;;  %v10483_v59 = vld [vmem:[#allocation8 + $0xc2c] sm:$0xf] }
 0x40e   :  { %v10697_v48 = vpop.eup %10696  ;;  %6135 = vmatpush.bf16.msra.mxu0 %v9265_v10  ;;  %v5168_v57 = vadd.f32 %v5167_v20, %v5154_v29  ;;  %v10503_v10 = vld [vmem:[#allocation8 + $0xccc] sm:$0xf]  ;;  %v9552_v20 = vld [vmem:[#allocation8 + $0xec8] sm:$0xf]  ;;  %v5209_v26 = vpop.f32.mrf.mxu2 }
 0x40f   :  { %v11224_v24 = vpack.c.bf16 %v10697_v48, %v10695_v13  ;;  %v9301_v13 = vor.u32 %v10503_v10, %v9298_v4  ;;  %v5181_v48 = vpop.f32.mrf.mxu0  ;;  %v10495_v29 = vld [vmem:[#allocation8 + $0xc8c] sm:$0xf]  ;;  %v10553_v4 = vld [vmem:[#allocation8 + $0xe54] sm:$0xf0] }
 0x410   :  { %10698 = vtanh.f32 %v5168_v57  ;;  %v9269_v40 = vor.u32 %v10495_v29, %v9266_v35  ;;  %v9520_v57 = vld [vmem:[#allocation8 + $0xe88] sm:$0xf]  ;;  %v9489_v31 = vor.u32 %v10553_v4, %v9488_v6  ;;  %v10605_v29 = vld [vmem:[#allocation8 + $0xff4] sm:$0xf0]  ;;  %v10523_v35 = vld [vmem:[#allocation8 + $0xd6c] sm:$0xf] }
 0x411   :  { %6042 = vmatmul.bf16.vlgmr.msra.gmra.mxu1 %v11224_v24  ;;  %6084 = vmatmul.bf16.vlgmr.msrb.gmra.mxu0 %v11220_v46  ;;  %v9521_v9 = vor.u32 %v10561_v50, %v9520_v57  ;;  %v9632_v4 = vld [vmem:[#allocation8 + $0xf68] sm:$0xf] }
 0x412   :  { %6136 = vmatpush.bf16.msra.mxu0 %v9249_v45  ;;  %6146 = vmatpush.bf16.msra.mxu1 %v9441_v21  ;;  %v10569_v45 = vld [vmem:[#allocation8 + $0xed4] sm:$0xf0]  ;;  %v10499_v21 = vld [vmem:[#allocation8 + $0xcac] sm:$0xf] }
 0x413   :  { %v9553_v19 = vor.u32 %v10569_v45, %v9552_v20  ;;  %v9285_v23 = vor.u32 %v10499_v21, %v9282_v14  ;;  %v10549_v21 = vld [vmem:[#allocation8 + $0xe34] sm:$0xf0]  ;;  %v10479_v14 = vld [vmem:[#allocation8 + $0xc0c] sm:$0xf] }
 0x415   :  { %v5169_v53 = vpop.f32.mrf.mxu3 }
 0x416   :  { %v5170_v16 = vadd.f32 %v5169_v53, %v5156_v11  ;;  %6137 = vmatpush.bf16.msra.mxu0 %v9233_v34  ;;  %6147 = vmatpush.bf16.msra.mxu1 %v9425_v37  ;;  %v10699_v8 = vpop.eup %10698  ;;  %v9345_v34 = vor.u32 %v10517_v30, %v9344_v25  ;;  %v9537_v37 = vor.u32 %v10565_v27, %v9536_v33  ;;  %v10539_v11 = vld [vmem:[#allocation8 + $0xdec] sm:$0xf]  ;;  %v5211_v18 = vpop.f32.mrf.mxu2  ;;  %v9456_v30 = vld [vmem:[#allocation8 + $0xe08] sm:$0xf]  ;;  %v10545_v33 = vld [vmem:[#allocation8 + $0xe14] sm:$0xf0] }
 0x417   :  { %v5182_v53 = vadd.f32 %v5181_v48, %v4359_v51  ;;  %v9445_v62 = vor.u32 %v10539_v11, %v9442_v52  ;;  %v9472_v48 = vld [vmem:[#allocation8 + $0xe28] sm:$0xf]  ;;  %v10601_v52 = vld [vmem:[#allocation8 + $0xfd4] sm:$0xf0] }
 0x418   :  { %10700 = vtanh.f32 %v5170_v16  ;;  %v5183_v16 = vpop.f32.mrf.mxu0  ;;  %v9696_v27 = vld [vmem:[#allocation8 + $0xfe8] sm:$0xf] }
 0x419   :  { %v5196_v1 = vadd.f32 %v5195_v22, %v5182_v53  ;;  %v5184_v17 = vadd.f32 %v5183_v16, %v4359_v51  ;;  %v9202_v22 = vld [vmem:[#allocation8 + $0xc18] sm:$0xf0]  ;;  %v9697_v57 = vor.u32 %v10605_v29, %v9696_v27  ;;  %v9680_v11 = vld [vmem:[#allocation8 + $0xfc8] sm:$0xf]  ;;  %v10519_v53 = vld [vmem:[#allocation8 + $0xd4c] sm:$0xf] }
 0x41a   :  { %6138 = vmatpush.bf16.msra.mxu0 %v9217_v36  ;;  %6148 = vmatpush.bf16.msra.mxu1 %v9409_v54  ;;  %v9329_v54 = vor.u32 %v10513_v49, %v9328_v0  ;;  %v9205_v25 = vor.u32 %v10479_v14, %v9202_v22  ;;  %v9378_v51 = vld [vmem:[#allocation8 + $0xd78] sm:$0xf0]  ;;  %v9457_v49 = vor.u32 %v10545_v33, %v9456_v30  ;;  %v10581_v14 = vld [vmem:[#allocation8 + $0xf34] sm:$0xf0]  ;;  %v10547_v22 = vld [vmem:[#allocation8 + $0xe2c] sm:$0xf] }
 0x41b   :  { %v5210_v63 = vadd.f32 %v5209_v26, %v5196_v1  ;;  %v9381_v38 = vor.u32 %v10523_v35, %v9378_v51  ;;  %v9362_v16 = vld [vmem:[#allocation8 + $0xd58] sm:$0xf0]  ;;  %v9664_v1 = vld [vmem:[#allocation8 + $0xfa8] sm:$0xf]  ;;  %v10577_v30 = vld [vmem:[#allocation8 + $0xf14] sm:$0xf0] }
 0x41c   :  { %v10543_v33 = vld [vmem:[#allocation8 + $0xe0c] sm:$0xf]  ;;  %v9698_v29 = vld [vmem:[#allocation8 + $0xff8] sm:$0xf0] }
 0x41d   :  { %v10603_v27 = vld [vmem:[#allocation8 + $0xfec] sm:$0xf] }
 0x41e   :  { %v10701_v28 = vpop.eup %10700  ;;  %6139 = vmatpush.bf16.msra.mxu0 %v9201_v42  ;;  %6149 = vmatpush.bf16.msra.mxu1 %v9393_v60  ;;  %v10535_v42 = vld [vmem:[#allocation8 + $0xdcc] sm:$0xf]  ;;  %v9426_v60 = vld [vmem:[#allocation8 + $0xdd8] sm:$0xf0]  ;;  %v9701_v51 = vor.u32 %v10603_v27, %v9698_v29 }
 0x41f   :  { %v11228_v7 = vpack.c.bf16 %v10701_v28, %v10699_v8  ;;  %v9429_v10 = vor.u32 %v10535_v42, %v9426_v60  ;;  %v9218_v8 = vld [vmem:[#allocation8 + $0xc38] sm:$0xf0]  ;;  %v9541_v42 = vor.u32 %v10563_v3, %v9538_v58  ;;  %v9648_v60 = vld [vmem:[#allocation8 + $0xf88] sm:$0xf]  ;;  %v10612_v3 = vld [vmem:[#allocation11 + $0x30] sm:$0xff] }
 0x420   :  { %v9221_v20 = vor.u32 %v10483_v59, %v9218_v8  ;;  %v10589_v59 = vld [vmem:[#allocation8 + $0xf74] sm:$0xf0]  ;;  %v10555_v8 = vld [vmem:[#allocation8 + $0xe6c] sm:$0xf] }
 0x421   :  { %6056 = vmatmul.bf16.vlgmr.msra.gmra.mxu2 %v11228_v7  ;;  %6098 = vmatmul.bf16.vlgmr.msrb.gmra.mxu1 %v11224_v24  ;;  %v10611_v58 = vld [vmem:[#allocation11 + $0x28] sm:$0xff] }
 0x422   :  { %6188 = vmatpush.bf16.msrb.mxu0 %v9317_v2  ;;  %6150 = vmatpush.bf16.msra.mxu1 %v9377_v47  ;;  %v5198_v2 = vadd.f32 %v5197_v32, %v5184_v17  ;;  %v10531_v47 = vld [vmem:[#allocation8 + $0xdac] sm:$0xf]  ;;  %v10597_v32 = vld [vmem:[#allocation8 + $0xfb4] sm:$0xf0] }
 0x423   :  { %6140 = vmatmul.bf16.vlgmr.msra.gmra.mxu0 %v11220_v46  ;;  %6160 = vmatpush.bf16.msra.mxu2 %v9569_v12  ;;  %v9410_v12 = vld [vmem:[#allocation8 + $0xdb8] sm:$0xf0]  ;;  %v9665_v17 = vor.u32 %v10597_v32, %v9664_v1  ;;  %v10575_v32 = vld [vmem:[#allocation8 + $0xf0c] sm:$0xf] }
 0x424   :  { %v5212_v28 = vadd.f32 %v5211_v18, %v5198_v2  ;;  %v9413_v45 = vor.u32 %v10531_v47, %v9410_v12  ;;  %v10511_v18 = vld [vmem:[#allocation8 + $0xd0c] sm:$0xf]  ;;  %v9330_v2 = vld [vmem:[#allocation8 + $0xd18] sm:$0xf0]  ;;  %v9633_v47 = vor.u32 %v10589_v59, %v9632_v4 }
 0x425   :  { %v10629_v4 = vld [vmem:[#allocation11 + $0xb8] sm:$0xff] }
 0x426   :  { %6189 = vmatpush.bf16.msrb.mxu0 %v9301_v13  ;;  %6151 = vmatpush.bf16.msra.mxu1 %v9361_v39  ;;  %v10527_v39 = vld [vmem:[#allocation8 + $0xd8c] sm:$0xf] }
 0x427   :  { %6161 = vmatpush.bf16.msra.mxu2 %v9553_v19  ;;  %v9394_v19 = vld [vmem:[#allocation8 + $0xd98] sm:$0xf0] }
 0x428   :  { %v9397_v26 = vor.u32 %v10527_v39, %v9394_v19  ;;  %v9474_v39 = vld [vmem:[#allocation8 + $0xe38] sm:$0xf0] }
 0x42a   :  { %6190 = vmatpush.bf16.msrb.mxu0 %v9285_v23  ;;  %6152 = vmatpush.bf16.msra.mxu1 %v9345_v34  ;;  %v9473_v23 = vor.u32 %v10549_v21, %v9472_v48  ;;  %v10571_v34 = vld [vmem:[#allocation8 + $0xeec] sm:$0xf]  ;;  %v9600_v21 = vld [vmem:[#allocation8 + $0xf28] sm:$0xf] }
 0x42b   :  { %6162 = vmatpush.bf16.msra.mxu2 %v9537_v37  ;;  %v9570_v37 = vld [vmem:[#allocation8 + $0xef8] sm:$0xf0]  ;;  %v9601_v19 = vor.u32 %v10581_v14, %v9600_v21  ;;  %v10614_v21 = vld [vmem:[#allocation11 + $0x40] sm:$0xff] }
 0x42c   :  { %v9573_v41 = vor.u32 %v10571_v34, %v9570_v37  ;;  %v10599_v34 = vld [vmem:[#allocation8 + $0xfcc] sm:$0xf]  ;;  %v9682_v37 = vld [vmem:[#allocation8 + $0xfd8] sm:$0xf0]  ;;  %v10626_v14 = vld [vmem:[#allocation11 + $0xa0] sm:$0xff] }
 0x42d   :  { %v5223_v36 = vpop.f32.mrf.mxu3 }
 0x42e   :  { %6191 = vmatpush.bf16.msrb.mxu0 %v9269_v40  ;;  %6153 = vmatpush.bf16.msra.mxu1 %v9329_v54  ;;  %v5224_v43 = vadd.f32 %v5223_v36, %v5210_v63  ;;  %v10567_v36 = vld [vmem:[#allocation8 + $0xecc] sm:$0xf]  ;;  %v9554_v54 = vld [vmem:[#allocation8 + $0xed8] sm:$0xf0]  ;;  %v10593_v63 = vld [vmem:[#allocation8 + $0xf94] sm:$0xf0] }
 0x42f   :  { %6163 = vmatpush.bf16.msra.mxu2 %v9521_v9  ;;  %v9681_v9 = vor.u32 %v10601_v52, %v9680_v11  ;;  %v9557_v56 = vor.u32 %v10567_v36, %v9554_v54  ;;  %v9649_v6 = vor.u32 %v10593_v63, %v9648_v60  ;;  %v10587_v52 = vld [vmem:[#allocation8 + $0xf6c] sm:$0xf]  ;;  %v9618_v54 = vld [vmem:[#allocation8 + $0xf58] sm:$0xf0]  ;;  %v10608_v60 = vld [vmem:[#allocation11 + $0x10] sm:$0xff] }
 0x430   :  { %10702 = vtanh.f32 %v5224_v43  ;;  %v9333_v43 = vor.u32 %v10511_v18, %v9330_v2  ;;  %v10583_v36 = vld [vmem:[#allocation8 + $0xf4c] sm:$0xf]  ;;  %v10620_v63 = vld [vmem:[#allocation11 + $0x70] sm:$0xff]  ;;  %v10607_v18 = vld [vmem:[#allocation11 + $0x8] sm:$0xff] }
 0x431   :  { %6112 = vmatmul.bf16.vlgmr.msrb.gmra.mxu2 %v11228_v7  ;;  %6154 = vmatmul.bf16.vlgmr.msra.gmra.mxu1 %v11224_v24  ;;  %v10619_v2 = vld [vmem:[#allocation11 + $0x68] sm:$0xff] }
 0x432   :  { %6192 = vmatpush.bf16.msrb.mxu0 %v9253_v55  ;;  %6202 = vmatpush.bf16.msrb.mxu1 %v9445_v62  ;;  %v9365_v55 = vor.u32 %v10519_v53, %v9362_v16  ;;  %v10515_v62 = vld [vmem:[#allocation8 + $0xd2c] sm:$0xf]  ;;  %v9634_v53 = vld [vmem:[#allocation8 + $0xf78] sm:$0xf0] }
 0x433   :  { %6164 = vmatpush.bf16.msra.mxu2 %v9505_v5  ;;  %v10559_v5 = vld [vmem:[#allocation8 + $0xe8c] sm:$0xf]  ;;  %v9637_v16 = vor.u32 %v10587_v52, %v9634_v53 }
 0x434   :  { %v10637_v52 = vld [vmem:[#allocation11 + $0xf8] sm:$0xff] }
 0x435   :  { %v5225_v13 = vpop.f32.mrf.mxu3 }
 0x436   :  { %v5226_v15 = vadd.f32 %v5225_v13, %v5212_v28  ;;  %6193 = vmatpush.bf16.msrb.mxu0 %v9237_v44  ;;  %6203 = vmatpush.bf16.msrb.mxu1 %v9429_v10  ;;  %v10703_v40 = vpop.eup %10702  ;;  %v9522_v44 = vld [vmem:[#allocation8 + $0xe98] sm:$0xf0]  ;;  %v9616_v13 = vld [vmem:[#allocation8 + $0xf48] sm:$0xf] }
 0x437   :  { %6165 = vmatpush.bf16.msra.mxu2 %v9489_v31  ;;  %v9525_v10 = vor.u32 %v10559_v5, %v9522_v44  ;;  %v9506_v28 = vld [vmem:[#allocation8 + $0xe78] sm:$0xf0]  ;;  %v10551_v31 = vld [vmem:[#allocation8 + $0xe4c] sm:$0xf]  ;;  %v10606_v44 = vld [vmem:[#allocation11] sm:$0xff] }
 0x438   :  { %10704 = vtanh.f32 %v5226_v15  ;;  %v9509_v12 = vor.u32 %v10555_v8, %v9506_v28  ;;  %v10585_v15 = vld [vmem:[#allocation8 + $0xf54] sm:$0xf0]  ;;  %v10616_v8 = vld [vmem:[#allocation11 + $0x50] sm:$0xff] }
 0x439   :  { %v9617_v48 = vor.u32 %v10585_v15, %v9616_v13  ;;  %v10628_v28 = vld [vmem:[#allocation11 + $0xb0] sm:$0xff] }
 0x43a   :  { %6194 = vmatpush.bf16.msrb.mxu0 %v9221_v20  ;;  %6204 = vmatpush.bf16.msrb.mxu1 %v9413_v45  ;;  %v9490_v20 = vld [vmem:[#allocation8 + $0xe58] sm:$0xf0] }
 0x43b   :  { %6166 = vmatpush.bf16.msra.mxu2 %v9473_v23  ;;  %v9493_v45 = vor.u32 %v10551_v31, %v9490_v20  ;;  %v9477_v23 = vor.u32 %v10547_v22, %v9474_v39  ;;  %v10615_v31 = vld [vmem:[#allocation11 + $0x48] sm:$0xff] }
 0x43c   :  { %v10627_v20 = vld [vmem:[#allocation11 + $0xa8] sm:$0xff] }
 0x43e   :  { %v10705_v0 = vpop.eup %10704  ;;  %6195 = vmatpush.bf16.msrb.mxu0 %v9205_v25  ;;  %6205 = vmatpush.bf16.msrb.mxu1 %v9397_v26  ;;  %v9584_v25 = vld [vmem:[#allocation8 + $0xf08] sm:$0xf]  ;;  %v9458_v26 = vld [vmem:[#allocation8 + $0xe18] sm:$0xf0] }
 0x43f   :  { %v11236_v50 = vpack.c.bf16 %v10705_v0, %v10703_v40  ;;  %6167 = vmatpush.bf16.msra.mxu2 %v9457_v49  ;;  %v9585_v35 = vor.u32 %v10577_v30, %v9584_v25  ;;  %v9685_v40 = vor.u32 %v10599_v34, %v9682_v37  ;;  %v10595_v0 = vld [vmem:[#allocation8 + $0xfac] sm:$0xf]  ;;  %v9666_v49 = vld [vmem:[#allocation8 + $0xfb8] sm:$0xf0] }
 0x440   :  { %v10625_v30 = vld [vmem:[#allocation11 + $0x98] sm:$0xff] }
 0x441   :  { %6070 = vmatmul.bf16.vlgmr.msra.gmra.mxu3 %v11236_v50  ;;  %6196 = vmatmul.bf16.vlgmr.msrb.gmra.mxu0 %v11220_v46  ;;  %v9349_v46 = vor.u32 %v10515_v62, %v9346_v61  ;;  %v10613_v61 = vld [vmem:[#allocation11 + $0x38] sm:$0xff] }
 0x442   :  { %6174 = vmatpush.bf16.msra.mxu3 %v9697_v57  ;;  %6206 = vmatpush.bf16.msrb.mxu1 %v9381_v38  ;;  %v9669_v57 = vor.u32 %v10595_v0, %v9666_v49  ;;  %v10591_v38 = vld [vmem:[#allocation8 + $0xf8c] sm:$0xf] }
 0x443   :  { %6216 = vmatpush.bf16.msrb.mxu2 %v9573_v41  ;;  %v9650_v41 = vld [vmem:[#allocation8 + $0xf98] sm:$0xf0]  ;;  %6516 = vmatpush.bf16.msra.mxu0 %v10613_v61 }
 0x444   :  { %6168 = vmatmul.bf16.vlgmr.msra.gmra.mxu2 %v11228_v7  ;;  %v9653_v11 = vor.u32 %v10591_v38, %v9650_v41 }
 0x446   :  { %6175 = vmatpush.bf16.msra.mxu3 %v9681_v9  ;;  %6207 = vmatpush.bf16.msrb.mxu1 %v9365_v55  ;;  %v9621_v9 = vor.u32 %v10583_v36, %v9618_v54  ;;  %v10579_v55 = vld [vmem:[#allocation8 + $0xf2c] sm:$0xf] }
 0x447   :  { %6217 = vmatpush.bf16.msrb.mxu2 %v9557_v56  ;;  %v9602_v56 = vld [vmem:[#allocation8 + $0xf38] sm:$0xf0]  ;;  %6517 = vmatpush.bf16.msra.mxu0 %v10612_v3 }
 0x448   :  { %v9605_v1 = vor.u32 %v10579_v55, %v9602_v56  ;;  %v10636_v55 = vld [vmem:[#allocation11 + $0xf0] sm:$0xff] }
 0x44a   :  { %6176 = vmatpush.bf16.msra.mxu3 %v9665_v17  ;;  %6208 = vmatpush.bf16.msrb.mxu1 %v9349_v46  ;;  %v10610_v17 = vld [vmem:[#allocation11 + $0x20] sm:$0xff]  ;;  %v10609_v46 = vld [vmem:[#allocation11 + $0x18] sm:$0xff] }
 0x44b   :  { %6218 = vmatpush.bf16.msrb.mxu2 %v9541_v42  ;;  %6518 = vmatpush.bf16.msra.mxu0 %v10611_v58  ;;  %v10621_v42 = vld [vmem:[#allocation11 + $0x78] sm:$0xff] }
 0x44e   :  { %6177 = vmatpush.bf16.msra.mxu3 %v9649_v6  ;;  %6209 = vmatpush.bf16.msrb.mxu1 %v9333_v43  ;;  %v10618_v6 = vld [vmem:[#allocation11 + $0x60] sm:$0xff] }
 0x44f   :  { %6219 = vmatpush.bf16.msrb.mxu2 %v9525_v10  ;;  %6519 = vmatpush.bf16.msra.mxu0 %v10610_v17  ;;  %v10617_v10 = vld [vmem:[#allocation11 + $0x58] sm:$0xff] }
 0x451   :  { %6126 = vmatmul.bf16.vlgmr.msrb.gmra.mxu3 %v11236_v50  ;;  %6210 = vmatmul.bf16.vlgmr.msrb.gmra.mxu1 %v11224_v24  ;;  %v9461_v24 = vor.u32 %v10543_v33, %v9458_v26 }
 0x452   :  { %6178 = vmatpush.bf16.msra.mxu3 %v9633_v47  ;;  %6530 = vmatpush.bf16.msra.mxu1 %v10621_v42  ;;  %v11246_v47 = vld [vmem:[#allocation10 + $0xc] sm:$0xf]  ;;  %v10634_v42 = vld [vmem:[#allocation11 + $0xe0] sm:$0xff] }
 0x453   :  { %6220 = vmatpush.bf16.msrb.mxu2 %v9509_v12  ;;  %6520 = vmatpush.bf16.msra.mxu0 %v10609_v46  ;;  %v5372_v13 = vperm.slane %v11246_v47, 0  ;;  %v5373_v34 = vperm.slane %v11246_v47, 1  ;;  %v5374_v46 = vperm.slane %v11246_v47, 2 }
 0x456   :  { %6179 = vmatpush.bf16.msra.mxu3 %v9617_v48  ;;  %6531 = vmatpush.bf16.msra.mxu1 %v10620_v63 }
 0x457   :  { %6221 = vmatpush.bf16.msrb.mxu2 %v9493_v45  ;;  %6521 = vmatpush.bf16.msra.mxu0 %v10608_v60 }
 0x45a   :  { %6180 = vmatpush.bf16.msra.mxu3 %v9601_v19  ;;  %6532 = vmatpush.bf16.msra.mxu1 %v10619_v2 }
 0x45b   :  { %6222 = vmatpush.bf16.msrb.mxu2 %v9477_v23  ;;  %6522 = vmatpush.bf16.msra.mxu0 %v10607_v18 }
 0x45e   :  { %6181 = vmatpush.bf16.msra.mxu3 %v9585_v35  ;;  %6533 = vmatpush.bf16.msra.mxu1 %v10618_v6 }
 0x45f   :  { %6223 = vmatpush.bf16.msrb.mxu2 %v9461_v24  ;;  %6523 = vmatpush.bf16.msra.mxu0 %v10606_v44  ;;  %v10624_v24 = vld [vmem:[#allocation11 + $0x90] sm:$0xff] }
 0x461   :  { %6182 = vmatmul.bf16.vlgmr.msra.gmra.mxu3 %v11236_v50 }
 0x462   :  { %6230 = vmatpush.bf16.msrb.mxu3 %v9701_v51  ;;  %6224 = vmatmul.bf16.vlgmr.msrb.gmra.mxu2 %v11228_v7  ;;  %v9586_v7 = vld [vmem:[#allocation8 + $0xf18] sm:$0xf0] }
 0x463   :  { %v9589_v62 = vor.u32 %v10575_v32, %v9586_v7  ;;  %6534 = vmatpush.bf16.msra.mxu1 %v10617_v10  ;;  %6544 = vmatpush.bf16.msra.mxu2 %v10629_v4  ;;  %v10635_v7 = vld [vmem:[#allocation11 + $0xe8] sm:$0xff] }
 0x466   :  { %6231 = vmatpush.bf16.msrb.mxu3 %v9685_v40  ;;  %v10623_v40 = vld [vmem:[#allocation11 + $0x88] sm:$0xff] }
 0x467   :  { %6535 = vmatpush.bf16.msra.mxu1 %v10616_v8  ;;  %6545 = vmatpush.bf16.msra.mxu2 %v10628_v28  ;;  %v10632_v8 = vld [vmem:[#allocation11 + $0xd0] sm:$0xff] }
 0x46a   :  { %6232 = vmatpush.bf16.msrb.mxu3 %v9669_v57 }
 0x46b   :  { %6536 = vmatpush.bf16.msra.mxu1 %v10615_v31  ;;  %6546 = vmatpush.bf16.msra.mxu2 %v10627_v20  ;;  %v10631_v31 = vld [vmem:[#allocation11 + $0xc8] sm:$0xff] }
 0x46e   :  { %6233 = vmatpush.bf16.msrb.mxu3 %v9653_v11  ;;  %v10622_v11 = vld [vmem:[#allocation11 + $0x80] sm:$0xff] }
 0x46f   :  { %6537 = vmatpush.bf16.msra.mxu1 %v10614_v21  ;;  %6547 = vmatpush.bf16.msra.mxu2 %v10626_v14 }
 0x472   :  { %6234 = vmatpush.bf16.msrb.mxu3 %v9637_v16 }
 0x473   :  { %6548 = vmatpush.bf16.msra.mxu2 %v10625_v30 }
 0x476   :  { %6235 = vmatpush.bf16.msrb.mxu3 %v9621_v9 }
 0x477   :  { %6549 = vmatpush.bf16.msra.mxu2 %v10624_v24 }
 0x47a   :  { %6236 = vmatpush.bf16.msrb.mxu3 %v9605_v1 }
 0x47b   :  { %6550 = vmatpush.bf16.msra.mxu2 %v10623_v40 }
 0x47e   :  { %6237 = vmatpush.bf16.msrb.mxu3 %v9589_v62  ;;  %v6029_v5 = vpop.f32.mrf.mxu0 }
 0x47f   :  { %v6030_v48 = vadd.f32 %v6029_v5, %v5372_v13  ;;  %6551 = vmatpush.bf16.msra.mxu2 %v10622_v11  ;;  %v10633_v5 = vld [vmem:[#allocation11 + $0xd8] sm:$0xff] }
 0x481   :  { %6238 = vmatmul.bf16.vlgmr.msrb.gmra.mxu3 %v11236_v50 }
 0x482   :  { %6558 = vmatpush.bf16.msra.mxu3 %v10637_v52  ;;  %v10657_v52 = vld [vmem:[#allocation13] ss:$0 sm:$0xff] }
 0x486   :  { %v6031_v59 = vpop.f32.mrf.mxu0  ;;  %6559 = vmatpush.bf16.msra.mxu3 %v10636_v55 }
 0x487   :  { %v6032_v19 = vadd.f32 %v6031_v59, %v5372_v13 }
 0x48a   :  { %6560 = vmatpush.bf16.msra.mxu3 %v10635_v7 }
 0x48e   :  { %v6043_v50 = vpop.f32.mrf.mxu1  ;;  %v6085_v39 = vpop.f32.mrf.mxu0  ;;  %6561 = vmatpush.bf16.msra.mxu3 %v10634_v42 }
 0x48f   :  { %v6044_v22 = vadd.f32 %v6043_v50, %v6030_v48  ;;  %v6086_v57 = vadd.f32 %v6085_v39, %v5373_v34  ;;  %v10630_v48 = vld [vmem:[#allocation11 + $0xc0] sm:$0xff] }
 0x492   :  { %6562 = vmatpush.bf16.msra.mxu3 %v10633_v5 }
 0x496   :  { %v6045_v12 = vpop.f32.mrf.mxu1  ;;  %v6087_v37 = vpop.f32.mrf.mxu0  ;;  %6563 = vmatpush.bf16.msra.mxu3 %v10632_v8 }
 0x497   :  { %v6046_v33 = vadd.f32 %v6045_v12, %v6032_v19  ;;  %v6088_v54 = vadd.f32 %v6087_v37, %v5373_v34 }
 0x49a   :  { %6564 = vmatpush.bf16.msra.mxu3 %v10631_v31 }
 0x49e   :  { %v6099_v23 = vpop.f32.mrf.mxu1  ;;  %6565 = vmatpush.bf16.msra.mxu3 %v10630_v48 }
 0x49f   :  { %v6100_v16 = vadd.f32 %v6099_v23, %v6086_v57  ;;  %v5375_v23 = vperm.slane %v11246_v47, 3 }
 0x4a0   :  { %v6141_v1 = vpop.f32.mrf.mxu0 }
 0x4a1   :  { %v6142_v63 = vadd.f32 %v6141_v1, %v5374_v46 }
 0x4a4   :  { %v6057_v43 = vpop.f32.mrf.mxu2 }
 0x4a5   :  { %v6058_v25 = vadd.f32 %v6057_v43, %v6044_v22 }
 0x4a6   :  { %v6101_v0 = vpop.f32.mrf.mxu1 }
 0x4a7   :  { %v6102_v56 = vadd.f32 %v6101_v0, %v6088_v54 }
 0x4a8   :  { %v6143_v18 = vpop.f32.mrf.mxu0 }
 0x4a9   :  { %v6144_v10 = vadd.f32 %v6143_v18, %v5374_v46 }
 0x4ac   :  { %v6059_v15 = vpop.f32.mrf.mxu2 }
 0x4ad   :  { %v6060_v29 = vadd.f32 %v6059_v15, %v6046_v33 }
 0x4ae   :  { %v6155_v61 = vpop.f32.mrf.mxu1 }
 0x4af   :  { %v6156_v44 = vadd.f32 %v6155_v61, %v6142_v63 }
 0x4b4   :  { %v6113_v26 = vpop.f32.mrf.mxu2 }
 0x4b5   :  { %v6114_v9 = vadd.f32 %v6113_v26, %v6100_v16 }
 0x4b6   :  { %v6157_v6 = vpop.f32.mrf.mxu1 }
 0x4b7   :  { %v6158_v28 = vadd.f32 %v6157_v6, %v6144_v10 }
 0x4bc   :  { %v6115_v38 = vpop.f32.mrf.mxu2 }
 0x4bd   :  { %v6116_v62 = vadd.f32 %v6115_v38, %v6102_v56 }
 0x4be   :  { %v6197_v22 = vpop.f32.mrf.mxu0 }
 0x4c4   :  { %v6071_v45 = vpop.f32.mrf.mxu3 }
 0x4c5   :  { %v6072_v27 = vadd.f32 %v6071_v45, %v6058_v25  ;;  %v6198_v25 = vadd.f32 %v6197_v22, %v5375_v23 }
 0x4c6   :  { %v6199_v30 = vpop.f32.mrf.mxu0 }
 0x4c7   :  { %10706 = vtanh.f32 %v6072_v27  ;;  %v6169_v17 = vpop.f32.mrf.mxu2 }
 0x4c8   :  { %v6170_v4 = vadd.f32 %v6169_v17, %v6156_v44 }
 0x4cc   :  { %v6073_v35 = vpop.f32.mrf.mxu3 }
 0x4cd   :  { %v6074_v51 = vadd.f32 %v6073_v35, %v6060_v29  ;;  %v10707_v49 = vpop.eup %10706  ;;  %v6200_v29 = vadd.f32 %v6199_v30, %v5375_v23 }
 0x4ce   :  { %v6211_v39 = vpop.f32.mrf.mxu1 }
 0x4cf   :  { %10708 = vtanh.f32 %v6074_v51  ;;  %v6171_v59 = vpop.f32.mrf.mxu2  ;;  %v6212_v26 = vadd.f32 %v6211_v39, %v6198_v25 }
 0x4d0   :  { %v6172_v13 = vadd.f32 %v6171_v59, %v6158_v28 }
 0x4d4   :  { %v6127_v41 = vpop.f32.mrf.mxu3 }
 0x4d5   :  { %v10709_v53 = vpop.eup %10708  ;;  %v6128_v32 = vadd.f32 %v6127_v41, %v6114_v9 }
 0x4d6   :  { %v6252_v36 = vpack.c.bf16 %v10709_v53, %v10707_v49  ;;  %v6213_v27 = vpop.f32.mrf.mxu1 }
 0x4d7   :  { %10710 = vtanh.f32 %v6128_v32  ;;  %v6214_v51 = vadd.f32 %v6213_v27, %v6200_v29 }
 0x4d8   :  { %6524 = vmatmul.bf16.vlgmr.msra.gmra.mxu0 %v6252_v36 }
 0x4dc   :  { %v6129_v3 = vpop.f32.mrf.mxu3 }
 0x4dd   :  { %v6130_v58 = vadd.f32 %v6129_v3, %v6116_v62  ;;  %v10711_v60 = vpop.eup %10710 }
 0x4df   :  { %10712 = vtanh.f32 %v6130_v58 }
 0x4e4   :  { %v6183_v2 = vpop.f32.mrf.mxu3 }
 0x4e5   :  { %v10713_v50 = vpop.eup %10712  ;;  %v6184_v12 = vadd.f32 %v6183_v2, %v6170_v4  ;;  %v6225_v19 = vpop.f32.mrf.mxu2 }
 0x4e6   :  { %v6253_v43 = vpack.c.bf16 %v10713_v50, %v10711_v60  ;;  %v6226_v35 = vadd.f32 %v6225_v19, %v6212_v26 }
 0x4e7   :  { %10714 = vtanh.f32 %v6184_v12 }
 0x4e8   :  { %6538 = vmatmul.bf16.vlgmr.msra.gmra.mxu1 %v6253_v43 }
 0x4ec   :  { %v6185_v15 = vpop.f32.mrf.mxu3 }
 0x4ed   :  { %v6186_v20 = vadd.f32 %v6185_v15, %v6172_v13  ;;  %v10715_v45 = vpop.eup %10714  ;;  %v6227_v24 = vpop.f32.mrf.mxu2 }
 0x4ee   :  { %v6228_v37 = vadd.f32 %v6227_v24, %v6214_v51 }
 0x4ef   :  { %10716 = vtanh.f32 %v6186_v20 }
 0x4f5   :  { %v10717_v21 = vpop.eup %10716 }
 0x4f6   :  { %v6254_v14 = vpack.c.bf16 %v10717_v21, %v10715_v45 }
 0x4f8   :  { %6552 = vmatmul.bf16.vlgmr.msra.gmra.mxu2 %v6254_v14 }
 0x504   :  { %v6239_v33 = vpop.f32.mrf.mxu3 }
 0x505   :  { %v6240_v34 = vadd.f32 %v6239_v33, %v6226_v35 }
 0x507   :  { %10718 = vtanh.f32 %v6240_v34 }
 0x50c   :  { %v6241_v40 = vpop.f32.mrf.mxu3 }
 0x50d   :  { %v6242_v0 = vadd.f32 %v6241_v40, %v6228_v37  ;;  %v10719_v49 = vpop.eup %10718 }
 0x50f   :  { %10720 = vtanh.f32 %v6242_v0 }
 0x515   :  { %v10721_v57 = vpop.eup %10720 }
 0x516   :  { %v6255_v38 = vpack.c.bf16 %v10721_v57, %v10719_v49 }
 0x518   :  { %6566 = vmatmul.bf16.vlgmr.msra.gmra.mxu3 %v6255_v38 }
 0x555   :  { %v6525_v47 = vpop.f32.mrf.mxu0 }
 0x556   :  { %v6526_v54 = vadd.f32 %v10657_v52, %v6525_v47 }
 0x55d   :  { %v6527_v53 = vpop.f32.mrf.mxu0 }
 0x55e   :  { %v6528_v9 = vadd.f32 %v10657_v52, %v6527_v53 }
 0x565   :  { %v6539_v41 = vpop.f32.mrf.mxu1 }
 0x566   :  { %v6540_v56 = vadd.f32 %v6539_v41, %v6526_v54 }
 0x56d   :  { %v6541_v36 = vpop.f32.mrf.mxu1 }
 0x56e   :  { %v6542_v1 = vadd.f32 %v6541_v36, %v6528_v9 }
 0x57b   :  { %v6553_v11 = vpop.f32.mrf.mxu2 }
 0x57c   :  { %v6554_v32 = vadd.f32 %v6553_v11, %v6540_v56 }
 0x583   :  { %v6555_v55 = vpop.f32.mrf.mxu2 }
 0x584   :  { %v6556_v7 = vadd.f32 %v6555_v55, %v6542_v1 }
 0x59b   :  { %v6567_v16 = vpop.f32.mrf.mxu3 }
 0x59c   :  { %v6568_v61 = vadd.f32 %v6567_v16, %v6554_v32 }
 0x5a3   :  { %v6569_v62 = vpop.f32.mrf.mxu3 }
 0x5a4   :  { %v6570_v3 = vadd.f32 %v6569_v62, %v6556_v7 }
 0x5a6   :  { %v10641_v58 = vpack.c.bf16 %v6570_v3, %v6568_v61 }
 0x5a8   :  { %10642 = vst [vmem:[#allocation14] sm:$0xff] %v10641_v58  }
 0x5a9   :  { %6588 = dma.vmem_to_hbm [thread:$0]  %s6581_s6, 128, %s6583_s15, [#allocation4], %s10930_s19, %s10930_s19, %s10931_s20  }
 0x5aa   :  { %10923 = dma.done.wait [#allocation4], 128  }
 0x5ab   :  { %10924 = vsyncadd [#allocation4], 4294967168 }
 0x5ac   :  { %6593 = vsyncpa [#allocation3], 1 }
 0x5ad   :  { %6594 = vsyncpa [#allocation6], 1 }
 0x5ae   :  { %6595 = vsyncpa [#allocation9], 1 }
 0x5af   :  { %6596 = vsyncpa [#allocation12], 1 }
 0x5b0   :  { %6597 = vsyncpa [#allocation4], 1 }

</bundles_post_ra>
